<compile_context>
chip_gen: v7x
topology: tpu7x:2x2x1
jax: 0.10.0
libtpu: 0.0.40
codegen_flags: <defaults>
</compile_context>

<pallas_src>
import math
from functools import partial

import jax
import jax.numpy as jnp
from jax.experimental import pallas as pl
from jax.experimental.pallas import tpu as pltpu


# ----------------------------------------------------------------------------
# helpers
# ----------------------------------------------------------------------------
def _zero_map(ndim):
    return lambda i: (0,) * ndim


def _round8(n):
    return ((n + 7) // 8) * 8


# ----------------------------------------------------------------------------
# in-kernel building blocks (activations are values of shape (Cout, S))
# ----------------------------------------------------------------------------
def _affine(y, s_ref, b_ref, relu):
    y = y * s_ref[...] + b_ref[...]
    if relu:
        y = jnp.maximum(y, 0.0)
    return y


def _conv1x1(x, wt_ref, s_ref, b_ref, relu):
    y = jnp.dot(wt_ref[...], x, preferred_element_type=jnp.float32)
    return _affine(y, s_ref, b_ref, relu)


def _conv3x3(x, interior, pad_ref, w9t_ref, s_ref, b_ref, relu, *, Wp, S, halo):
    """3x3 conv (padding=1) in the padded lane layout.

    x: (Cin, S) activation in padded-board layout (values at padding lanes are
    arbitrary; they are masked here before being written to the halo'ed scratch
    so that every tap read of an off-board neighbour returns exactly zero).
    The 9 taps are statically shifted lane windows of pad_ref, stacked along
    sublanes (Cin padded to a multiple of 8 -> aligned concat) and contracted
    with a single matmul against the (Cout, 9*Cin) weight.
    """
    cin = x.shape[0]
    pad_ref[pl.ds(0, cin), pl.ds(halo, S)] = x * interior
    taps = []
    for dh in range(3):
        for dw in range(3):
            off = halo + (dh - 1) * Wp + (dw - 1)
            taps.append(pad_ref[pl.ds(0, cin), pl.ds(off, S)])
    stacked = jnp.concatenate(taps, axis=0)                       # (9*Cin, S)
    y = jnp.dot(w9t_ref[...], stacked, preferred_element_type=jnp.float32)
    return _affine(y, s_ref, b_ref, relu)


# ----------------------------------------------------------------------------
# the single fused kernel
# ----------------------------------------------------------------------------
def _fused_kernel(*refs, plan, B, H, W):
    Hp, Wp = H + 2, W + 2
    P1 = Hp * Wp          # padded board size per batch element
    HW = H * W
    S = B * P1            # total lane extent of an activation
    halo = Wp + 1         # extra lanes on each side of the conv scratch

    pol_ref = refs[-3]
    val_ref = refs[-2]
    pad_ref = refs[-1]
    it = iter(refs[:-3])

    # zero only the halo strips of the conv scratch (interior is always written
    # before it is read); done once for the whole forward pass.
    zrows = pad_ref.shape[0]
    pad_ref[:, pl.ds(0, halo)] = jnp.zeros((zrows, halo), jnp.float32)
    pad_ref[:, pl.ds(halo + S, halo)] = jnp.zeros((zrows, halo), jnp.float32)

    interior = next(it)[...]          # (1, S)  1 on real board cells, 0 on padding
    sel_ref = next(it)                # (B, S)  1 on lanes belonging to batch b
    x_in = next(it)[...]              # (Cin_pad, S) padded input planes

    # ---- stem: 3x3 conv + folded BN + ReLU ----
    w0, s0, b0 = next(it), next(it), next(it)
    act = _conv3x3(x_in, interior, pad_ref, w0, s0, b0, True, Wp=Wp, S=S, halo=halo)
    act = act * interior              # keep padding lanes exactly zero

    # ---- body ----
    for kind in plan:
        if kind == "g":               # gumbel-AZ residual block
            w1, s1, b1 = next(it), next(it), next(it)
            w2, s2, b2 = next(it), next(it), next(it)
            w3, s3, b3 = next(it), next(it), next(it)
            w4, s4, b4 = next(it), next(it), next(it)
            h = _conv1x1(act, w1, s1, b1, True)
            h = _conv3x3(h, interior, pad_ref, w2, s2, b2, True, Wp=Wp, S=S, halo=halo)
            h = _conv3x3(h, interior, pad_ref, w3, s3, b3, True, Wp=Wp, S=S, halo=halo)
            h = _conv1x1(h, w4, s4, b4, False)
            y = h + act
            act = (y * jax.nn.sigmoid(y)) * interior              # SiLU + re-zero padding
        else:                         # ResBlockAlt(PoolBias)
            wa, sa, ba = next(it), next(it), next(it)
            wb, sb, bb = next(it), next(it), next(it)
            wlmax, wlmean, bl = next(it), next(it), next(it)
            wo, so, bo = next(it), next(it), next(it)
            a = _conv1x1(act, wa, sa, ba, True)                   # (C, S)
            bfr = _conv1x1(act, wb, sb, bb, True)                 # (C, S)
            c = a
            for b in range(B):
                blk = bfr[:, b * P1:(b + 1) * P1]                 # (C, P1)
                mb = interior[:, b * P1:(b + 1) * P1] > 0.0       # (1, P1)
                bmax = jnp.max(jnp.where(mb, blk, jnp.float32(-1e30)),
                               axis=1, keepdims=True)             # (C, 1)
                bmean = jnp.sum(jnp.where(mb, blk, 0.0),
                                axis=1, keepdims=True) * (1.0 / HW)
                bvec = (jnp.dot(wlmax[...], bmax, preferred_element_type=jnp.float32)
                        + jnp.dot(wlmean[...], bmean, preferred_element_type=jnp.float32)
                        + bl[...])                                # (C, 1)
                c = c + bvec * sel_ref[b:b + 1, :]                # broadcast onto batch b lanes
            h = _conv1x1(c, wo, so, bo, False)
            y = h + act
            act = (y * jax.nn.sigmoid(y)) * interior

    # ---- heads (both 1x1 head convs fused into one (2, C) matmul) ----
    wc, sc, bc = next(it), next(it), next(it)
    wlp, blp = next(it), next(it)         # policy linear, scattered to padded rows
    wl1, bl1 = next(it), next(it)         # value linear 1, scattered to padded rows
    wl2, bl2 = next(it), next(it)
    q = _conv1x1(act, wc, sc, bc, True)                           # (2, S)
    for b in range(B):
        qb = q[:, b * P1:(b + 1) * P1]                            # (2, P1)
        pol_ref[b:b + 1, :] = (jnp.dot(qb[0:1, :], wlp[...],
                                       preferred_element_type=jnp.float32)
                               + blp[...])
        hid = jnp.maximum(jnp.dot(qb[1:2, :], wl1[...],
                                  preferred_element_type=jnp.float32) + bl1[...], 0.0)
        val_ref[b:b + 1, :] = jnp.tanh(jnp.dot(hid, wl2[...],
                                               preferred_element_type=jnp.float32)
                                       + bl2[...])


# ----------------------------------------------------------------------------
# parameters (synthetic, deterministic, BN folded, kernel-ready layouts)
# ----------------------------------------------------------------------------
def make_params(key, *, board_size, in_channels, channels, num_blocks,
                value_head_hidden, broadcast_every):
    H = W = board_size
    Hp, Wp = H + 2, W + 2
    P1 = Hp * Wp
    HW = H * W
    C = channels
    bC = C // 2
    in_pad = _round8(in_channels)
    bC_pad = _round8(bC)
    Hd = value_head_hidden

    keys = iter(jax.random.split(key, 1024))

    def nk():
        return next(keys)

    def _normal(shape, scale):
        return (scale * jax.random.normal(nk(), shape)).astype(jnp.float32)

    def conv1x1(cin, cout, cin_pad=None, cout_pad=None):
        cin_pad = cin if cin_pad is None else cin_pad
        cout_pad = cout if cout_pad is None else cout_pad
        w = jnp.zeros((cout_pad, cin_pad), jnp.float32)
        w = w.at[:cout, :cin].set(_normal((cout, cin), 1.0 / math.sqrt(cin)))
        s = jnp.zeros((cout_pad, 1), jnp.float32).at[:cout].set(1.0 + _normal((cout, 1), 0.1))
        b = jnp.zeros((cout_pad, 1), jnp.float32).at[:cout].set(_normal((cout, 1), 0.1))
        return dict(w=w, s=s, b=b)

    def conv3x3(cin, cout, cin_pad=None, cout_pad=None):
        cin_pad = cin if cin_pad is None else cin_pad
        cout_pad = cout if cout_pad is None else cout_pad
        w = jnp.zeros((cout_pad, 9, cin_pad), jnp.float32)
        w = w.at[:cout, :, :cin].set(_normal((cout, 9, cin), 1.0 / math.sqrt(9 * cin)))
        w = w.reshape(cout_pad, 9 * cin_pad)
        s = jnp.zeros((cout_pad, 1), jnp.float32).at[:cout].set(1.0 + _normal((cout, 1), 0.1))
        b = jnp.zeros((cout_pad, 1), jnp.float32).at[:cout].set(_normal((cout, 1), 0.1))
        return dict(w=w, s=s, b=b)

    blocks = []
    for i in range(num_blocks):
        if (i + 1) % broadcast_every != 0:
            blocks.append(dict(
                c1=conv1x1(C, bC, cout_pad=bC_pad),
                c2=conv3x3(bC, bC, cin_pad=bC_pad, cout_pad=bC_pad),
                c3=conv3x3(bC, bC, cin_pad=bC_pad, cout_pad=bC_pad),
                c4=conv1x1(bC, C, cin_pad=bC_pad),
            ))
        else:
            wl = _normal((C, 2 * C), 1.0 / math.sqrt(2 * C))
            blocks.append(dict(
                pa=conv1x1(C, C),
                pb=conv1x1(C, C),
                wlmax=wl[:, :C],              # acts on the max-pooled half
                wlmean=wl[:, C:],             # acts on the mean-pooled half
                bl=_normal((C, 1), 0.1),
                pout=conv1x1(C, C),
            ))

    # heads: policy + value 1x1 convs fused into one (2, C) matmul
    pol_c = conv1x1(C, 1)
    val_c = conv1x1(C, 1)
    wc = jnp.concatenate([pol_c["w"], val_c["w"]], axis=0)          # (2, C)
    sc = jnp.concatenate([pol_c["s"], val_c["s"]], axis=0)          # (2, 1)
    bc = jnp.concatenate([pol_c["b"], val_c["b"]], axis=0)          # (2, 1)

    # head linear weights scattered to padded-board rows (zero rows on padding)
    hh = jnp.arange(HW) // W
    ww = jnp.arange(HW) % W
    idx = (hh + 1) * Wp + (ww + 1)
    wlp = _normal((HW, HW + 1), 1.0 / math.sqrt(HW))
    wl1 = _normal((HW, Hd), 1.0 / math.sqrt(HW))
    wlp_pad = jnp.zeros((P1, HW + 1), jnp.float32).at[idx].set(wlp)
    wl1_pad = jnp.zeros((P1, Hd), jnp.float32).at[idx].set(wl1)

    heads = dict(
        wc=wc, sc=sc, bc=bc,
        wlp=wlp_pad, blp=_normal((1, HW + 1), 0.1),
        wl1=wl1_pad, bl1=_normal((1, Hd), 0.1),
        wl2=_normal((Hd, 1), 1.0 / math.sqrt(Hd)), bl2=_normal((1, 1), 0.1),
    )

    return dict(conv1=conv3x3(in_channels, C, cin_pad=in_pad),
                blocks=blocks, heads=heads)


def _flatten_params(params):
    args, plan = [], []
    c1 = params["conv1"]
    args += [c1["w"], c1["s"], c1["b"]]
    for bp in params["blocks"]:
        if "c1" in bp:
            plan.append("g")
            for n in ("c1", "c2", "c3", "c4"):
                args += [bp[n]["w"], bp[n]["s"], bp[n]["b"]]
        else:
            plan.append("p")
            for n in ("pa", "pb"):
                args += [bp[n]["w"], bp[n]["s"], bp[n]["b"]]
            args += [bp["wlmax"], bp["wlmean"], bp["bl"]]
            args += [bp["pout"]["w"], bp["pout"]["s"], bp["pout"]["b"]]
    hp = params["heads"]
    args += [hp["wc"], hp["sc"], hp["bc"], hp["wlp"], hp["blp"],
             hp["wl1"], hp["bl1"], hp["wl2"], hp["bl2"]]
    return args, tuple(plan)


# ----------------------------------------------------------------------------
# forward pass: one fused pallas_call
# ----------------------------------------------------------------------------
def pv_forward(params, x_nchw):
    f32 = jnp.float32
    B, Cin, H, W = x_nchw.shape
    Hp, Wp = H + 2, W + 2
    P1 = Hp * Wp
    HW = H * W
    S = B * P1
    halo = Wp + 1
    C = params["conv1"]["w"].shape[0]
    in_pad = params["conv1"]["w"].shape[1] // 9
    Hd = params["heads"]["wl1"].shape[1]

    pad_rows = in_pad
    for bp in params["blocks"]:
        if "c2" in bp:
            pad_rows = max(pad_rows, bp["c2"]["w"].shape[1] // 9)

    # input planes in padded lane layout (Cin padded to a multiple of 8)
    xp = jnp.pad(x_nchw.astype(f32), ((0, 0), (0, 0), (1, 1), (1, 1)))
    x_lane = jnp.transpose(xp, (1, 0, 2, 3)).reshape(Cin, S)
    x_in = jnp.zeros((in_pad, S), f32).at[:Cin].set(x_lane)

    hh = jnp.arange(Hp)
    ww = jnp.arange(Wp)
    interior_board = ((hh[:, None] >= 1) & (hh[:, None] <= H)
                      & (ww[None, :] >= 1) & (ww[None, :] <= W)).astype(f32)
    interior = jnp.tile(interior_board.reshape(1, P1), (1, B))      # (1, S)
    sel = (jnp.arange(S)[None, :] // P1
           == jnp.arange(B)[:, None]).astype(f32)                   # (B, S)

    pargs, plan = _flatten_params(params)
    args = [interior, sel, x_in] + pargs

    n_g = sum(1 for k in plan if k == "g")
    n_p = len(plan) - n_g
    bCp = pad_rows
    flops = 2 * S * 9 * in_pad * C
    flops += n_g * 2 * S * (C * bCp + 2 * 9 * bCp * bCp + bCp * C)
    flops += n_p * (2 * S * 3 * C * C + 4 * B * C * C + 2 * B * C * S)
    flops += 2 * S * 2 * C + 2 * B * P1 * (HW + 1 + Hd) + 2 * B * Hd
    trans = (n_g + n_p) * S * C + B
    bytes_accessed = int(sum(int(a.size) * a.dtype.itemsize for a in args)
                         + 4 * B * (HW + 2))
    cost = pl.CostEstimate(flops=int(flops), transcendentals=int(trans),
                           bytes_accessed=bytes_accessed)

    kernel = partial(_fused_kernel, plan=plan, B=B, H=H, W=W)
    return pl.pallas_call(
        kernel,
        out_shape=(jax.ShapeDtypeStruct((B, HW + 1), f32),
                   jax.ShapeDtypeStruct((B, 1), f32)),
        grid=(1,),
        in_specs=[pl.BlockSpec(a.shape, _zero_map(a.ndim)) for a in args],
        out_specs=(pl.BlockSpec((B, HW + 1), _zero_map(2)),
                   pl.BlockSpec((B, 1), _zero_map(2))),
        scratch_shapes=[pltpu.VMEM((pad_rows, S + 2 * halo), f32)],
        compiler_params=pltpu.CompilerParams(dimension_semantics=("arbitrary",)),
        cost_estimate=cost,
    )(*args)


# ----------------------------------------------------------------------------
if __name__ == "__main__":
    cfg = dict(board_size=9, in_channels=4, channels=8, num_blocks=3,
               value_head_hidden=32, broadcast_every=3)
    key = jax.random.PRNGKey(0)
    pkey, xkey = jax.random.split(key)

    params = make_params(pkey, **cfg)
    x = jax.random.normal(
        xkey, (2, cfg["in_channels"], cfg["board_size"], cfg["board_size"]),
        jnp.float32)

    policy, value = jax.jit(pv_forward)(params, x)
    jax.block_until_ready((policy, value))

    assert policy.shape == (2, cfg["board_size"] ** 2 + 1), policy.shape
    assert value.shape == (2, 1), value.shape
    assert bool(jnp.all(jnp.isfinite(policy))) and bool(jnp.all(jnp.isfinite(value)))
    print("KERNEL_OK")
</pallas_src>

<mosaic_0001>
module attributes {stable_mosaic.version = 11 : i64} {
  func.func @_fused_kernel(%arg0: i32, %arg1: memref<1x242xf32, #tpu.memory_space<vmem>>, %arg2: memref<2x242xf32, #tpu.memory_space<vmem>>, %arg3: memref<8x242xf32, #tpu.memory_space<vmem>>, %arg4: memref<8x72xf32, #tpu.memory_space<vmem>>, %arg5: memref<8x1xf32, #tpu.memory_space<vmem>>, %arg6: memref<8x1xf32, #tpu.memory_space<vmem>>, %arg7: memref<8x8xf32, #tpu.memory_space<vmem>>, %arg8: memref<8x1xf32, #tpu.memory_space<vmem>>, %arg9: memref<8x1xf32, #tpu.memory_space<vmem>>, %arg10: memref<8x72xf32, #tpu.memory_space<vmem>>, %arg11: memref<8x1xf32, #tpu.memory_space<vmem>>, %arg12: memref<8x1xf32, #tpu.memory_space<vmem>>, %arg13: memref<8x72xf32, #tpu.memory_space<vmem>>, %arg14: memref<8x1xf32, #tpu.memory_space<vmem>>, %arg15: memref<8x1xf32, #tpu.memory_space<vmem>>, %arg16: memref<8x8xf32, #tpu.memory_space<vmem>>, %arg17: memref<8x1xf32, #tpu.memory_space<vmem>>, %arg18: memref<8x1xf32, #tpu.memory_space<vmem>>, %arg19: memref<8x8xf32, #tpu.memory_space<vmem>>, %arg20: memref<8x1xf32, #tpu.memory_space<vmem>>, %arg21: memref<8x1xf32, #tpu.memory_space<vmem>>, %arg22: memref<8x72xf32, #tpu.memory_space<vmem>>, %arg23: memref<8x1xf32, #tpu.memory_space<vmem>>, %arg24: memref<8x1xf32, #tpu.memory_space<vmem>>, %arg25: memref<8x72xf32, #tpu.memory_space<vmem>>, %arg26: memref<8x1xf32, #tpu.memory_space<vmem>>, %arg27: memref<8x1xf32, #tpu.memory_space<vmem>>, %arg28: memref<8x8xf32, #tpu.memory_space<vmem>>, %arg29: memref<8x1xf32, #tpu.memory_space<vmem>>, %arg30: memref<8x1xf32, #tpu.memory_space<vmem>>, %arg31: memref<8x8xf32, #tpu.memory_space<vmem>>, %arg32: memref<8x1xf32, #tpu.memory_space<vmem>>, %arg33: memref<8x1xf32, #tpu.memory_space<vmem>>, %arg34: memref<8x8xf32, #tpu.memory_space<vmem>>, %arg35: memref<8x1xf32, #tpu.memory_space<vmem>>, %arg36: memref<8x1xf32, #tpu.memory_space<vmem>>, %arg37: memref<8x8xf32, #tpu.memory_space<vmem>>, %arg38: memref<8x8xf32, #tpu.memory_space<vmem>>, %arg39: memref<8x1xf32, #tpu.memory_space<vmem>>, %arg40: memref<8x8xf32, #tpu.memory_space<vmem>>, %arg41: memref<8x1xf32, #tpu.memory_space<vmem>>, %arg42: memref<8x1xf32, #tpu.memory_space<vmem>>, %arg43: memref<2x8xf32, #tpu.memory_space<vmem>>, %arg44: memref<2x1xf32, #tpu.memory_space<vmem>>, %arg45: memref<2x1xf32, #tpu.memory_space<vmem>>, %arg46: memref<121x82xf32, #tpu.memory_space<vmem>>, %arg47: memref<1x82xf32, #tpu.memory_space<vmem>>, %arg48: memref<121x32xf32, #tpu.memory_space<vmem>>, %arg49: memref<1x32xf32, #tpu.memory_space<vmem>>, %arg50: memref<32x1xf32, #tpu.memory_space<vmem>>, %arg51: memref<1x1xf32, #tpu.memory_space<vmem>>, %arg52: memref<2x82xf32, #tpu.memory_space<vmem>>, %arg53: memref<2x1xf32, #tpu.memory_space<vmem>>, %arg54: memref<8x266xf32, #tpu.memory_space<vmem>>) attributes {dimension_semantics = [#tpu.dimension_semantics<arbitrary>], iteration_bounds = array<i64: 1>, scalar_prefetch = 0 : i64, scratch_operands = 1 : i64, tpu.core_type = #tpu.core_type<tc>, window_params = [{pipeline_mode = #tpu.pipeline_mode<synchronous>, transform_indices = @transform_0, window_bounds = array<i64: 1, 242>}, {pipeline_mode = #tpu.pipeline_mode<synchronous>, transform_indices = @transform_1, window_bounds = array<i64: 2, 242>}, {pipeline_mode = #tpu.pipeline_mode<synchronous>, transform_indices = @transform_2, window_bounds = array<i64: 8, 242>}, {pipeline_mode = #tpu.pipeline_mode<synchronous>, transform_indices = @transform_3, window_bounds = array<i64: 8, 72>}, {pipeline_mode = #tpu.pipeline_mode<synchronous>, transform_indices = @transform_4, window_bounds = array<i64: 8, 1>}, {pipeline_mode = #tpu.pipeline_mode<synchronous>, transform_indices = @transform_5, window_bounds = array<i64: 8, 1>}, {pipeline_mode = #tpu.pipeline_mode<synchronous>, transform_indices = @transform_6, window_bounds = array<i64: 8, 8>}, {pipeline_mode = #tpu.pipeline_mode<synchronous>, transform_indices = @transform_7, window_bounds = array<i64: 8, 1>}, {pipeline_mode = #tpu.pipeline_mode<synchronous>, transform_indices = @transform_8, window_bounds = array<i64: 8, 1>}, {pipeline_mode = #tpu.pipeline_mode<synchronous>, transform_indices = @transform_9, window_bounds = array<i64: 8, 72>}, {pipeline_mode = #tpu.pipeline_mode<synchronous>, transform_indices = @transform_10, window_bounds = array<i64: 8, 1>}, {pipeline_mode = #tpu.pipeline_mode<synchronous>, transform_indices = @transform_11, window_bounds = array<i64: 8, 1>}, {pipeline_mode = #tpu.pipeline_mode<synchronous>, transform_indices = @transform_12, window_bounds = array<i64: 8, 72>}, {pipeline_mode = #tpu.pipeline_mode<synchronous>, transform_indices = @transform_13, window_bounds = array<i64: 8, 1>}, {pipeline_mode = #tpu.pipeline_mode<synchronous>, transform_indices = @transform_14, window_bounds = array<i64: 8, 1>}, {pipeline_mode = #tpu.pipeline_mode<synchronous>, transform_indices = @transform_15, window_bounds = array<i64: 8, 8>}, {pipeline_mode = #tpu.pipeline_mode<synchronous>, transform_indices = @transform_16, window_bounds = array<i64: 8, 1>}, {pipeline_mode = #tpu.pipeline_mode<synchronous>, transform_indices = @transform_17, window_bounds = array<i64: 8, 1>}, {pipeline_mode = #tpu.pipeline_mode<synchronous>, transform_indices = @transform_18, window_bounds = array<i64: 8, 8>}, {pipeline_mode = #tpu.pipeline_mode<synchronous>, transform_indices = @transform_19, window_bounds = array<i64: 8, 1>}, {pipeline_mode = #tpu.pipeline_mode<synchronous>, transform_indices = @transform_20, window_bounds = array<i64: 8, 1>}, {pipeline_mode = #tpu.pipeline_mode<synchronous>, transform_indices = @transform_21, window_bounds = array<i64: 8, 72>}, {pipeline_mode = #tpu.pipeline_mode<synchronous>, transform_indices = @transform_22, window_bounds = array<i64: 8, 1>}, {pipeline_mode = #tpu.pipeline_mode<synchronous>, transform_indices = @transform_23, window_bounds = array<i64: 8, 1>}, {pipeline_mode = #tpu.pipeline_mode<synchronous>, transform_indices = @transform_24, window_bounds = array<i64: 8, 72>}, {pipeline_mode = #tpu.pipeline_mode<synchronous>, transform_indices = @transform_25, window_bounds = array<i64: 8, 1>}, {pipeline_mode = #tpu.pipeline_mode<synchronous>, transform_indices = @transform_26, window_bounds = array<i64: 8, 1>}, {pipeline_mode = #tpu.pipeline_mode<synchronous>, transform_indices = @transform_27, window_bounds = array<i64: 8, 8>}, {pipeline_mode = #tpu.pipeline_mode<synchronous>, transform_indices = @transform_28, window_bounds = array<i64: 8, 1>}, {pipeline_mode = #tpu.pipeline_mode<synchronous>, transform_indices = @transform_29, window_bounds = array<i64: 8, 1>}, {pipeline_mode = #tpu.pipeline_mode<synchronous>, transform_indices = @transform_30, window_bounds = array<i64: 8, 8>}, {pipeline_mode = #tpu.pipeline_mode<synchronous>, transform_indices = @transform_31, window_bounds = array<i64: 8, 1>}, {pipeline_mode = #tpu.pipeline_mode<synchronous>, transform_indices = @transform_32, window_bounds = array<i64: 8, 1>}, {pipeline_mode = #tpu.pipeline_mode<synchronous>, transform_indices = @transform_33, window_bounds = array<i64: 8, 8>}, {pipeline_mode = #tpu.pipeline_mode<synchronous>, transform_indices = @transform_34, window_bounds = array<i64: 8, 1>}, {pipeline_mode = #tpu.pipeline_mode<synchronous>, transform_indices = @transform_35, window_bounds = array<i64: 8, 1>}, {pipeline_mode = #tpu.pipeline_mode<synchronous>, transform_indices = @transform_36, window_bounds = array<i64: 8, 8>}, {pipeline_mode = #tpu.pipeline_mode<synchronous>, transform_indices = @transform_37, window_bounds = array<i64: 8, 8>}, {pipeline_mode = #tpu.pipeline_mode<synchronous>, transform_indices = @transform_38, window_bounds = array<i64: 8, 1>}, {pipeline_mode = #tpu.pipeline_mode<synchronous>, transform_indices = @transform_39, window_bounds = array<i64: 8, 8>}, {pipeline_mode = #tpu.pipeline_mode<synchronous>, transform_indices = @transform_40, window_bounds = array<i64: 8, 1>}, {pipeline_mode = #tpu.pipeline_mode<synchronous>, transform_indices = @transform_41, window_bounds = array<i64: 8, 1>}, {pipeline_mode = #tpu.pipeline_mode<synchronous>, transform_indices = @transform_42, window_bounds = array<i64: 2, 8>}, {pipeline_mode = #tpu.pipeline_mode<synchronous>, transform_indices = @transform_43, window_bounds = array<i64: 2, 1>}, {pipeline_mode = #tpu.pipeline_mode<synchronous>, transform_indices = @transform_44, window_bounds = array<i64: 2, 1>}, {pipeline_mode = #tpu.pipeline_mode<synchronous>, transform_indices = @transform_45, window_bounds = array<i64: 121, 82>}, {pipeline_mode = #tpu.pipeline_mode<synchronous>, transform_indices = @transform_46, window_bounds = array<i64: 1, 82>}, {pipeline_mode = #tpu.pipeline_mode<synchronous>, transform_indices = @transform_47, window_bounds = array<i64: 121, 32>}, {pipeline_mode = #tpu.pipeline_mode<synchronous>, transform_indices = @transform_48, window_bounds = array<i64: 1, 32>}, {pipeline_mode = #tpu.pipeline_mode<synchronous>, transform_indices = @transform_49, window_bounds = array<i64: 32, 1>}, {pipeline_mode = #tpu.pipeline_mode<synchronous>, transform_indices = @transform_50, window_bounds = array<i64: 1, 1>}, {pipeline_mode = #tpu.pipeline_mode<synchronous>, transform_indices = @transform_51, window_bounds = array<i64: 2, 82>}, {pipeline_mode = #tpu.pipeline_mode<synchronous>, transform_indices = @transform_52, window_bounds = array<i64: 2, 1>}]} {
    %cst = arith.constant 0.000000e+00 : f32
    %0 = vector.broadcast %cst : f32 to vector<8x12xf32>
    %c0 = arith.constant 0 : index
    %c0_0 = arith.constant 0 : index
    %1 = vector.load %arg54[%c0, %c0_0] : memref<8x266xf32, #tpu.memory_space<vmem>>, vector<8x12xf32>
    tpu.vector_store %arg54[%c0, %c0_0], %0 {strides = array<i32>} : memref<8x266xf32, #tpu.memory_space<vmem>>, vector<8x12xf32>,
    %cst_1 = arith.constant 0.000000e+00 : f32
    %2 = vector.broadcast %cst_1 : f32 to vector<8x12xf32>
    %c0_2 = arith.constant 0 : index
    %c254 = arith.constant 254 : index
    %3 = vector.load %arg54[%c0_2, %c254] : memref<8x266xf32, #tpu.memory_space<vmem>>, vector<8x12xf32>
    tpu.vector_store %arg54[%c0_2, %c254], %2 {strides = array<i32>} : memref<8x266xf32, #tpu.memory_space<vmem>>, vector<8x12xf32>,
    %c0_3 = arith.constant 0 : index
    %c0_4 = arith.constant 0 : index
    %4 = vector.load %arg1[%c0_3, %c0_4] : memref<1x242xf32, #tpu.memory_space<vmem>>, vector<1x242xf32>
    %c0_5 = arith.constant 0 : index
    %c0_6 = arith.constant 0 : index
    %5 = vector.load %arg3[%c0_5, %c0_6] : memref<8x242xf32, #tpu.memory_space<vmem>>, vector<8x242xf32>
    %6 = vector.broadcast %4 : vector<1x242xf32> to vector<8x242xf32>
    %7 = arith.mulf %5, %6 : vector<8x242xf32>
    %c0_7 = arith.constant 0 : index
    %c12 = arith.constant 12 : index
    %8 = vector.load %arg54[%c0_7, %c12] : memref<8x266xf32, #tpu.memory_space<vmem>>, vector<8x242xf32>
    tpu.vector_store %arg54[%c0_7, %c12], %7 {strides = array<i32>} : memref<8x266xf32, #tpu.memory_space<vmem>>, vector<8x242xf32>,
    %c0_8 = arith.constant 0 : index
    %c0_9 = arith.constant 0 : index
    %9 = vector.load %arg54[%c0_8, %c0_9] : memref<8x266xf32, #tpu.memory_space<vmem>>, vector<8x242xf32>
    %c0_10 = arith.constant 0 : index
    %c1 = arith.constant 1 : index
    %10 = vector.load %arg54[%c0_10, %c1] : memref<8x266xf32, #tpu.memory_space<vmem>>, vector<8x242xf32>
    %c0_11 = arith.constant 0 : index
    %c2 = arith.constant 2 : index
    %11 = vector.load %arg54[%c0_11, %c2] : memref<8x266xf32, #tpu.memory_space<vmem>>, vector<8x242xf32>
    %c0_12 = arith.constant 0 : index
    %c11 = arith.constant 11 : index
    %12 = vector.load %arg54[%c0_12, %c11] : memref<8x266xf32, #tpu.memory_space<vmem>>, vector<8x242xf32>
    %c0_13 = arith.constant 0 : index
    %c12_14 = arith.constant 12 : index
    %13 = vector.load %arg54[%c0_13, %c12_14] : memref<8x266xf32, #tpu.memory_space<vmem>>, vector<8x242xf32>
    %c0_15 = arith.constant 0 : index
    %c13 = arith.constant 13 : index
    %14 = vector.load %arg54[%c0_15, %c13] : memref<8x266xf32, #tpu.memory_space<vmem>>, vector<8x242xf32>
    %c0_16 = arith.constant 0 : index
    %c22 = arith.constant 22 : index
    %15 = vector.load %arg54[%c0_16, %c22] : memref<8x266xf32, #tpu.memory_space<vmem>>, vector<8x242xf32>
    %c0_17 = arith.constant 0 : index
    %c23 = arith.constant 23 : index
    %16 = vector.load %arg54[%c0_17, %c23] : memref<8x266xf32, #tpu.memory_space<vmem>>, vector<8x242xf32>
    %c0_18 = arith.constant 0 : index
    %c24 = arith.constant 24 : index
    %17 = vector.load %arg54[%c0_18, %c24] : memref<8x266xf32, #tpu.memory_space<vmem>>, vector<8x242xf32>
    %18 = tpu.concatenate %9, %10, %11, %12, %13, %14, %15, %16, %17 in 0 : vector<8x242xf32>, vector<8x242xf32>, vector<8x242xf32>, vector<8x242xf32>, vector<8x242xf32>, vector<8x242xf32>, vector<8x242xf32>, vector<8x242xf32>, vector<8x242xf32> -> vector<72x242xf32>
    %c0_19 = arith.constant 0 : index
    %c0_20 = arith.constant 0 : index
    %19 = vector.load %arg4[%c0_19, %c0_20] : memref<8x72xf32, #tpu.memory_space<vmem>>, vector<8x72xf32>
    %cst_21 = arith.constant dense<0.000000e+00> : vector<8x242xf32>
    %20 = tpu.matmul %19, %18, %cst_21 {dimension_numbers = #tpu.dot_dimension_numbers<[1], [0], [0], [1], [0, 0, 1, 1], [], []>} : vector<8x72xf32>, vector<72x242xf32>, vector<8x242xf32> -> vector<8x242xf32>
    %c0_22 = arith.constant 0 : index
    %c0_23 = arith.constant 0 : index
    %21 = vector.load %arg5[%c0_22, %c0_23] : memref<8x1xf32, #tpu.memory_space<vmem>>, vector<8x1xf32>
    %22 = vector.broadcast %21 : vector<8x1xf32> to vector<8x242xf32>
    %23 = arith.mulf %20, %22 : vector<8x242xf32>
    %c0_24 = arith.constant 0 : index
    %c0_25 = arith.constant 0 : index
    %24 = vector.load %arg6[%c0_24, %c0_25] : memref<8x1xf32, #tpu.memory_space<vmem>>, vector<8x1xf32>
    %25 = vector.broadcast %24 : vector<8x1xf32> to vector<8x242xf32>
    %26 = arith.addf %23, %25 : vector<8x242xf32>
    %cst_26 = arith.constant 0.000000e+00 : f32
    %27 = vector.broadcast %cst_26 : f32 to vector<8x242xf32>
    %28 = arith.maximumf %26, %27 : vector<8x242xf32>
    %29 = vector.broadcast %4 : vector<1x242xf32> to vector<8x242xf32>
    %30 = arith.mulf %28, %29 : vector<8x242xf32>
    %c0_27 = arith.constant 0 : index
    %c0_28 = arith.constant 0 : index
    %31 = vector.load %arg7[%c0_27, %c0_28] : memref<8x8xf32, #tpu.memory_space<vmem>>, vector<8x8xf32>
    %cst_29 = arith.constant dense<0.000000e+00> : vector<8x242xf32>
    %32 = tpu.matmul %31, %30, %cst_29 {dimension_numbers = #tpu.dot_dimension_numbers<[1], [0], [0], [1], [0, 0, 1, 1], [], []>} : vector<8x8xf32>, vector<8x242xf32>, vector<8x242xf32> -> vector<8x242xf32>
    %c0_30 = arith.constant 0 : index
    %c0_31 = arith.constant 0 : index
    %33 = vector.load %arg8[%c0_30, %c0_31] : memref<8x1xf32, #tpu.memory_space<vmem>>, vector<8x1xf32>
    %34 = vector.broadcast %33 : vector<8x1xf32> to vector<8x242xf32>
    %35 = arith.mulf %32, %34 : vector<8x242xf32>
    %c0_32 = arith.constant 0 : index
    %c0_33 = arith.constant 0 : index
    %36 = vector.load %arg9[%c0_32, %c0_33] : memref<8x1xf32, #tpu.memory_space<vmem>>, vector<8x1xf32>
    %37 = vector.broadcast %36 : vector<8x1xf32> to vector<8x242xf32>
    %38 = arith.addf %35, %37 : vector<8x242xf32>
    %cst_34 = arith.constant 0.000000e+00 : f32
    %39 = vector.broadcast %cst_34 : f32 to vector<8x242xf32>
    %40 = arith.maximumf %38, %39 : vector<8x242xf32>
    %41 = vector.broadcast %4 : vector<1x242xf32> to vector<8x242xf32>
    %42 = arith.mulf %40, %41 : vector<8x242xf32>
    %c0_35 = arith.constant 0 : index
    %c12_36 = arith.constant 12 : index
    %43 = vector.load %arg54[%c0_35, %c12_36] : memref<8x266xf32, #tpu.memory_space<vmem>>, vector<8x242xf32>
    tpu.vector_store %arg54[%c0_35, %c12_36], %42 {strides = array<i32>} : memref<8x266xf32, #tpu.memory_space<vmem>>, vector<8x242xf32>,
    %c0_37 = arith.constant 0 : index
    %c0_38 = arith.constant 0 : index
    %44 = vector.load %arg54[%c0_37, %c0_38] : memref<8x266xf32, #tpu.memory_space<vmem>>, vector<8x242xf32>
    %c0_39 = arith.constant 0 : index
    %c1_40 = arith.constant 1 : index
    %45 = vector.load %arg54[%c0_39, %c1_40] : memref<8x266xf32, #tpu.memory_space<vmem>>, vector<8x242xf32>
    %c0_41 = arith.constant 0 : index
    %c2_42 = arith.constant 2 : index
    %46 = vector.load %arg54[%c0_41, %c2_42] : memref<8x266xf32, #tpu.memory_space<vmem>>, vector<8x242xf32>
    %c0_43 = arith.constant 0 : index
    %c11_44 = arith.constant 11 : index
    %47 = vector.load %arg54[%c0_43, %c11_44] : memref<8x266xf32, #tpu.memory_space<vmem>>, vector<8x242xf32>
    %c0_45 = arith.constant 0 : index
    %c12_46 = arith.constant 12 : index
    %48 = vector.load %arg54[%c0_45, %c12_46] : memref<8x266xf32, #tpu.memory_space<vmem>>, vector<8x242xf32>
    %c0_47 = arith.constant 0 : index
    %c13_48 = arith.constant 13 : index
    %49 = vector.load %arg54[%c0_47, %c13_48] : memref<8x266xf32, #tpu.memory_space<vmem>>, vector<8x242xf32>
    %c0_49 = arith.constant 0 : index
    %c22_50 = arith.constant 22 : index
    %50 = vector.load %arg54[%c0_49, %c22_50] : memref<8x266xf32, #tpu.memory_space<vmem>>, vector<8x242xf32>
    %c0_51 = arith.constant 0 : index
    %c23_52 = arith.constant 23 : index
    %51 = vector.load %arg54[%c0_51, %c23_52] : memref<8x266xf32, #tpu.memory_space<vmem>>, vector<8x242xf32>
    %c0_53 = arith.constant 0 : index
    %c24_54 = arith.constant 24 : index
    %52 = vector.load %arg54[%c0_53, %c24_54] : memref<8x266xf32, #tpu.memory_space<vmem>>, vector<8x242xf32>
    %53 = tpu.concatenate %44, %45, %46, %47, %48, %49, %50, %51, %52 in 0 : vector<8x242xf32>, vector<8x242xf32>, vector<8x242xf32>, vector<8x242xf32>, vector<8x242xf32>, vector<8x242xf32>, vector<8x242xf32>, vector<8x242xf32>, vector<8x242xf32> -> vector<72x242xf32>
    %c0_55 = arith.constant 0 : index
    %c0_56 = arith.constant 0 : index
    %54 = vector.load %arg10[%c0_55, %c0_56] : memref<8x72xf32, #tpu.memory_space<vmem>>, vector<8x72xf32>
    %cst_57 = arith.constant dense<0.000000e+00> : vector<8x242xf32>
    %55 = tpu.matmul %54, %53, %cst_57 {dimension_numbers = #tpu.dot_dimension_numbers<[1], [0], [0], [1], [0, 0, 1, 1], [], []>} : vector<8x72xf32>, vector<72x242xf32>, vector<8x242xf32> -> vector<8x242xf32>
    %c0_58 = arith.constant 0 : index
    %c0_59 = arith.constant 0 : index
    %56 = vector.load %arg11[%c0_58, %c0_59] : memref<8x1xf32, #tpu.memory_space<vmem>>, vector<8x1xf32>
    %57 = vector.broadcast %56 : vector<8x1xf32> to vector<8x242xf32>
    %58 = arith.mulf %55, %57 : vector<8x242xf32>
    %c0_60 = arith.constant 0 : index
    %c0_61 = arith.constant 0 : index
    %59 = vector.load %arg12[%c0_60, %c0_61] : memref<8x1xf32, #tpu.memory_space<vmem>>, vector<8x1xf32>
    %60 = vector.broadcast %59 : vector<8x1xf32> to vector<8x242xf32>
    %61 = arith.addf %58, %60 : vector<8x242xf32>
    %cst_62 = arith.constant 0.000000e+00 : f32
    %62 = vector.broadcast %cst_62 : f32 to vector<8x242xf32>
    %63 = arith.maximumf %61, %62 : vector<8x242xf32>
    %64 = vector.broadcast %4 : vector<1x242xf32> to vector<8x242xf32>
    %65 = arith.mulf %63, %64 : vector<8x242xf32>
    %c0_63 = arith.constant 0 : index
    %c12_64 = arith.constant 12 : index
    %66 = vector.load %arg54[%c0_63, %c12_64] : memref<8x266xf32, #tpu.memory_space<vmem>>, vector<8x242xf32>
    tpu.vector_store %arg54[%c0_63, %c12_64], %65 {strides = array<i32>} : memref<8x266xf32, #tpu.memory_space<vmem>>, vector<8x242xf32>,
    %c0_65 = arith.constant 0 : index
    %c0_66 = arith.constant 0 : index
    %67 = vector.load %arg54[%c0_65, %c0_66] : memref<8x266xf32, #tpu.memory_space<vmem>>, vector<8x242xf32>
    %c0_67 = arith.constant 0 : index
    %c1_68 = arith.constant 1 : index
    %68 = vector.load %arg54[%c0_67, %c1_68] : memref<8x266xf32, #tpu.memory_space<vmem>>, vector<8x242xf32>
    %c0_69 = arith.constant 0 : index
    %c2_70 = arith.constant 2 : index
    %69 = vector.load %arg54[%c0_69, %c2_70] : memref<8x266xf32, #tpu.memory_space<vmem>>, vector<8x242xf32>
    %c0_71 = arith.constant 0 : index
    %c11_72 = arith.constant 11 : index
    %70 = vector.load %arg54[%c0_71, %c11_72] : memref<8x266xf32, #tpu.memory_space<vmem>>, vector<8x242xf32>
    %c0_73 = arith.constant 0 : index
    %c12_74 = arith.constant 12 : index
    %71 = vector.load %arg54[%c0_73, %c12_74] : memref<8x266xf32, #tpu.memory_space<vmem>>, vector<8x242xf32>
    %c0_75 = arith.constant 0 : index
    %c13_76 = arith.constant 13 : index
    %72 = vector.load %arg54[%c0_75, %c13_76] : memref<8x266xf32, #tpu.memory_space<vmem>>, vector<8x242xf32>
    %c0_77 = arith.constant 0 : index
    %c22_78 = arith.constant 22 : index
    %73 = vector.load %arg54[%c0_77, %c22_78] : memref<8x266xf32, #tpu.memory_space<vmem>>, vector<8x242xf32>
    %c0_79 = arith.constant 0 : index
    %c23_80 = arith.constant 23 : index
    %74 = vector.load %arg54[%c0_79, %c23_80] : memref<8x266xf32, #tpu.memory_space<vmem>>, vector<8x242xf32>
    %c0_81 = arith.constant 0 : index
    %c24_82 = arith.constant 24 : index
    %75 = vector.load %arg54[%c0_81, %c24_82] : memref<8x266xf32, #tpu.memory_space<vmem>>, vector<8x242xf32>
    %76 = tpu.concatenate %67, %68, %69, %70, %71, %72, %73, %74, %75 in 0 : vector<8x242xf32>, vector<8x242xf32>, vector<8x242xf32>, vector<8x242xf32>, vector<8x242xf32>, vector<8x242xf32>, vector<8x242xf32>, vector<8x242xf32>, vector<8x242xf32> -> vector<72x242xf32>
    %c0_83 = arith.constant 0 : index
    %c0_84 = arith.constant 0 : index
    %77 = vector.load %arg13[%c0_83, %c0_84] : memref<8x72xf32, #tpu.memory_space<vmem>>, vector<8x72xf32>
    %cst_85 = arith.constant dense<0.000000e+00> : vector<8x242xf32>
    %78 = tpu.matmul %77, %76, %cst_85 {dimension_numbers = #tpu.dot_dimension_numbers<[1], [0], [0], [1], [0, 0, 1, 1], [], []>} : vector<8x72xf32>, vector<72x242xf32>, vector<8x242xf32> -> vector<8x242xf32>
    %c0_86 = arith.constant 0 : index
    %c0_87 = arith.constant 0 : index
    %79 = vector.load %arg14[%c0_86, %c0_87] : memref<8x1xf32, #tpu.memory_space<vmem>>, vector<8x1xf32>
    %80 = vector.broadcast %79 : vector<8x1xf32> to vector<8x242xf32>
    %81 = arith.mulf %78, %80 : vector<8x242xf32>
    %c0_88 = arith.constant 0 : index
    %c0_89 = arith.constant 0 : index
    %82 = vector.load %arg15[%c0_88, %c0_89] : memref<8x1xf32, #tpu.memory_space<vmem>>, vector<8x1xf32>
    %83 = vector.broadcast %82 : vector<8x1xf32> to vector<8x242xf32>
    %84 = arith.addf %81, %83 : vector<8x242xf32>
    %cst_90 = arith.constant 0.000000e+00 : f32
    %85 = vector.broadcast %cst_90 : f32 to vector<8x242xf32>
    %86 = arith.maximumf %84, %85 : vector<8x242xf32>
    %c0_91 = arith.constant 0 : index
    %c0_92 = arith.constant 0 : index
    %87 = vector.load %arg16[%c0_91, %c0_92] : memref<8x8xf32, #tpu.memory_space<vmem>>, vector<8x8xf32>
    %cst_93 = arith.constant dense<0.000000e+00> : vector<8x242xf32>
    %88 = tpu.matmul %87, %86, %cst_93 {dimension_numbers = #tpu.dot_dimension_numbers<[1], [0], [0], [1], [0, 0, 1, 1], [], []>} : vector<8x8xf32>, vector<8x242xf32>, vector<8x242xf32> -> vector<8x242xf32>
    %c0_94 = arith.constant 0 : index
    %c0_95 = arith.constant 0 : index
    %89 = vector.load %arg17[%c0_94, %c0_95] : memref<8x1xf32, #tpu.memory_space<vmem>>, vector<8x1xf32>
    %90 = vector.broadcast %89 : vector<8x1xf32> to vector<8x242xf32>
    %91 = arith.mulf %88, %90 : vector<8x242xf32>
    %c0_96 = arith.constant 0 : index
    %c0_97 = arith.constant 0 : index
    %92 = vector.load %arg18[%c0_96, %c0_97] : memref<8x1xf32, #tpu.memory_space<vmem>>, vector<8x1xf32>
    %93 = vector.broadcast %92 : vector<8x1xf32> to vector<8x242xf32>
    %94 = arith.addf %91, %93 : vector<8x242xf32>
    %95 = arith.addf %94, %30 : vector<8x242xf32>
    %96 = arith.negf %95 : vector<8x242xf32>
    %97 = math.exp %96 : vector<8x242xf32>
    %cst_98 = arith.constant 1.000000e+00 : f32
    %98 = vector.broadcast %cst_98 : f32 to vector<8x242xf32>
    %99 = arith.addf %98, %97 : vector<8x242xf32>
    %100 = arith.divf %98, %99 : vector<8x242xf32>
    %101 = arith.mulf %95, %100 : vector<8x242xf32>
    %102 = vector.broadcast %4 : vector<1x242xf32> to vector<8x242xf32>
    %103 = arith.mulf %101, %102 : vector<8x242xf32>
    %c0_99 = arith.constant 0 : index
    %c0_100 = arith.constant 0 : index
    %104 = vector.load %arg19[%c0_99, %c0_100] : memref<8x8xf32, #tpu.memory_space<vmem>>, vector<8x8xf32>
    %cst_101 = arith.constant dense<0.000000e+00> : vector<8x242xf32>
    %105 = tpu.matmul %104, %103, %cst_101 {dimension_numbers = #tpu.dot_dimension_numbers<[1], [0], [0], [1], [0, 0, 1, 1], [], []>} : vector<8x8xf32>, vector<8x242xf32>, vector<8x242xf32> -> vector<8x242xf32>
    %c0_102 = arith.constant 0 : index
    %c0_103 = arith.constant 0 : index
    %106 = vector.load %arg20[%c0_102, %c0_103] : memref<8x1xf32, #tpu.memory_space<vmem>>, vector<8x1xf32>
    %107 = vector.broadcast %106 : vector<8x1xf32> to vector<8x242xf32>
    %108 = arith.mulf %105, %107 : vector<8x242xf32>
    %c0_104 = arith.constant 0 : index
    %c0_105 = arith.constant 0 : index
    %109 = vector.load %arg21[%c0_104, %c0_105] : memref<8x1xf32, #tpu.memory_space<vmem>>, vector<8x1xf32>
    %110 = vector.broadcast %109 : vector<8x1xf32> to vector<8x242xf32>
    %111 = arith.addf %108, %110 : vector<8x242xf32>
    %cst_106 = arith.constant 0.000000e+00 : f32
    %112 = vector.broadcast %cst_106 : f32 to vector<8x242xf32>
    %113 = arith.maximumf %111, %112 : vector<8x242xf32>
    %114 = vector.broadcast %4 : vector<1x242xf32> to vector<8x242xf32>
    %115 = arith.mulf %113, %114 : vector<8x242xf32>
    %c0_107 = arith.constant 0 : index
    %c12_108 = arith.constant 12 : index
    %116 = vector.load %arg54[%c0_107, %c12_108] : memref<8x266xf32, #tpu.memory_space<vmem>>, vector<8x242xf32>
    tpu.vector_store %arg54[%c0_107, %c12_108], %115 {strides = array<i32>} : memref<8x266xf32, #tpu.memory_space<vmem>>, vector<8x242xf32>,
    %c0_109 = arith.constant 0 : index
    %c0_110 = arith.constant 0 : index
    %117 = vector.load %arg54[%c0_109, %c0_110] : memref<8x266xf32, #tpu.memory_space<vmem>>, vector<8x242xf32>
    %c0_111 = arith.constant 0 : index
    %c1_112 = arith.constant 1 : index
    %118 = vector.load %arg54[%c0_111, %c1_112] : memref<8x266xf32, #tpu.memory_space<vmem>>, vector<8x242xf32>
    %c0_113 = arith.constant 0 : index
    %c2_114 = arith.constant 2 : index
    %119 = vector.load %arg54[%c0_113, %c2_114] : memref<8x266xf32, #tpu.memory_space<vmem>>, vector<8x242xf32>
    %c0_115 = arith.constant 0 : index
    %c11_116 = arith.constant 11 : index
    %120 = vector.load %arg54[%c0_115, %c11_116] : memref<8x266xf32, #tpu.memory_space<vmem>>, vector<8x242xf32>
    %c0_117 = arith.constant 0 : index
    %c12_118 = arith.constant 12 : index
    %121 = vector.load %arg54[%c0_117, %c12_118] : memref<8x266xf32, #tpu.memory_space<vmem>>, vector<8x242xf32>
    %c0_119 = arith.constant 0 : index
    %c13_120 = arith.constant 13 : index
    %122 = vector.load %arg54[%c0_119, %c13_120] : memref<8x266xf32, #tpu.memory_space<vmem>>, vector<8x242xf32>
    %c0_121 = arith.constant 0 : index
    %c22_122 = arith.constant 22 : index
    %123 = vector.load %arg54[%c0_121, %c22_122] : memref<8x266xf32, #tpu.memory_space<vmem>>, vector<8x242xf32>
    %c0_123 = arith.constant 0 : index
    %c23_124 = arith.constant 23 : index
    %124 = vector.load %arg54[%c0_123, %c23_124] : memref<8x266xf32, #tpu.memory_space<vmem>>, vector<8x242xf32>
    %c0_125 = arith.constant 0 : index
    %c24_126 = arith.constant 24 : index
    %125 = vector.load %arg54[%c0_125, %c24_126] : memref<8x266xf32, #tpu.memory_space<vmem>>, vector<8x242xf32>
    %126 = tpu.concatenate %117, %118, %119, %120, %121, %122, %123, %124, %125 in 0 : vector<8x242xf32>, vector<8x242xf32>, vector<8x242xf32>, vector<8x242xf32>, vector<8x242xf32>, vector<8x242xf32>, vector<8x242xf32>, vector<8x242xf32>, vector<8x242xf32> -> vector<72x242xf32>
    %c0_127 = arith.constant 0 : index
    %c0_128 = arith.constant 0 : index
    %127 = vector.load %arg22[%c0_127, %c0_128] : memref<8x72xf32, #tpu.memory_space<vmem>>, vector<8x72xf32>
    %cst_129 = arith.constant dense<0.000000e+00> : vector<8x242xf32>
    %128 = tpu.matmul %127, %126, %cst_129 {dimension_numbers = #tpu.dot_dimension_numbers<[1], [0], [0], [1], [0, 0, 1, 1], [], []>} : vector<8x72xf32>, vector<72x242xf32>, vector<8x242xf32> -> vector<8x242xf32>
    %c0_130 = arith.constant 0 : index
    %c0_131 = arith.constant 0 : index
    %129 = vector.load %arg23[%c0_130, %c0_131] : memref<8x1xf32, #tpu.memory_space<vmem>>, vector<8x1xf32>
    %130 = vector.broadcast %129 : vector<8x1xf32> to vector<8x242xf32>
    %131 = arith.mulf %128, %130 : vector<8x242xf32>
    %c0_132 = arith.constant 0 : index
    %c0_133 = arith.constant 0 : index
    %132 = vector.load %arg24[%c0_132, %c0_133] : memref<8x1xf32, #tpu.memory_space<vmem>>, vector<8x1xf32>
    %133 = vector.broadcast %132 : vector<8x1xf32> to vector<8x242xf32>
    %134 = arith.addf %131, %133 : vector<8x242xf32>
    %cst_134 = arith.constant 0.000000e+00 : f32
    %135 = vector.broadcast %cst_134 : f32 to vector<8x242xf32>
    %136 = arith.maximumf %134, %135 : vector<8x242xf32>
    %137 = vector.broadcast %4 : vector<1x242xf32> to vector<8x242xf32>
    %138 = arith.mulf %136, %137 : vector<8x242xf32>
    %c0_135 = arith.constant 0 : index
    %c12_136 = arith.constant 12 : index
    %139 = vector.load %arg54[%c0_135, %c12_136] : memref<8x266xf32, #tpu.memory_space<vmem>>, vector<8x242xf32>
    tpu.vector_store %arg54[%c0_135, %c12_136], %138 {strides = array<i32>} : memref<8x266xf32, #tpu.memory_space<vmem>>, vector<8x242xf32>,
    %c0_137 = arith.constant 0 : index
    %c0_138 = arith.constant 0 : index
    %140 = vector.load %arg54[%c0_137, %c0_138] : memref<8x266xf32, #tpu.memory_space<vmem>>, vector<8x242xf32>
    %c0_139 = arith.constant 0 : index
    %c1_140 = arith.constant 1 : index
    %141 = vector.load %arg54[%c0_139, %c1_140] : memref<8x266xf32, #tpu.memory_space<vmem>>, vector<8x242xf32>
    %c0_141 = arith.constant 0 : index
    %c2_142 = arith.constant 2 : index
    %142 = vector.load %arg54[%c0_141, %c2_142] : memref<8x266xf32, #tpu.memory_space<vmem>>, vector<8x242xf32>
    %c0_143 = arith.constant 0 : index
    %c11_144 = arith.constant 11 : index
    %143 = vector.load %arg54[%c0_143, %c11_144] : memref<8x266xf32, #tpu.memory_space<vmem>>, vector<8x242xf32>
    %c0_145 = arith.constant 0 : index
    %c12_146 = arith.constant 12 : index
    %144 = vector.load %arg54[%c0_145, %c12_146] : memref<8x266xf32, #tpu.memory_space<vmem>>, vector<8x242xf32>
    %c0_147 = arith.constant 0 : index
    %c13_148 = arith.constant 13 : index
    %145 = vector.load %arg54[%c0_147, %c13_148] : memref<8x266xf32, #tpu.memory_space<vmem>>, vector<8x242xf32>
    %c0_149 = arith.constant 0 : index
    %c22_150 = arith.constant 22 : index
    %146 = vector.load %arg54[%c0_149, %c22_150] : memref<8x266xf32, #tpu.memory_space<vmem>>, vector<8x242xf32>
    %c0_151 = arith.constant 0 : index
    %c23_152 = arith.constant 23 : index
    %147 = vector.load %arg54[%c0_151, %c23_152] : memref<8x266xf32, #tpu.memory_space<vmem>>, vector<8x242xf32>
    %c0_153 = arith.constant 0 : index
    %c24_154 = arith.constant 24 : index
    %148 = vector.load %arg54[%c0_153, %c24_154] : memref<8x266xf32, #tpu.memory_space<vmem>>, vector<8x242xf32>
    %149 = tpu.concatenate %140, %141, %142, %143, %144, %145, %146, %147, %148 in 0 : vector<8x242xf32>, vector<8x242xf32>, vector<8x242xf32>, vector<8x242xf32>, vector<8x242xf32>, vector<8x242xf32>, vector<8x242xf32>, vector<8x242xf32>, vector<8x242xf32> -> vector<72x242xf32>
    %c0_155 = arith.constant 0 : index
    %c0_156 = arith.constant 0 : index
    %150 = vector.load %arg25[%c0_155, %c0_156] : memref<8x72xf32, #tpu.memory_space<vmem>>, vector<8x72xf32>
    %cst_157 = arith.constant dense<0.000000e+00> : vector<8x242xf32>
    %151 = tpu.matmul %150, %149, %cst_157 {dimension_numbers = #tpu.dot_dimension_numbers<[1], [0], [0], [1], [0, 0, 1, 1], [], []>} : vector<8x72xf32>, vector<72x242xf32>, vector<8x242xf32> -> vector<8x242xf32>
    %c0_158 = arith.constant 0 : index
    %c0_159 = arith.constant 0 : index
    %152 = vector.load %arg26[%c0_158, %c0_159] : memref<8x1xf32, #tpu.memory_space<vmem>>, vector<8x1xf32>
    %153 = vector.broadcast %152 : vector<8x1xf32> to vector<8x242xf32>
    %154 = arith.mulf %151, %153 : vector<8x242xf32>
    %c0_160 = arith.constant 0 : index
    %c0_161 = arith.constant 0 : index
    %155 = vector.load %arg27[%c0_160, %c0_161] : memref<8x1xf32, #tpu.memory_space<vmem>>, vector<8x1xf32>
    %156 = vector.broadcast %155 : vector<8x1xf32> to vector<8x242xf32>
    %157 = arith.addf %154, %156 : vector<8x242xf32>
    %cst_162 = arith.constant 0.000000e+00 : f32
    %158 = vector.broadcast %cst_162 : f32 to vector<8x242xf32>
    %159 = arith.maximumf %157, %158 : vector<8x242xf32>
    %c0_163 = arith.constant 0 : index
    %c0_164 = arith.constant 0 : index
    %160 = vector.load %arg28[%c0_163, %c0_164] : memref<8x8xf32, #tpu.memory_space<vmem>>, vector<8x8xf32>
    %cst_165 = arith.constant dense<0.000000e+00> : vector<8x242xf32>
    %161 = tpu.matmul %160, %159, %cst_165 {dimension_numbers = #tpu.dot_dimension_numbers<[1], [0], [0], [1], [0, 0, 1, 1], [], []>} : vector<8x8xf32>, vector<8x242xf32>, vector<8x242xf32> -> vector<8x242xf32>
    %c0_166 = arith.constant 0 : index
    %c0_167 = arith.constant 0 : index
    %162 = vector.load %arg29[%c0_166, %c0_167] : memref<8x1xf32, #tpu.memory_space<vmem>>, vector<8x1xf32>
    %163 = vector.broadcast %162 : vector<8x1xf32> to vector<8x242xf32>
    %164 = arith.mulf %161, %163 : vector<8x242xf32>
    %c0_168 = arith.constant 0 : index
    %c0_169 = arith.constant 0 : index
    %165 = vector.load %arg30[%c0_168, %c0_169] : memref<8x1xf32, #tpu.memory_space<vmem>>, vector<8x1xf32>
    %166 = vector.broadcast %165 : vector<8x1xf32> to vector<8x242xf32>
    %167 = arith.addf %164, %166 : vector<8x242xf32>
    %168 = arith.addf %167, %103 : vector<8x242xf32>
    %169 = arith.negf %168 : vector<8x242xf32>
    %170 = math.exp %169 : vector<8x242xf32>
    %cst_170 = arith.constant 1.000000e+00 : f32
    %171 = vector.broadcast %cst_170 : f32 to vector<8x242xf32>
    %172 = arith.addf %171, %170 : vector<8x242xf32>
    %173 = arith.divf %171, %172 : vector<8x242xf32>
    %174 = arith.mulf %168, %173 : vector<8x242xf32>
    %175 = vector.broadcast %4 : vector<1x242xf32> to vector<8x242xf32>
    %176 = arith.mulf %174, %175 : vector<8x242xf32>
    %c0_171 = arith.constant 0 : index
    %c0_172 = arith.constant 0 : index
    %177 = vector.load %arg31[%c0_171, %c0_172] : memref<8x8xf32, #tpu.memory_space<vmem>>, vector<8x8xf32>
    %cst_173 = arith.constant dense<0.000000e+00> : vector<8x242xf32>
    %178 = tpu.matmul %177, %176, %cst_173 {dimension_numbers = #tpu.dot_dimension_numbers<[1], [0], [0], [1], [0, 0, 1, 1], [], []>} : vector<8x8xf32>, vector<8x242xf32>, vector<8x242xf32> -> vector<8x242xf32>
    %c0_174 = arith.constant 0 : index
    %c0_175 = arith.constant 0 : index
    %179 = vector.load %arg32[%c0_174, %c0_175] : memref<8x1xf32, #tpu.memory_space<vmem>>, vector<8x1xf32>
    %180 = vector.broadcast %179 : vector<8x1xf32> to vector<8x242xf32>
    %181 = arith.mulf %178, %180 : vector<8x242xf32>
    %c0_176 = arith.constant 0 : index
    %c0_177 = arith.constant 0 : index
    %182 = vector.load %arg33[%c0_176, %c0_177] : memref<8x1xf32, #tpu.memory_space<vmem>>, vector<8x1xf32>
    %183 = vector.broadcast %182 : vector<8x1xf32> to vector<8x242xf32>
    %184 = arith.addf %181, %183 : vector<8x242xf32>
    %cst_178 = arith.constant 0.000000e+00 : f32
    %185 = vector.broadcast %cst_178 : f32 to vector<8x242xf32>
    %186 = arith.maximumf %184, %185 : vector<8x242xf32>
    %c0_179 = arith.constant 0 : index
    %c0_180 = arith.constant 0 : index
    %187 = vector.load %arg34[%c0_179, %c0_180] : memref<8x8xf32, #tpu.memory_space<vmem>>, vector<8x8xf32>
    %cst_181 = arith.constant dense<0.000000e+00> : vector<8x242xf32>
    %188 = tpu.matmul %187, %176, %cst_181 {dimension_numbers = #tpu.dot_dimension_numbers<[1], [0], [0], [1], [0, 0, 1, 1], [], []>} : vector<8x8xf32>, vector<8x242xf32>, vector<8x242xf32> -> vector<8x242xf32>
    %c0_182 = arith.constant 0 : index
    %c0_183 = arith.constant 0 : index
    %189 = vector.load %arg35[%c0_182, %c0_183] : memref<8x1xf32, #tpu.memory_space<vmem>>, vector<8x1xf32>
    %190 = vector.broadcast %189 : vector<8x1xf32> to vector<8x242xf32>
    %191 = arith.mulf %188, %190 : vector<8x242xf32>
    %c0_184 = arith.constant 0 : index
    %c0_185 = arith.constant 0 : index
    %192 = vector.load %arg36[%c0_184, %c0_185] : memref<8x1xf32, #tpu.memory_space<vmem>>, vector<8x1xf32>
    %193 = vector.broadcast %192 : vector<8x1xf32> to vector<8x242xf32>
    %194 = arith.addf %191, %193 : vector<8x242xf32>
    %cst_186 = arith.constant 0.000000e+00 : f32
    %195 = vector.broadcast %cst_186 : f32 to vector<8x242xf32>
    %196 = arith.maximumf %194, %195 : vector<8x242xf32>
    %197 = vector.extract_strided_slice %196 {offsets = [0, 0], sizes = [8, 121], strides = [1, 1]} : vector<8x242xf32> to vector<8x121xf32>
    %198 = vector.extract_strided_slice %4 {offsets = [0, 0], sizes = [1, 121], strides = [1, 1]} : vector<1x242xf32> to vector<1x121xf32>
    %cst_187 = arith.constant 0.000000e+00 : f32
    %199 = vector.broadcast %cst_187 : f32 to vector<1x121xf32>
    %200 = arith.cmpf ogt, %198, %199 : vector<1x121xf32>
    %cst_188 = arith.constant -1.000000e+30 : f32
    %201 = vector.shape_cast %200 : vector<1x121xi1> to vector<1x121xi1>
    %202 = vector.broadcast %201 : vector<1x121xi1> to vector<8x121xi1>
    %203 = vector.broadcast %cst_188 : f32 to vector<8x121xf32>
    %204 = arith.select %202, %197, %203 : vector<8x121xi1>, vector<8x121xf32>
    %cst_189 = arith.constant dense<0xFF800000> : vector<8xf32>
    %205 = vector.multi_reduction <maximumf>, %204, %cst_189 [1] : vector<8x121xf32> to vector<8xf32>
    %206 = vector.shape_cast %205 : vector<8xf32> to vector<8x1xf32>
    %cst_190 = arith.constant 0.000000e+00 : f32
    %207 = vector.shape_cast %200 : vector<1x121xi1> to vector<1x121xi1>
    %208 = vector.broadcast %207 : vector<1x121xi1> to vector<8x121xi1>
    %209 = vector.broadcast %cst_190 : f32 to vector<8x121xf32>
    %210 = arith.select %208, %197, %209 : vector<8x121xi1>, vector<8x121xf32>
    %cst_191 = arith.constant dense<0.000000e+00> : vector<8xf32>
    %211 = vector.multi_reduction <add>, %210, %cst_191 [1] : vector<8x121xf32> to vector<8xf32>
    %212 = vector.shape_cast %211 : vector<8xf32> to vector<8x1xf32>
    %cst_192 = arith.constant 0.0123456791 : f32
    %213 = vector.broadcast %cst_192 : f32 to vector<8x1xf32>
    %214 = arith.mulf %212, %213 : vector<8x1xf32>
    %c0_193 = arith.constant 0 : index
    %c0_194 = arith.constant 0 : index
    %215 = vector.load %arg37[%c0_193, %c0_194] : memref<8x8xf32, #tpu.memory_space<vmem>>, vector<8x8xf32>
    %cst_195 = arith.constant dense<0.000000e+00> : vector<8x1xf32>
    %216 = tpu.matmul %215, %206, %cst_195 {dimension_numbers = #tpu.dot_dimension_numbers<[1], [0], [0], [1], [0, 0, 1, 1], [], []>} : vector<8x8xf32>, vector<8x1xf32>, vector<8x1xf32> -> vector<8x1xf32>
    %c0_196 = arith.constant 0 : index
    %c0_197 = arith.constant 0 : index
    %217 = vector.load %arg38[%c0_196, %c0_197] : memref<8x8xf32, #tpu.memory_space<vmem>>, vector<8x8xf32>
    %cst_198 = arith.constant dense<0.000000e+00> : vector<8x1xf32>
    %218 = tpu.matmul %217, %214, %cst_198 {dimension_numbers = #tpu.dot_dimension_numbers<[1], [0], [0], [1], [0, 0, 1, 1], [], []>} : vector<8x8xf32>, vector<8x1xf32>, vector<8x1xf32> -> vector<8x1xf32>
    %219 = arith.addf %216, %218 : vector<8x1xf32>
    %c0_199 = arith.constant 0 : index
    %c0_200 = arith.constant 0 : index
    %220 = vector.load %arg39[%c0_199, %c0_200] : memref<8x1xf32, #tpu.memory_space<vmem>>, vector<8x1xf32>
    %221 = arith.addf %219, %220 : vector<8x1xf32>
    %c0_201 = arith.constant 0 : index
    %c0_202 = arith.constant 0 : index
    %222 = vector.load %arg2[%c0_201, %c0_202] : memref<2x242xf32, #tpu.memory_space<vmem>>, vector<1x242xf32>
    %223 = vector.broadcast %221 : vector<8x1xf32> to vector<8x242xf32>
    %224 = vector.broadcast %222 : vector<1x242xf32> to vector<8x242xf32>
    %225 = arith.mulf %223, %224 : vector<8x242xf32>
    %226 = arith.addf %186, %225 : vector<8x242xf32>
    %227 = vector.extract_strided_slice %196 {offsets = [0, 121], sizes = [8, 121], strides = [1, 1]} : vector<8x242xf32> to vector<8x121xf32>
    %228 = vector.extract_strided_slice %4 {offsets = [0, 121], sizes = [1, 121], strides = [1, 1]} : vector<1x242xf32> to vector<1x121xf32>
    %cst_203 = arith.constant 0.000000e+00 : f32
    %229 = vector.broadcast %cst_203 : f32 to vector<1x121xf32>
    %230 = arith.cmpf ogt, %228, %229 : vector<1x121xf32>
    %cst_204 = arith.constant -1.000000e+30 : f32
    %231 = vector.shape_cast %230 : vector<1x121xi1> to vector<1x121xi1>
    %232 = vector.broadcast %231 : vector<1x121xi1> to vector<8x121xi1>
    %233 = vector.broadcast %cst_204 : f32 to vector<8x121xf32>
    %234 = arith.select %232, %227, %233 : vector<8x121xi1>, vector<8x121xf32>
    %cst_205 = arith.constant dense<0xFF800000> : vector<8xf32>
    %235 = vector.multi_reduction <maximumf>, %234, %cst_205 [1] : vector<8x121xf32> to vector<8xf32>
    %236 = vector.shape_cast %235 : vector<8xf32> to vector<8x1xf32>
    %cst_206 = arith.constant 0.000000e+00 : f32
    %237 = vector.shape_cast %230 : vector<1x121xi1> to vector<1x121xi1>
    %238 = vector.broadcast %237 : vector<1x121xi1> to vector<8x121xi1>
    %239 = vector.broadcast %cst_206 : f32 to vector<8x121xf32>
    %240 = arith.select %238, %227, %239 : vector<8x121xi1>, vector<8x121xf32>
    %cst_207 = arith.constant dense<0.000000e+00> : vector<8xf32>
    %241 = vector.multi_reduction <add>, %240, %cst_207 [1] : vector<8x121xf32> to vector<8xf32>
    %242 = vector.shape_cast %241 : vector<8xf32> to vector<8x1xf32>
    %cst_208 = arith.constant 0.0123456791 : f32
    %243 = vector.broadcast %cst_208 : f32 to vector<8x1xf32>
    %244 = arith.mulf %242, %243 : vector<8x1xf32>
    %c0_209 = arith.constant 0 : index
    %c0_210 = arith.constant 0 : index
    %245 = vector.load %arg37[%c0_209, %c0_210] : memref<8x8xf32, #tpu.memory_space<vmem>>, vector<8x8xf32>
    %cst_211 = arith.constant dense<0.000000e+00> : vector<8x1xf32>
    %246 = tpu.matmul %245, %236, %cst_211 {dimension_numbers = #tpu.dot_dimension_numbers<[1], [0], [0], [1], [0, 0, 1, 1], [], []>} : vector<8x8xf32>, vector<8x1xf32>, vector<8x1xf32> -> vector<8x1xf32>
    %c0_212 = arith.constant 0 : index
    %c0_213 = arith.constant 0 : index
    %247 = vector.load %arg38[%c0_212, %c0_213] : memref<8x8xf32, #tpu.memory_space<vmem>>, vector<8x8xf32>
    %cst_214 = arith.constant dense<0.000000e+00> : vector<8x1xf32>
    %248 = tpu.matmul %247, %244, %cst_214 {dimension_numbers = #tpu.dot_dimension_numbers<[1], [0], [0], [1], [0, 0, 1, 1], [], []>} : vector<8x8xf32>, vector<8x1xf32>, vector<8x1xf32> -> vector<8x1xf32>
    %249 = arith.addf %246, %248 : vector<8x1xf32>
    %c0_215 = arith.constant 0 : index
    %c0_216 = arith.constant 0 : index
    %250 = vector.load %arg39[%c0_215, %c0_216] : memref<8x1xf32, #tpu.memory_space<vmem>>, vector<8x1xf32>
    %251 = arith.addf %249, %250 : vector<8x1xf32>
    %c1_217 = arith.constant 1 : index
    %c0_218 = arith.constant 0 : index
    %252 = vector.load %arg2[%c1_217, %c0_218] : memref<2x242xf32, #tpu.memory_space<vmem>>, vector<1x242xf32>
    %253 = vector.broadcast %251 : vector<8x1xf32> to vector<8x242xf32>
    %254 = vector.broadcast %252 : vector<1x242xf32> to vector<8x242xf32>
    %255 = arith.mulf %253, %254 : vector<8x242xf32>
    %256 = arith.addf %226, %255 : vector<8x242xf32>
    %c0_219 = arith.constant 0 : index
    %c0_220 = arith.constant 0 : index
    %257 = vector.load %arg40[%c0_219, %c0_220] : memref<8x8xf32, #tpu.memory_space<vmem>>, vector<8x8xf32>
    %cst_221 = arith.constant dense<0.000000e+00> : vector<8x242xf32>
    %258 = tpu.matmul %257, %256, %cst_221 {dimension_numbers = #tpu.dot_dimension_numbers<[1], [0], [0], [1], [0, 0, 1, 1], [], []>} : vector<8x8xf32>, vector<8x242xf32>, vector<8x242xf32> -> vector<8x242xf32>
    %c0_222 = arith.constant 0 : index
    %c0_223 = arith.constant 0 : index
    %259 = vector.load %arg41[%c0_222, %c0_223] : memref<8x1xf32, #tpu.memory_space<vmem>>, vector<8x1xf32>
    %260 = vector.broadcast %259 : vector<8x1xf32> to vector<8x242xf32>
    %261 = arith.mulf %258, %260 : vector<8x242xf32>
    %c0_224 = arith.constant 0 : index
    %c0_225 = arith.constant 0 : index
    %262 = vector.load %arg42[%c0_224, %c0_225] : memref<8x1xf32, #tpu.memory_space<vmem>>, vector<8x1xf32>
    %263 = vector.broadcast %262 : vector<8x1xf32> to vector<8x242xf32>
    %264 = arith.addf %261, %263 : vector<8x242xf32>
    %265 = arith.addf %264, %176 : vector<8x242xf32>
    %266 = arith.negf %265 : vector<8x242xf32>
    %267 = math.exp %266 : vector<8x242xf32>
    %cst_226 = arith.constant 1.000000e+00 : f32
    %268 = vector.broadcast %cst_226 : f32 to vector<8x242xf32>
    %269 = arith.addf %268, %267 : vector<8x242xf32>
    %270 = arith.divf %268, %269 : vector<8x242xf32>
    %271 = arith.mulf %265, %270 : vector<8x242xf32>
    %272 = vector.broadcast %4 : vector<1x242xf32> to vector<8x242xf32>
    %273 = arith.mulf %271, %272 : vector<8x242xf32>
    %c0_227 = arith.constant 0 : index
    %c0_228 = arith.constant 0 : index
    %274 = vector.load %arg43[%c0_227, %c0_228] : memref<2x8xf32, #tpu.memory_space<vmem>>, vector<2x8xf32>
    %cst_229 = arith.constant dense<0.000000e+00> : vector<2x242xf32>
    %275 = tpu.matmul %274, %273, %cst_229 {dimension_numbers = #tpu.dot_dimension_numbers<[1], [0], [0], [1], [0, 0, 1, 1], [], []>} : vector<2x8xf32>, vector<8x242xf32>, vector<2x242xf32> -> vector<2x242xf32>
    %c0_230 = arith.constant 0 : index
    %c0_231 = arith.constant 0 : index
    %276 = vector.load %arg44[%c0_230, %c0_231] : memref<2x1xf32, #tpu.memory_space<vmem>>, vector<2x1xf32>
    %277 = vector.broadcast %276 : vector<2x1xf32> to vector<2x242xf32>
    %278 = arith.mulf %275, %277 : vector<2x242xf32>
    %c0_232 = arith.constant 0 : index
    %c0_233 = arith.constant 0 : index
    %279 = vector.load %arg45[%c0_232, %c0_233] : memref<2x1xf32, #tpu.memory_space<vmem>>, vector<2x1xf32>
    %280 = vector.broadcast %279 : vector<2x1xf32> to vector<2x242xf32>
    %281 = arith.addf %278, %280 : vector<2x242xf32>
    %cst_234 = arith.constant 0.000000e+00 : f32
    %282 = vector.broadcast %cst_234 : f32 to vector<2x242xf32>
    %283 = arith.maximumf %281, %282 : vector<2x242xf32>
    %284 = vector.extract_strided_slice %283 {offsets = [0, 0], sizes = [2, 121], strides = [1, 1]} : vector<2x242xf32> to vector<2x121xf32>
    %285 = vector.extract_strided_slice %284 {offsets = [0, 0], sizes = [1, 121], strides = [1, 1]} : vector<2x121xf32> to vector<1x121xf32>
    %c0_235 = arith.constant 0 : index
    %c0_236 = arith.constant 0 : index
    %286 = vector.load %arg46[%c0_235, %c0_236] : memref<121x82xf32, #tpu.memory_space<vmem>>, vector<121x82xf32>
    %cst_237 = arith.constant dense<0.000000e+00> : vector<1x82xf32>
    %287 = tpu.matmul %285, %286, %cst_237 {dimension_numbers = #tpu.dot_dimension_numbers<[1], [0], [0], [1], [0, 0, 1, 1], [], []>} : vector<1x121xf32>, vector<121x82xf32>, vector<1x82xf32> -> vector<1x82xf32>
    %c0_238 = arith.constant 0 : index
    %c0_239 = arith.constant 0 : index
    %288 = vector.load %arg47[%c0_238, %c0_239] : memref<1x82xf32, #tpu.memory_space<vmem>>, vector<1x82xf32>
    %289 = arith.addf %287, %288 : vector<1x82xf32>
    %c0_240 = arith.constant 0 : index
    %c0_241 = arith.constant 0 : index
    %290 = vector.load %arg52[%c0_240, %c0_241] : memref<2x82xf32, #tpu.memory_space<vmem>>, vector<1x82xf32>
    tpu.vector_store %arg52[%c0_240, %c0_241], %289 {strides = array<i32>} : memref<2x82xf32, #tpu.memory_space<vmem>>, vector<1x82xf32>,
    %291 = vector.extract_strided_slice %284 {offsets = [1, 0], sizes = [1, 121], strides = [1, 1]} : vector<2x121xf32> to vector<1x121xf32>
    %c0_242 = arith.constant 0 : index
    %c0_243 = arith.constant 0 : index
    %292 = vector.load %arg48[%c0_242, %c0_243] : memref<121x32xf32, #tpu.memory_space<vmem>>, vector<121x32xf32>
    %cst_244 = arith.constant dense<0.000000e+00> : vector<1x32xf32>
    %293 = tpu.matmul %291, %292, %cst_244 {dimension_numbers = #tpu.dot_dimension_numbers<[1], [0], [0], [1], [0, 0, 1, 1], [], []>} : vector<1x121xf32>, vector<121x32xf32>, vector<1x32xf32> -> vector<1x32xf32>
    %c0_245 = arith.constant 0 : index
    %c0_246 = arith.constant 0 : index
    %294 = vector.load %arg49[%c0_245, %c0_246] : memref<1x32xf32, #tpu.memory_space<vmem>>, vector<1x32xf32>
    %295 = arith.addf %293, %294 : vector<1x32xf32>
    %cst_247 = arith.constant 0.000000e+00 : f32
    %296 = vector.broadcast %cst_247 : f32 to vector<1x32xf32>
    %297 = arith.maximumf %295, %296 : vector<1x32xf32>
    %c0_248 = arith.constant 0 : index
    %c0_249 = arith.constant 0 : index
    %298 = vector.load %arg50[%c0_248, %c0_249] : memref<32x1xf32, #tpu.memory_space<vmem>>, vector<32x1xf32>
    %cst_250 = arith.constant dense<0.000000e+00> : vector<1x1xf32>
    %299 = tpu.matmul %297, %298, %cst_250 {dimension_numbers = #tpu.dot_dimension_numbers<[1], [0], [0], [1], [0, 0, 1, 1], [], []>} : vector<1x32xf32>, vector<32x1xf32>, vector<1x1xf32> -> vector<1x1xf32>
    %c0_251 = arith.constant 0 : index
    %c0_252 = arith.constant 0 : index
    %300 = vector.load %arg51[%c0_251, %c0_252] : memref<1x1xf32, #tpu.memory_space<vmem>>, vector<1x1xf32>
    %301 = arith.addf %299, %300 : vector<1x1xf32>
    %302 = math.tanh %301 : vector<1x1xf32>
    %c0_253 = arith.constant 0 : index
    %c0_254 = arith.constant 0 : index
    %303 = vector.load %arg53[%c0_253, %c0_254] : memref<2x1xf32, #tpu.memory_space<vmem>>, vector<1x1xf32>
    tpu.vector_store %arg53[%c0_253, %c0_254], %302 {strides = array<i32>} : memref<2x1xf32, #tpu.memory_space<vmem>>, vector<1x1xf32>,
    %304 = vector.extract_strided_slice %283 {offsets = [0, 121], sizes = [2, 121], strides = [1, 1]} : vector<2x242xf32> to vector<2x121xf32>
    %305 = vector.extract_strided_slice %304 {offsets = [0, 0], sizes = [1, 121], strides = [1, 1]} : vector<2x121xf32> to vector<1x121xf32>
    %c0_255 = arith.constant 0 : index
    %c0_256 = arith.constant 0 : index
    %306 = vector.load %arg46[%c0_255, %c0_256] : memref<121x82xf32, #tpu.memory_space<vmem>>, vector<121x82xf32>
    %cst_257 = arith.constant dense<0.000000e+00> : vector<1x82xf32>
    %307 = tpu.matmul %305, %306, %cst_257 {dimension_numbers = #tpu.dot_dimension_numbers<[1], [0], [0], [1], [0, 0, 1, 1], [], []>} : vector<1x121xf32>, vector<121x82xf32>, vector<1x82xf32> -> vector<1x82xf32>
    %c0_258 = arith.constant 0 : index
    %c0_259 = arith.constant 0 : index
    %308 = vector.load %arg47[%c0_258, %c0_259] : memref<1x82xf32, #tpu.memory_space<vmem>>, vector<1x82xf32>
    %309 = arith.addf %307, %308 : vector<1x82xf32>
    %c1_260 = arith.constant 1 : index
    %c0_261 = arith.constant 0 : index
    %310 = vector.load %arg52[%c1_260, %c0_261] : memref<2x82xf32, #tpu.memory_space<vmem>>, vector<1x82xf32>
    tpu.vector_store %arg52[%c1_260, %c0_261], %309 {strides = array<i32>} : memref<2x82xf32, #tpu.memory_space<vmem>>, vector<1x82xf32>,
    %311 = vector.extract_strided_slice %304 {offsets = [1, 0], sizes = [1, 121], strides = [1, 1]} : vector<2x121xf32> to vector<1x121xf32>
    %c0_262 = arith.constant 0 : index
    %c0_263 = arith.constant 0 : index
    %312 = vector.load %arg48[%c0_262, %c0_263] : memref<121x32xf32, #tpu.memory_space<vmem>>, vector<121x32xf32>
    %cst_264 = arith.constant dense<0.000000e+00> : vector<1x32xf32>
    %313 = tpu.matmul %311, %312, %cst_264 {dimension_numbers = #tpu.dot_dimension_numbers<[1], [0], [0], [1], [0, 0, 1, 1], [], []>} : vector<1x121xf32>, vector<121x32xf32>, vector<1x32xf32> -> vector<1x32xf32>
    %c0_265 = arith.constant 0 : index
    %c0_266 = arith.constant 0 : index
    %314 = vector.load %arg49[%c0_265, %c0_266] : memref<1x32xf32, #tpu.memory_space<vmem>>, vector<1x32xf32>
    %315 = arith.addf %313, %314 : vector<1x32xf32>
    %cst_267 = arith.constant 0.000000e+00 : f32
    %316 = vector.broadcast %cst_267 : f32 to vector<1x32xf32>
    %317 = arith.maximumf %315, %316 : vector<1x32xf32>
    %c0_268 = arith.constant 0 : index
    %c0_269 = arith.constant 0 : index
    %318 = vector.load %arg50[%c0_268, %c0_269] : memref<32x1xf32, #tpu.memory_space<vmem>>, vector<32x1xf32>
    %cst_270 = arith.constant dense<0.000000e+00> : vector<1x1xf32>
    %319 = tpu.matmul %317, %318, %cst_270 {dimension_numbers = #tpu.dot_dimension_numbers<[1], [0], [0], [1], [0, 0, 1, 1], [], []>} : vector<1x32xf32>, vector<32x1xf32>, vector<1x1xf32> -> vector<1x1xf32>
    %c0_271 = arith.constant 0 : index
    %c0_272 = arith.constant 0 : index
    %320 = vector.load %arg51[%c0_271, %c0_272] : memref<1x1xf32, #tpu.memory_space<vmem>>, vector<1x1xf32>
    %321 = arith.addf %319, %320 : vector<1x1xf32>
    %322 = math.tanh %321 : vector<1x1xf32>
    %c1_273 = arith.constant 1 : index
    %c0_274 = arith.constant 0 : index
    %323 = vector.load %arg53[%c1_273, %c0_274] : memref<2x1xf32, #tpu.memory_space<vmem>>, vector<1x1xf32>
    tpu.vector_store %arg53[%c1_273, %c0_274], %322 {strides = array<i32>} : memref<2x1xf32, #tpu.memory_space<vmem>>, vector<1x1xf32>,
    return
  }
  func.func @transform_0(%arg0: i32) -> (i32, i32) {
    %c0_i32 = arith.constant 0 : i32
    %c0_i32_0 = arith.constant 0 : i32
    %c0_i32_1 = arith.constant 0 : i32
    return %c0_i32, %c0_i32_0 : i32, i32
  }
  func.func @transform_1(%arg0: i32) -> (i32, i32) {
    %c0_i32 = arith.constant 0 : i32
    %c0_i32_0 = arith.constant 0 : i32
    %c0_i32_1 = arith.constant 0 : i32
    return %c0_i32, %c0_i32_0 : i32, i32
  }
  func.func @transform_2(%arg0: i32) -> (i32, i32) {
    %c0_i32 = arith.constant 0 : i32
    %c0_i32_0 = arith.constant 0 : i32
    %c0_i32_1 = arith.constant 0 : i32
    return %c0_i32, %c0_i32_0 : i32, i32
  }
  func.func @transform_3(%arg0: i32) -> (i32, i32) {
    %c0_i32 = arith.constant 0 : i32
    %c0_i32_0 = arith.constant 0 : i32
    %c0_i32_1 = arith.constant 0 : i32
    return %c0_i32, %c0_i32_0 : i32, i32
  }
  func.func @transform_4(%arg0: i32) -> (i32, i32) {
    %c0_i32 = arith.constant 0 : i32
    %c0_i32_0 = arith.constant 0 : i32
    %c0_i32_1 = arith.constant 0 : i32
    return %c0_i32, %c0_i32_0 : i32, i32
  }
  func.func @transform_5(%arg0: i32) -> (i32, i32) {
    %c0_i32 = arith.constant 0 : i32
    %c0_i32_0 = arith.constant 0 : i32
    %c0_i32_1 = arith.constant 0 : i32
    return %c0_i32, %c0_i32_0 : i32, i32
  }
  func.func @transform_6(%arg0: i32) -> (i32, i32) {
    %c0_i32 = arith.constant 0 : i32
    %c0_i32_0 = arith.constant 0 : i32
    %c0_i32_1 = arith.constant 0 : i32
    return %c0_i32, %c0_i32_0 : i32, i32
  }
  func.func @transform_7(%arg0: i32) -> (i32, i32) {
    %c0_i32 = arith.constant 0 : i32
    %c0_i32_0 = arith.constant 0 : i32
    %c0_i32_1 = arith.constant 0 : i32
    return %c0_i32, %c0_i32_0 : i32, i32
  }
  func.func @transform_8(%arg0: i32) -> (i32, i32) {
    %c0_i32 = arith.constant 0 : i32
    %c0_i32_0 = arith.constant 0 : i32
    %c0_i32_1 = arith.constant 0 : i32
    return %c0_i32, %c0_i32_0 : i32, i32
  }
  func.func @transform_9(%arg0: i32) -> (i32, i32) {
    %c0_i32 = arith.constant 0 : i32
    %c0_i32_0 = arith.constant 0 : i32
    %c0_i32_1 = arith.constant 0 : i32
    return %c0_i32, %c0_i32_0 : i32, i32
  }
  func.func @transform_10(%arg0: i32) -> (i32, i32) {
    %c0_i32 = arith.constant 0 : i32
    %c0_i32_0 = arith.constant 0 : i32
    %c0_i32_1 = arith.constant 0 : i32
    return %c0_i32, %c0_i32_0 : i32, i32
  }
  func.func @transform_11(%arg0: i32) -> (i32, i32) {
    %c0_i32 = arith.constant 0 : i32
    %c0_i32_0 = arith.constant 0 : i32
    %c0_i32_1 = arith.constant 0 : i32
    return %c0_i32, %c0_i32_0 : i32, i32
  }
  func.func @transform_12(%arg0: i32) -> (i32, i32) {
    %c0_i32 = arith.constant 0 : i32
    %c0_i32_0 = arith.constant 0 : i32
    %c0_i32_1 = arith.constant 0 : i32
    return %c0_i32, %c0_i32_0 : i32, i32
  }
  func.func @transform_13(%arg0: i32) -> (i32, i32) {
    %c0_i32 = arith.constant 0 : i32
    %c0_i32_0 = arith.constant 0 : i32
    %c0_i32_1 = arith.constant 0 : i32
    return %c0_i32, %c0_i32_0 : i32, i32
  }
  func.func @transform_14(%arg0: i32) -> (i32, i32) {
    %c0_i32 = arith.constant 0 : i32
    %c0_i32_0 = arith.constant 0 : i32
    %c0_i32_1 = arith.constant 0 : i32
    return %c0_i32, %c0_i32_0 : i32, i32
  }
  func.func @transform_15(%arg0: i32) -> (i32, i32) {
    %c0_i32 = arith.constant 0 : i32
    %c0_i32_0 = arith.constant 0 : i32
    %c0_i32_1 = arith.constant 0 : i32
    return %c0_i32, %c0_i32_0 : i32, i32
  }
  func.func @transform_16(%arg0: i32) -> (i32, i32) {
    %c0_i32 = arith.constant 0 : i32
    %c0_i32_0 = arith.constant 0 : i32
    %c0_i32_1 = arith.constant 0 : i32
    return %c0_i32, %c0_i32_0 : i32, i32
  }
  func.func @transform_17(%arg0: i32) -> (i32, i32) {
    %c0_i32 = arith.constant 0 : i32
    %c0_i32_0 = arith.constant 0 : i32
    %c0_i32_1 = arith.constant 0 : i32
    return %c0_i32, %c0_i32_0 : i32, i32
  }
  func.func @transform_18(%arg0: i32) -> (i32, i32) {
    %c0_i32 = arith.constant 0 : i32
    %c0_i32_0 = arith.constant 0 : i32
    %c0_i32_1 = arith.constant 0 : i32
    return %c0_i32, %c0_i32_0 : i32, i32
  }
  func.func @transform_19(%arg0: i32) -> (i32, i32) {
    %c0_i32 = arith.constant 0 : i32
    %c0_i32_0 = arith.constant 0 : i32
    %c0_i32_1 = arith.constant 0 : i32
    return %c0_i32, %c0_i32_0 : i32, i32
  }
  func.func @transform_20(%arg0: i32) -> (i32, i32) {
    %c0_i32 = arith.constant 0 : i32
    %c0_i32_0 = arith.constant 0 : i32
    %c0_i32_1 = arith.constant 0 : i32
    return %c0_i32, %c0_i32_0 : i32, i32
  }
  func.func @transform_21(%arg0: i32) -> (i32, i32) {
    %c0_i32 = arith.constant 0 : i32
    %c0_i32_0 = arith.constant 0 : i32
    %c0_i32_1 = arith.constant 0 : i32
    return %c0_i32, %c0_i32_0 : i32, i32
  }
  func.func @transform_22(%arg0: i32) -> (i32, i32) {
    %c0_i32 = arith.constant 0 : i32
    %c0_i32_0 = arith.constant 0 : i32
    %c0_i32_1 = arith.constant 0 : i32
    return %c0_i32, %c0_i32_0 : i32, i32
  }
  func.func @transform_23(%arg0: i32) -> (i32, i32) {
    %c0_i32 = arith.constant 0 : i32
    %c0_i32_0 = arith.constant 0 : i32
    %c0_i32_1 = arith.constant 0 : i32
    return %c0_i32, %c0_i32_0 : i32, i32
  }
  func.func @transform_24(%arg0: i32) -> (i32, i32) {
    %c0_i32 = arith.constant 0 : i32
    %c0_i32_0 = arith.constant 0 : i32
    %c0_i32_1 = arith.constant 0 : i32
    return %c0_i32, %c0_i32_0 : i32, i32
  }
  func.func @transform_25(%arg0: i32) -> (i32, i32) {
    %c0_i32 = arith.constant 0 : i32
    %c0_i32_0 = arith.constant 0 : i32
    %c0_i32_1 = arith.constant 0 : i32
    return %c0_i32, %c0_i32_0 : i32, i32
  }
  func.func @transform_26(%arg0: i32) -> (i32, i32) {
    %c0_i32 = arith.constant 0 : i32
    %c0_i32_0 = arith.constant 0 : i32
    %c0_i32_1 = arith.constant 0 : i32
    return %c0_i32, %c0_i32_0 : i32, i32
  }
  func.func @transform_27(%arg0: i32) -> (i32, i32) {
    %c0_i32 = arith.constant 0 : i32
    %c0_i32_0 = arith.constant 0 : i32
    %c0_i32_1 = arith.constant 0 : i32
    return %c0_i32, %c0_i32_0 : i32, i32
  }
  func.func @transform_28(%arg0: i32) -> (i32, i32) {
    %c0_i32 = arith.constant 0 : i32
    %c0_i32_0 = arith.constant 0 : i32
    %c0_i32_1 = arith.constant 0 : i32
    return %c0_i32, %c0_i32_0 : i32, i32
  }
  func.func @transform_29(%arg0: i32) -> (i32, i32) {
    %c0_i32 = arith.constant 0 : i32
    %c0_i32_0 = arith.constant 0 : i32
    %c0_i32_1 = arith.constant 0 : i32
    return %c0_i32, %c0_i32_0 : i32, i32
  }
  func.func @transform_30(%arg0: i32) -> (i32, i32) {
    %c0_i32 = arith.constant 0 : i32
    %c0_i32_0 = arith.constant 0 : i32
    %c0_i32_1 = arith.constant 0 : i32
    return %c0_i32, %c0_i32_0 : i32, i32
  }
  func.func @transform_31(%arg0: i32) -> (i32, i32) {
    %c0_i32 = arith.constant 0 : i32
    %c0_i32_0 = arith.constant 0 : i32
    %c0_i32_1 = arith.constant 0 : i32
    return %c0_i32, %c0_i32_0 : i32, i32
  }
  func.func @transform_32(%arg0: i32) -> (i32, i32) {
    %c0_i32 = arith.constant 0 : i32
    %c0_i32_0 = arith.constant 0 : i32
    %c0_i32_1 = arith.constant 0 : i32
    return %c0_i32, %c0_i32_0 : i32, i32
  }
  func.func @transform_33(%arg0: i32) -> (i32, i32) {
    %c0_i32 = arith.constant 0 : i32
    %c0_i32_0 = arith.constant 0 : i32
    %c0_i32_1 = arith.constant 0 : i32
    return %c0_i32, %c0_i32_0 : i32, i32
  }
  func.func @transform_34(%arg0: i32) -> (i32, i32) {
    %c0_i32 = arith.constant 0 : i32
    %c0_i32_0 = arith.constant 0 : i32
    %c0_i32_1 = arith.constant 0 : i32
    return %c0_i32, %c0_i32_0 : i32, i32
  }
  func.func @transform_35(%arg0: i32) -> (i32, i32) {
    %c0_i32 = arith.constant 0 : i32
    %c0_i32_0 = arith.constant 0 : i32
    %c0_i32_1 = arith.constant 0 : i32
    return %c0_i32, %c0_i32_0 : i32, i32
  }
  func.func @transform_36(%arg0: i32) -> (i32, i32) {
    %c0_i32 = arith.constant 0 : i32
    %c0_i32_0 = arith.constant 0 : i32
    %c0_i32_1 = arith.constant 0 : i32
    return %c0_i32, %c0_i32_0 : i32, i32
  }
  func.func @transform_37(%arg0: i32) -> (i32, i32) {
    %c0_i32 = arith.constant 0 : i32
    %c0_i32_0 = arith.constant 0 : i32
    %c0_i32_1 = arith.constant 0 : i32
    return %c0_i32, %c0_i32_0 : i32, i32
  }
  func.func @transform_38(%arg0: i32) -> (i32, i32) {
    %c0_i32 = arith.constant 0 : i32
    %c0_i32_0 = arith.constant 0 : i32
    %c0_i32_1 = arith.constant 0 : i32
    return %c0_i32, %c0_i32_0 : i32, i32
  }
  func.func @transform_39(%arg0: i32) -> (i32, i32) {
    %c0_i32 = arith.constant 0 : i32
    %c0_i32_0 = arith.constant 0 : i32
    %c0_i32_1 = arith.constant 0 : i32
    return %c0_i32, %c0_i32_0 : i32, i32
  }
  func.func @transform_40(%arg0: i32) -> (i32, i32) {
    %c0_i32 = arith.constant 0 : i32
    %c0_i32_0 = arith.constant 0 : i32
    %c0_i32_1 = arith.constant 0 : i32
    return %c0_i32, %c0_i32_0 : i32, i32
  }
  func.func @transform_41(%arg0: i32) -> (i32, i32) {
    %c0_i32 = arith.constant 0 : i32
    %c0_i32_0 = arith.constant 0 : i32
    %c0_i32_1 = arith.constant 0 : i32
    return %c0_i32, %c0_i32_0 : i32, i32
  }
  func.func @transform_42(%arg0: i32) -> (i32, i32) {
    %c0_i32 = arith.constant 0 : i32
    %c0_i32_0 = arith.constant 0 : i32
    %c0_i32_1 = arith.constant 0 : i32
    return %c0_i32, %c0_i32_0 : i32, i32
  }
  func.func @transform_43(%arg0: i32) -> (i32, i32) {
    %c0_i32 = arith.constant 0 : i32
    %c0_i32_0 = arith.constant 0 : i32
    %c0_i32_1 = arith.constant 0 : i32
    return %c0_i32, %c0_i32_0 : i32, i32
  }
  func.func @transform_44(%arg0: i32) -> (i32, i32) {
    %c0_i32 = arith.constant 0 : i32
    %c0_i32_0 = arith.constant 0 : i32
    %c0_i32_1 = arith.constant 0 : i32
    return %c0_i32, %c0_i32_0 : i32, i32
  }
  func.func @transform_45(%arg0: i32) -> (i32, i32) {
    %c0_i32 = arith.constant 0 : i32
    %c0_i32_0 = arith.constant 0 : i32
    %c0_i32_1 = arith.constant 0 : i32
    return %c0_i32, %c0_i32_0 : i32, i32
  }
  func.func @transform_46(%arg0: i32) -> (i32, i32) {
    %c0_i32 = arith.constant 0 : i32
    %c0_i32_0 = arith.constant 0 : i32
    %c0_i32_1 = arith.constant 0 : i32
    return %c0_i32, %c0_i32_0 : i32, i32
  }
  func.func @transform_47(%arg0: i32) -> (i32, i32) {
    %c0_i32 = arith.constant 0 : i32
    %c0_i32_0 = arith.constant 0 : i32
    %c0_i32_1 = arith.constant 0 : i32
    return %c0_i32, %c0_i32_0 : i32, i32
  }
  func.func @transform_48(%arg0: i32) -> (i32, i32) {
    %c0_i32 = arith.constant 0 : i32
    %c0_i32_0 = arith.constant 0 : i32
    %c0_i32_1 = arith.constant 0 : i32
    return %c0_i32, %c0_i32_0 : i32, i32
  }
  func.func @transform_49(%arg0: i32) -> (i32, i32) {
    %c0_i32 = arith.constant 0 : i32
    %c0_i32_0 = arith.constant 0 : i32
    %c0_i32_1 = arith.constant 0 : i32
    return %c0_i32, %c0_i32_0 : i32, i32
  }
  func.func @transform_50(%arg0: i32) -> (i32, i32) {
    %c0_i32 = arith.constant 0 : i32
    %c0_i32_0 = arith.constant 0 : i32
    %c0_i32_1 = arith.constant 0 : i32
    return %c0_i32, %c0_i32_0 : i32, i32
  }
  func.func @transform_51(%arg0: i32) -> (i32, i32) {
    %c0_i32 = arith.constant 0 : i32
    %c0_i32_0 = arith.constant 0 : i32
    %c0_i32_1 = arith.constant 0 : i32
    return %c0_i32, %c0_i32_0 : i32, i32
  }
  func.func @transform_52(%arg0: i32) -> (i32, i32) {
    %c0_i32 = arith.constant 0 : i32
    %c0_i32_0 = arith.constant 0 : i32
    %c0_i32_1 = arith.constant 0 : i32
    return %c0_i32, %c0_i32_0 : i32, i32
  }
}

</mosaic_0001>

<bundles_post_ra>
// kernel: pv_forward.1
= control target key start
LH: loop header
LB: loop body
LE: loop exit
PB: predicated region body
PF: predicated region fallthrough
CT: control target
= control target key end

     0   :  { %s3716_s6 = smov 1   ;;  %s3717_s10 = smov 2   ;;  %s4547_s0 = inlined_call_operand.smem [shape: u32[53], index: -1, kind: input, shape index: {}] }
   0x1   :  { %s3792_s5 = sld [smem:[%s4547_s0]]   ;;  %s3718_s14 = smov 3  }
   0x2   :  { %s3797_s9 = sld [smem:[%s4547_s0 + %s3716_s6]]   ;;  %s3719_s18 = smov 4  }
   0x3   :  { %s3802_s13 = sld [smem:[%s4547_s0 + %s3717_s10]]   ;;  %s3720_s22 = smov 5  }
   0x4   :  { %s3807_s17 = sld [smem:[%s4547_s0 + %s3718_s14]]   ;;  %s3721_s26 = smov 6  }
   0x5   :  { %s3812_s21 = sld [smem:[%s4547_s0 + %s3719_s18]]   ;;  %s3722_s30 = smov 7  }
   0x6   :  { %s3817_s25 = sld [smem:[%s4547_s0 + %s3720_s22]]   ;;  %s3723_s4 = smov 8  }
   0x7   :  { %s3822_s29 = sld [smem:[%s4547_s0 + %s3721_s26]]   ;;  %s3724_s10 = smov 9  }
   0x8   :  { %4553 = sst [smem:[#allocation7_spill]] %s3797_s9  ;;  %s3725_s15 = smov 10  }
   0x9   :  { %s3827_s3 = sld [smem:[%s4547_s0 + %s3722_s30]]   ;;  %s3726_s20 = smov 11  }
   0xa   :  { %s3832_s8 = sld [smem:[%s4547_s0 + %s3723_s4]]   ;;  %s3727_s26 = smov 12  }
   0xb   :  { %s3837_s14 = sld [smem:[%s4547_s0 + %s3724_s10]]   ;;  %s3728_s1 = smov 13  }
   0xc   :  { %s3842_s19 = sld [smem:[%s4547_s0 + %s3725_s15]]   ;;  %s3729_s7 = smov 14  }
   0xd   :  { %s3847_s24 = sld [smem:[%s4547_s0 + %s3726_s20]]   ;;  %s3730_s15 = smov 15  }
   0xe   :  { %s3852_s30 = sld [smem:[%s4547_s0 + %s3727_s26]]   ;;  %s3731_s22 = smov 16  }
   0xf   :  { %s3857_s6 = sld [smem:[%s4547_s0 + %s3728_s1]]   ;;  %s3732_s28 = smov 17  }
  0x10   :  { %s3862_s12 = sld [smem:[%s4547_s0 + %s3729_s7]]   ;;  %s3733_s7 = smov 18  }
  0x11   :  { %s3867_s20 = sld [smem:[%s4547_s0 + %s3730_s15]]   ;;  %s3734_s15 = smov 19  }
  0x12   :  { %s3872_s27 = sld [smem:[%s4547_s0 + %s3731_s22]]   ;;  %s3735_s22 = smov 20  }
  0x13   :  { %s3877_s4 = sld [smem:[%s4547_s0 + %s3732_s28]]   ;;  %s3736_s28 = smov 21  }
  0x14   :  { %4554 = sst [smem:[#allocation8_spill]] %s3852_s30  ;;  %s3766_s16 = smov 51  }
  0x15   :  { %s3882_s9 = sld [smem:[%s4547_s0 + %s3733_s7]]   ;;  %s3737_s7 = smov 22  }
  0x16   :  { %s3892_s30 = sld [smem:[%s4547_s0 + %s3735_s22]]   ;;  %s3739_s22 = smov 24  }
  0x17   :  { %4555 = sst [smem:[#allocation9_spill]] %s3867_s20  ;;  %s3767_s23 = smov 52  }
  0x18   :  { %4556 = sst [smem:[#allocation10_spill]] %s3872_s27 }
  0x19   :  { %s3887_s20 = sld [smem:[%s4547_s0 + %s3734_s15]]   ;;  %s3738_s15 = smov 23  }
  0x1a   :  { %s3897_s27 = sld [smem:[%s4547_s0 + %s3736_s28]]   ;;  %s3740_s28 = smov 25  }
  0x1b   :  { %4557 = sst [smem:[#allocation11_spill]] %s3882_s9 }
  0x1c   :  { %4559 = sst [smem:[#allocation13_spill]] %s3892_s30 }
  0x1d   :  { %s3902_s9 = sld [smem:[%s4547_s0 + %s3737_s7]]   ;;  %s3741_s7 = smov 26  }
  0x1e   :  { %s3912_s30 = sld [smem:[%s4547_s0 + %s3739_s22]]   ;;  %s3743_s22 = smov 28  }
  0x1f   :  { %4558 = sst [smem:[#allocation12_spill]] %s3887_s20 }
  0x20   :  { %4560 = sst [smem:[#allocation14_spill]] %s3897_s27 }
  0x21   :  { %s3907_s20 = sld [smem:[%s4547_s0 + %s3738_s15]]   ;;  %s3742_s15 = smov 27  }
  0x22   :  { %s3917_s27 = sld [smem:[%s4547_s0 + %s3740_s28]]   ;;  %s3744_s28 = smov 29  }
  0x23   :  { %4561 = sst [smem:[#allocation15_spill]] %s3902_s9 }
  0x24   :  { %4563 = sst [smem:[#allocation17_spill]] %s3912_s30 }
  0x25   :  { %s3922_s9 = sld [smem:[%s4547_s0 + %s3741_s7]]   ;;  %s3745_s7 = smov 30  }
  0x26   :  { %s3932_s30 = sld [smem:[%s4547_s0 + %s3743_s22]]   ;;  %s3747_s22 = smov 32  }
  0x27   :  { %4562 = sst [smem:[#allocation16_spill]] %s3907_s20 }
  0x28   :  { %4564 = sst [smem:[#allocation18_spill]] %s3917_s27 }
  0x29   :  { %s3927_s20 = sld [smem:[%s4547_s0 + %s3742_s15]]   ;;  %s3746_s15 = smov 31  }
  0x2a   :  { %s3937_s27 = sld [smem:[%s4547_s0 + %s3744_s28]]   ;;  %s3748_s28 = smov 33  }
  0x2b   :  { %4565 = sst [smem:[#allocation19_spill]] %s3922_s9 }
  0x2c   :  { %4567 = sst [smem:[#allocation21_spill]] %s3932_s30 }
  0x2d   :  { %s3942_s9 = sld [smem:[%s4547_s0 + %s3745_s7]]   ;;  %s3749_s7 = smov 34  }
  0x2e   :  { %s3952_s30 = sld [smem:[%s4547_s0 + %s3747_s22]]   ;;  %s3751_s22 = smov 36  }
  0x2f   :  { %4566 = sst [smem:[#allocation20_spill]] %s3927_s20 }
  0x30   :  { %4568 = sst [smem:[#allocation22_spill]] %s3937_s27 }
  0x31   :  { %s3947_s20 = sld [smem:[%s4547_s0 + %s3746_s15]]   ;;  %s3750_s15 = smov 35  }
  0x32   :  { %s3957_s27 = sld [smem:[%s4547_s0 + %s3748_s28]]   ;;  %s3752_s28 = smov 37  }
  0x33   :  { %4569 = sst [smem:[#allocation23_spill]] %s3942_s9 }
  0x34   :  { %4571 = sst [smem:[#allocation25_spill]] %s3952_s30 }
  0x35   :  { %s3962_s9 = sld [smem:[%s4547_s0 + %s3749_s7]]   ;;  %s3753_s7 = smov 38  }
  0x36   :  { %s3972_s30 = sld [smem:[%s4547_s0 + %s3751_s22]]   ;;  %s3755_s22 = smov 40  }
  0x37   :  { %4570 = sst [smem:[#allocation24_spill]] %s3947_s20 }
  0x38   :  { %4572 = sst [smem:[#allocation26_spill]] %s3957_s27 }
  0x39   :  { %s3967_s20 = sld [smem:[%s4547_s0 + %s3750_s15]]   ;;  %s3754_s15 = smov 39  }
  0x3a   :  { %s3977_s27 = sld [smem:[%s4547_s0 + %s3752_s28]]   ;;  %s3756_s28 = smov 41  }
  0x3b   :  { %4573 = sst [smem:[#allocation27_spill]] %s3962_s9 }
  0x3c   :  { %4575 = sst [smem:[#allocation29_spill]] %s3972_s30 }
  0x3d   :  { %s3982_s9 = sld [smem:[%s4547_s0 + %s3753_s7]]   ;;  %s3757_s7 = smov 42  }
  0x3e   :  { %s3992_s30 = sld [smem:[%s4547_s0 + %s3755_s22]]   ;;  %s3759_s22 = smov 44  }
  0x3f   :  { %4574 = sst [smem:[#allocation28_spill]] %s3967_s20 }
  0x40   :  { %4576 = sst [smem:[#allocation30_spill]] %s3977_s27 }
  0x41   :  { %s3987_s20 = sld [smem:[%s4547_s0 + %s3754_s15]]   ;;  %s3758_s15 = smov 43  }
  0x42   :  { %s3997_s27 = sld [smem:[%s4547_s0 + %s3756_s28]]   ;;  %s3760_s28 = smov 45  }
  0x43   :  { %4577 = sst [smem:[#allocation31_spill]] %s3982_s9 }
  0x44   :  { %4579 = sst [smem:[#allocation33_spill]] %s3992_s30 }
  0x45   :  { %s4002_s9 = sld [smem:[%s4547_s0 + %s3757_s7]]   ;;  %s3761_s7 = smov 46  }
  0x46   :  { %s4012_s30 = sld [smem:[%s4547_s0 + %s3759_s22]]   ;;  %s3763_s22 = smov 48  }
  0x47   :  { %4578 = sst [smem:[#allocation32_spill]] %s3987_s20 }
  0x48   :  { %4580 = sst [smem:[#allocation34_spill]] %s3997_s27 }
  0x49   :  { %s4007_s20 = sld [smem:[%s4547_s0 + %s3758_s15]]   ;;  %s3762_s15 = smov 47  }
  0x4a   :  { %s4017_s27 = sld [smem:[%s4547_s0 + %s3760_s28]]   ;;  %s3764_s28 = smov 49  }
  0x4b   :  { %4581 = sst [smem:[#allocation35_spill]] %s4002_s9 }
  0x4c   :  { %4583 = sst [smem:[#allocation37_spill]] %s4012_s30 }
  0x4d   :  { %s4022_s9 = sld [smem:[%s4547_s0 + %s3761_s7]]   ;;  %s3765_s7 = smov 50  }
  0x4e   :  { %s4032_s30 = sld [smem:[%s4547_s0 + %s3763_s22]]  }
  0x4f   :  { %4582 = sst [smem:[#allocation36_spill]] %s4007_s20 }
  0x50   :  { %4584 = sst [smem:[#allocation38_spill]] %s4017_s27 }
  0x51   :  { %s4027_s20 = sld [smem:[%s4547_s0 + %s3762_s15]]  }
  0x52   :  { %s4037_s27 = sld [smem:[%s4547_s0 + %s3764_s28]]  }
  0x53   :  { %4585 = sst [smem:[#allocation39_spill]] %s4022_s9 }
  0x54   :  { %4587 = sst [smem:[#allocation41_spill]] %s4032_s30 }
  0x55   :  { %s2921_s9 = sld [smem:[%s4547_s0 + %s3765_s7]]  }
  0x56   :  { %s4050_s30 = sld [smem:[%s4547_s0 + %s3767_s23]]  }
  0x57   :  { %4586 = sst [smem:[#allocation40_spill]] %s4027_s20 }
  0x58   :  { %s4045_s20 = sld [smem:[%s4547_s0 + %s3766_s16]]  }
  0x5b   :  { %v111_v0 = vstv %s2921_s9 }
  0x5c   :  { %112 = vst [vmem:[#allocation3] sm:$0x1] %v111_v0 }
  0x5d   :  { %v226_v1 = vlaneseq  ;;  %vm216_vm0 = vcmask 97280   ;;  %vm218_vm1 = vcmask 1048560  }
  0x5e   :  { %113 = vsyncpa [#allocation5], 0  ;;  %v3768_v3 = vmov 0.0   ;;  %vm220_vm2 = vcmask 80896   ;;  %v222_v4 = vld [vmem:[%s3792_s5] sm:$0x3] }
  0x5f   :  { %v227_v2 = vshrl.u32 %v226_v1, 7  ;;  %217 = vst.msk [vmem:[#allocation2] sm:$0xff] %vm216_vm0, %v3768_v3  ;;  %398 = vmatprep.mubr.f32.mxu0 %v3768_v3  ;;  %494 = vmatprep.mubr.f32.mxu1 %v3768_v3  ;;  %v223_v7 = vld [vmem:[%s3802_s13] sm:$0xff]  ;;  %v224_v10 = vld [vmem:[%s3802_s13 + $0x8] sm:$0xff]  ;;  %s3769_s0 = smov 12   ;;  %vm247_vm3 = vcmask 1047648  }
  0x60   :  { %219 = vst.msk [vmem:[#allocation2 + $0x8] sm:$0xff] %vm218_vm1, %v3768_v3  ;;  %vm249_vm4 = vcmask 1031168   ;;  %s3770_s9 = smov 106   ;;  %s3771_s13 = smov 117   ;;  %v3777_v21 = vmov 0   ;;  %v405_v22 = vld [vmem:[%s3812_s21] sm:$0xff] }
  0x61   :  { %221 = vst.msk [vmem:[#allocation2 + $0x10] sm:$0xff] %vm220_vm2, %v3768_v3  ;;  %v4059_v5 = vsub.s32 0, %v227_v2  ;;  %v4061_v6 = vsub.s32 1, %v227_v2  ;;  %s3772_s28 = smov 127   ;;  %s3773_s1 = smov 115   ;;  %3521 = vset.pattern.permute.xlu0 %v3777_v21  ;;  %3522 = vset.pattern.permute.xlu1 %v3777_v21  ;;  %v413_v23 = vld [vmem:[%s3817_s25] sm:$0xff] }
  0x62   :  { %s3774_s2 = smov 126   ;;  %s3775_s7 = smov 105   ;;  %v509_v24 = vld [vmem:[%s3832_s8] sm:$0xff]  ;;  %vm260_vm5 = vcmask 1039360   ;;  %vm275_vm6 = vcmask 957440   ;;  %vm291_vm7 = vcmask 941056  }
  0x63   :  { %v4065_v8 = vrot.slane %v222_v4, %v4059_v5  ;;  %v4068_v9 = vrot.slane %v222_v4, %v4061_v6  ;;  %s3776_s10 = smov 116   ;;  %s3778_s11 = smov 104   ;;  %v501_v25 = vld [vmem:[%s3827_s3] sm:$0xff]  ;;  %vm283_vm8 = vcmask 949248   ;;  %vm313_vm9 = vcmask 859136  }
  0x64   :  { %vm302_vm10 = vcmask 867328   ;;  %vm324_vm11 = vcmask 850944   ;;  %vm330_vm12 = vcmask 588800   ;;  %vm426_vm13 = vcmask 64512   ;;  %s4589_s21 = sld [smem:[#allocation10_spill]]  ;;  %s4590_s25 = sld [smem:[#allocation12_spill]] }
  0x65   :  { %v236_v11 = vmul.f32 %v4065_v8, %v223_v7  ;;  %v237_v12 = vmul.f32 %v4068_v9, %v224_v10  ;;  %s4592_s3 = sld [smem:[#allocation9_spill]]  ;;  %s4593_s8 = sld [smem:[#allocation11_spill]]  ;;  %vm1918_vm1 = vcmask 1048520   ;;  %vm1920_vm2 = vcmask 932864  }
  0x66   :  { %s4600_s16 = sld [smem:[#allocation28_spill]]  ;;  %s4601_s15 = sld [smem:[#allocation21_spill]] }
  0x67   :  { %240 = vrot.lane.b32.xlu0 %v236_v11, %s3769_s0  ;;  %s4602_s18 = sld [smem:[#allocation27_spill]]  ;;  %s4603_s23 = sld [smem:[#allocation17_spill]] }
  0x68   :  { %v4081_v19 = vld [vmem:[#allocation2 + $0x10] sm:$0xff]  ;;  %s4604_s22 = sld [smem:[#allocation20_spill]]  ;;  %s4605_s26 = sld [smem:[#allocation26_spill]] }
  0x6b   :  { %242 = vrot.lane.b32.xlu0 %v237_v12, %s3769_s0  ;;  %v329_v12 = vld [vmem:[%s3807_s17] sm:$0xff]  ;;  %s4588_s17 = sld [smem:[#allocation13_spill]] }
  0xd9   :  { %v241_v13 = vpop.permute.xlu0 %240 }
  0xda   :  { %248 = vst.msk [vmem:[#allocation2] sm:$0xff] %vm247_vm3, %v241_v13 }
  0xdd   :  { %v243_v14 = vpop.permute.xlu0 %242 }
  0xde   :  { %v244_v15 = vsel %vm216_vm0, %v241_v13, %v243_v14 }
  0xdf   :  { %250 = vst.msk [vmem:[#allocation2 + $0x8] sm:$0xff] %vm249_vm4, %v244_v15 }
  0xe1   :  { %v251_v16 = vld [vmem:[#allocation2] sm:$0xff] }
  0xe2   :  { %296 = vrot.lane.b32.xlu1 %v251_v16, %s3770_s9 }
  0xe6   :  { %v252_v17 = vld [vmem:[#allocation2 + $0x8] sm:$0xff] }
  0xe7   :  { %v3496_v18 = vpack.i.bf16 %v252_v17, %v251_v16  ;;  %v3516_v20 = vpack.i.bf16 %v4081_v19, %v252_v17 }
  0xe9   :  { %3497 = vrot.lane.b32.xlu0 %v3496_v18, %s3771_s13  ;;  %3487 = vrot.lane.b32.xlu1 %v3496_v18, %s3772_s28 }
  0xed   :  { %3507 = vrot.lane.b32.xlu0 %v3496_v18, %s3773_s1  ;;  %3492 = vrot.lane.b32.xlu1 %v3496_v18, %s3774_s2 }
  0xf1   :  { %3517 = vrot.lane.b32.xlu0 %v3516_v20, %s3775_s7  ;;  %3502 = vrot.lane.b32.xlu1 %v3496_v18, %s3776_s10 }
  0xf5   :  { %307 = vrot.lane.b32.xlu0 %v251_v16, %s3775_s7  ;;  %3512 = vrot.lane.b32.xlu1 %v3516_v20, %s3770_s9 }
  0xf9   :  { %322 = vrot.lane.b32.xlu0 %v4081_v19, %s3778_s11  ;;  %320 = vrot.lane.b32.xlu1 %v252_v17, %s3778_s11 }
  0xfd   :  { %318 = vrot.lane.b32.xlu1 %v251_v16, %s3778_s11  ;;  %408 = vperm.xlu0 %3521, %v405_v22  }
 0x101   :  { %416 = vperm.xlu1 %3522, %v413_v23   ;;  %512 = vperm.xlu0 %3521, %v509_v24  }
 0x105   :  { %504 = vperm.xlu1 %3522, %v501_v25  }
 0x154   :  { %v297_v26 = vpop.permute.xlu1 %296 }
 0x15b   :  { %v3498_v27 = vpop.permute.xlu0 %3497  ;;  %v3488_v28 = vpop.permute.xlu1 %3487 }
 0x15c   :  { %v3489_v29 = vunpack.i.l.bf16 %v3488_v28  ;;  %v3490_v30 = vunpack.i.h.bf16 %v3488_v28  ;;  %v3500_v31 = vunpack.i.h.bf16 %v3498_v27  ;;  %v3499_v32 = vunpack.i.l.bf16 %v3498_v27  ;;  %v425_v27 = vld [vmem:[%s3822_s29] sm:$0xff]  ;;  %s4591_s29 = sld [smem:[#allocation8_spill]] }
 0x15e   :  { %v3226_v33 = vpack.c.bf16 %v3490_v30, %v252_v17  ;;  %v261_v34 = vsel %vm260_vm5, %v3489_v29, %v3490_v30  ;;  %v276_v44 = vsel %vm275_vm6, %v3499_v32, %v3500_v31 }
 0x15f   :  { %v3508_v35 = vpop.permute.xlu0 %3507  ;;  %v3493_v36 = vpop.permute.xlu1 %3492  ;;  %v3228_v37 = vpack.c.bf16 %v261_v34, %v251_v16 }
 0x160   :  { %v3495_v38 = vunpack.i.h.bf16 %v3493_v36  ;;  %v3494_v39 = vunpack.i.l.bf16 %v3493_v36  ;;  %3227 = vmatprep.subr.bf16.mxu0 %v3226_v33  ;;  %v3510_v40 = vunpack.i.h.bf16 %v3508_v35  ;;  %v3509_v41 = vunpack.i.l.bf16 %v3508_v35 }
 0x161   :  { %3229 = vmatpush1.bf16.msra.mxu0 %v3228_v37 }
 0x162   :  { %v3230_v42 = vpack.c.bf16 %v3500_v31, %v3495_v38  ;;  %v268_v43 = vsel %vm249_vm4, %v3494_v39, %v3495_v38  ;;  %v292_v50 = vsel %vm291_vm7, %v3509_v41, %v3510_v40 }
 0x163   :  { %v3518_v45 = vpop.permute.xlu0 %3517  ;;  %v3503_v46 = vpop.permute.xlu1 %3502  ;;  %v3232_v47 = vpack.c.bf16 %v276_v44, %v268_v43 }
 0x164   :  { %v3505_v48 = vunpack.i.h.bf16 %v3503_v46  ;;  %v3504_v49 = vunpack.i.l.bf16 %v3503_v46  ;;  %3231 = vmatprep.subr.bf16.mxu0 %v3230_v42  ;;  %v3520_v51 = vunpack.i.h.bf16 %v3518_v45  ;;  %v3519_v52 = vunpack.i.l.bf16 %v3518_v45 }
 0x165   :  { %3233 = vmatpush1.bf16.msra.mxu0 %v3232_v47  ;;  %v686_v47 = vld [vmem:[%s3847_s24] sm:$0xff]  ;;  %s4596_s24 = sld [smem:[#allocation14_spill]] }
 0x166   :  { %v3234_v53 = vpack.c.bf16 %v3510_v40, %v3505_v48  ;;  %v284_v54 = vsel %vm283_vm8, %v3504_v49, %v3505_v48  ;;  %v315_v62 = vsel %vm313_vm9, %v3519_v52, %v3520_v51  ;;  %v678_v48 = vld [vmem:[%s3842_s19] sm:$0xff]  ;;  %s4595_s19 = sld [smem:[#allocation15_spill]] }
 0x167   :  { %v308_v55 = vpop.permute.xlu0 %307  ;;  %v3513_v56 = vpop.permute.xlu1 %3512  ;;  %v3236_v57 = vpack.c.bf16 %v292_v50, %v284_v54 }
 0x168   :  { %v3515_v58 = vunpack.i.h.bf16 %v3513_v56  ;;  %v3514_v59 = vunpack.i.l.bf16 %v3513_v56  ;;  %3235 = vmatprep.subr.bf16.mxu0 %v3234_v53  ;;  %v314_v60 = vsel %vm313_vm9, %v308_v55, %v3519_v52 }
 0x169   :  { %3237 = vmatpush1.bf16.msra.mxu0 %v3236_v57 }
 0x16a   :  { %v304_v61 = vsel %vm302_vm10, %v3514_v59, %v3515_v58  ;;  %v303_v63 = vsel %vm302_vm10, %v297_v26, %v3514_v59 }
 0x16b   :  { %v323_v0 = vpop.permute.xlu0 %322  ;;  %v321_v1 = vpop.permute.xlu1 %320  ;;  %v3238_v2 = vpack.c.bf16 %v315_v62, %v304_v61  ;;  %v3240_v4 = vpack.c.bf16 %v314_v60, %v303_v63 }
 0x16c   :  { %v326_v7 = vsel %vm324_vm11, %v321_v1, %v323_v0 }
 0x16d   :  { %3239 = vmatprep.subr.bf16.mxu0 %v3238_v2 }
 0x16e   :  { %3241 = vmatpush1.bf16.msra.mxu0 %v3240_v4 }
 0x16f   :  { %v319_v10 = vpop.permute.xlu1 %318  ;;  %350 = vmatprep.subr.mxu0 %v326_v7 }
 0x170   :  { %v325_v11 = vsel %vm324_vm11, %v319_v10, %v321_v1 }
 0x172   :  { %351 = vmatpush1.msra.mxu0 %v325_v11 }
 0x173   :  { %2924 = vmatmul.mubr.msk.f32.vlgmr.msra.gmra.mrb[0].mxu0 %vm330_vm12, %v329_v12 }
 0x174   :  { %848 = vmatprep.mubr.f32.mxu0 %v3768_v3 }
 0x17c   :  { %v409_v13 = vpop.permute.xlu0 %408 }
 0x180   :  { %v417_v17 = vpop.permute.xlu1 %416  ;;  %v513_v32 = vpop.permute.xlu0 %512 }
 0x184   :  { %v505_v28 = vpop.permute.xlu1 %504 }
 0x246   :  { %v400_v14 = vpop.f32.mrb[0].mxu0 }
 0x247   :  { %v411_v15 = vmul.f32 %v409_v13, %v400_v14  ;;  %v402_v16 = vpop.f32.mrb[1].mxu0 }
 0x248   :  { %v412_v18 = vmul.f32 %v409_v13, %v402_v16 }
 0x249   :  { %v419_v20 = vadd.f32 %v417_v17, %v411_v15 }
 0x24a   :  { %v420_v22 = vadd.f32 %v417_v17, %v412_v18 }
 0x24b   :  { %v421_v23 = vmax.f32 %v419_v20, 0.0 }
 0x24c   :  { %v422_v24 = vmax.f32 %v420_v22, 0.0 }
 0x24d   :  { %v4118_v26 = vmul.f32 %v421_v23, %v4065_v8 }
 0x24e   :  { %v4115_v25 = vmul.f32 %v422_v24, %v4068_v9 }
 0x250   :  { %430 = vmatprep.subr.mxu1 %v4115_v25 }
 0x251   :  { %431 = vmatpush1.msra.mxu1 %v4118_v26 }
 0x252   :  { %2925 = vmatmul.mubr.msk.f32.vlgmr.msra.gmra.mrb[0].mxu1 %vm426_vm13, %v425_v27 }
 0x253   :  { %671 = vmatprep.mubr.f32.mxu1 %v3768_v3 }
 0x325   :  { %v496_v29 = vpop.f32.mrb[0].mxu1 }
 0x326   :  { %v507_v30 = vmul.f32 %v505_v28, %v496_v29  ;;  %v498_v31 = vpop.f32.mrb[1].mxu1 }
 0x327   :  { %v508_v33 = vmul.f32 %v505_v28, %v498_v31 }
 0x328   :  { %v515_v34 = vadd.f32 %v513_v32, %v507_v30 }
 0x329   :  { %v516_v35 = vadd.f32 %v513_v32, %v508_v33 }
 0x32a   :  { %v517_v36 = vmax.f32 %v515_v34, 0.0 }
 0x32b   :  { %v518_v37 = vmax.f32 %v516_v35, 0.0 }
 0x32c   :  { %v519_v38 = vmul.f32 %v517_v36, %v4065_v8 }
 0x32d   :  { %v520_v39 = vmul.f32 %v518_v37, %v4068_v9 }
 0x32e   :  { %523 = vrot.lane.b32.xlu1 %v519_v38, %s3769_s0  ;;  %v603_v38 = vld [vmem:[%s3837_s14] sm:$0xff]  ;;  %s4594_s14 = sld [smem:[#allocation16_spill]] }
 0x32f   :  { %525 = vrot.lane.b32.xlu0 %v520_v39, %s3769_s0 }
 0x3a0   :  { %v524_v40 = vpop.permute.xlu1 %523 }
 0x3a1   :  { %530 = vst.msk [vmem:[#allocation2] sm:$0xff] %vm247_vm3, %v524_v40  ;;  %v526_v41 = vpop.permute.xlu0 %525 }
 0x3a2   :  { %v527_v42 = vsel %vm216_vm0, %v524_v40, %v526_v41 }
 0x3a3   :  { %531 = vst.msk [vmem:[#allocation2 + $0x8] sm:$0xff] %vm249_vm4, %v527_v42 }
 0x3a8   :  { %v532_v43 = vld [vmem:[#allocation2] sm:$0xff] }
 0x3a9   :  { %573 = vrot.lane.b32.xlu0 %v532_v43, %s3770_s9 }
 0x3aa   :  { %v533_v44 = vld [vmem:[#allocation2 + $0x8] sm:$0xff] }
 0x3ab   :  { %v3528_v45 = vpack.i.bf16 %v533_v44, %v532_v43  ;;  %v3548_v46 = vpack.i.bf16 %v4081_v19, %v533_v44 }
 0x3ad   :  { %3529 = vrot.lane.b32.xlu0 %v3528_v45, %s3774_s2  ;;  %3524 = vrot.lane.b32.xlu1 %v3528_v45, %s3772_s28 }
 0x3b1   :  { %3539 = vrot.lane.b32.xlu0 %v3528_v45, %s3776_s10  ;;  %3534 = vrot.lane.b32.xlu1 %v3528_v45, %s3771_s13 }
 0x3b5   :  { %3549 = vrot.lane.b32.xlu0 %v3548_v46, %s3770_s9  ;;  %3544 = vrot.lane.b32.xlu1 %v3528_v45, %s3773_s1 }
 0x3b9   :  { %595 = vrot.lane.b32.xlu0 %v533_v44, %s3778_s11  ;;  %3554 = vrot.lane.b32.xlu1 %v3548_v46, %s3775_s7 }
 0x3bd   :  { %593 = vrot.lane.b32.xlu0 %v532_v43, %s3778_s11  ;;  %583 = vrot.lane.b32.xlu1 %v532_v43, %s3775_s7 }
 0x3c1   :  { %689 = vperm.xlu0 %3521, %v686_v47   ;;  %597 = vrot.lane.b32.xlu1 %v4081_v19, %s3778_s11 }
 0x3c5   :  { %681 = vperm.xlu1 %3522, %v678_v48  }
 0x41b   :  { %v574_v49 = vpop.permute.xlu0 %573 }
 0x41f   :  { %v3525_v50 = vpop.permute.xlu1 %3524  ;;  %v3530_v51 = vpop.permute.xlu0 %3529 }
 0x420   :  { %v3527_v52 = vunpack.i.h.bf16 %v3525_v50  ;;  %v3526_v53 = vunpack.i.l.bf16 %v3525_v50  ;;  %v3532_v56 = vunpack.i.h.bf16 %v3530_v51  ;;  %v3531_v57 = vunpack.i.l.bf16 %v3530_v51 }
 0x422   :  { %v3242_v54 = vpack.c.bf16 %v3527_v52, %v533_v44  ;;  %v541_v55 = vsel %vm260_vm5, %v3526_v53, %v3527_v52  ;;  %v548_v1 = vsel %vm249_vm4, %v3531_v57, %v3532_v56 }
 0x423   :  { %v3244_v58 = vpack.c.bf16 %v541_v55, %v532_v43  ;;  %v3535_v59 = vpop.permute.xlu1 %3534  ;;  %v3540_v60 = vpop.permute.xlu0 %3539 }
 0x424   :  { %v3537_v61 = vunpack.i.h.bf16 %v3535_v59  ;;  %v3536_v62 = vunpack.i.l.bf16 %v3535_v59  ;;  %3243 = vmatprep.subr.bf16.mxu1 %v3242_v54  ;;  %v3542_v63 = vunpack.i.h.bf16 %v3540_v60  ;;  %v3541_v0 = vunpack.i.l.bf16 %v3540_v60  ;;  %v863_v59 = vld [vmem:[%s3862_s12] sm:$0xff]  ;;  %s4598_s12 = sld [smem:[#allocation22_spill]] }
 0x425   :  { %3245 = vmatpush1.bf16.msra.mxu1 %v3244_v58  ;;  %v956_v60 = vld [vmem:[%s3877_s4] sm:$0xff]  ;;  %s4599_s4 = sld [smem:[#allocation18_spill]] }
 0x426   :  { %v555_v2 = vsel %vm275_vm6, %v3536_v62, %v3537_v61  ;;  %v3246_v4 = vpack.c.bf16 %v3537_v61, %v3532_v56  ;;  %v562_v14 = vsel %vm283_vm8, %v3541_v0, %v3542_v63  ;;  %v855_v61 = vld [vmem:[%s3857_s6] sm:$0xff]  ;;  %s4597_s6 = sld [smem:[#allocation19_spill]] }
 0x427   :  { %v3248_v7 = vpack.c.bf16 %v555_v2, %v548_v1  ;;  %v3545_v10 = vpop.permute.xlu1 %3544  ;;  %v3550_v11 = vpop.permute.xlu0 %3549  ;;  %v1065_v62 = vld [vmem:[%s4588_s17] sm:$0xff]  ;;  %s4615_s17 = sld [smem:[#allocation37_spill]] }
 0x428   :  { %v3547_v12 = vunpack.i.h.bf16 %v3545_v10  ;;  %v3546_v13 = vunpack.i.l.bf16 %v3545_v10  ;;  %3247 = vmatprep.subr.bf16.mxu1 %v3246_v4  ;;  %v3552_v17 = vunpack.i.h.bf16 %v3550_v11  ;;  %v3551_v18 = vunpack.i.l.bf16 %v3550_v11  ;;  %v1057_v0 = vld [vmem:[%s4590_s25] sm:$0xff]  ;;  %s4617_s25 = sld [smem:[#allocation32_spill]] }
 0x429   :  { %3249 = vmatpush1.bf16.msra.mxu1 %v3248_v7 }
 0x42a   :  { %v569_v15 = vsel %vm291_vm7, %v3546_v13, %v3547_v12  ;;  %v3250_v16 = vpack.c.bf16 %v3547_v12, %v3542_v63  ;;  %v580_v28 = vsel %vm302_vm10, %v3551_v18, %v3552_v17  ;;  %v579_v32 = vsel %vm302_vm10, %v574_v49, %v3551_v18  ;;  %v948_v63 = vld [vmem:[%s4589_s21] sm:$0xff]  ;;  %s4616_s21 = sld [smem:[#allocation7_spill]] }
 0x42b   :  { %v3252_v20 = vpack.c.bf16 %v569_v15, %v562_v14  ;;  %v3555_v22 = vpop.permute.xlu1 %3554  ;;  %v596_v27 = vpop.permute.xlu0 %595 }
 0x42c   :  { %v3557_v23 = vunpack.i.h.bf16 %v3555_v22  ;;  %v3556_v24 = vunpack.i.l.bf16 %v3555_v22  ;;  %3251 = vmatprep.subr.bf16.mxu1 %v3250_v16 }
 0x42d   :  { %3253 = vmatpush1.bf16.msra.mxu1 %v3252_v20 }
 0x42e   :  { %v590_v29 = vsel %vm313_vm9, %v3556_v24, %v3557_v23 }
 0x42f   :  { %v584_v30 = vpop.permute.xlu1 %583  ;;  %v3254_v31 = vpack.c.bf16 %v590_v29, %v580_v28  ;;  %v594_v35 = vpop.permute.xlu0 %593 }
 0x430   :  { %v589_v33 = vsel %vm313_vm9, %v584_v30, %v3556_v24  ;;  %v599_v39 = vsel %vm324_vm11, %v594_v35, %v596_v27 }
 0x431   :  { %v3256_v34 = vpack.c.bf16 %v589_v33, %v579_v32  ;;  %3255 = vmatprep.subr.bf16.mxu1 %v3254_v31 }
 0x433   :  { %v598_v36 = vpop.permute.xlu1 %597  ;;  %3257 = vmatpush1.bf16.msra.mxu1 %v3256_v34 }
 0x434   :  { %v600_v37 = vsel %vm324_vm11, %v596_v27, %v598_v36 }
 0x435   :  { %623 = vmatprep.subr.mxu1 %v600_v37 }
 0x437   :  { %624 = vmatpush1.msra.mxu1 %v599_v39 }
 0x438   :  { %2926 = vmatmul.mubr.msk.f32.vlgmr.msra.gmra.mrb[2].mxu1 %vm330_vm12, %v603_v38 }
 0x439   :  { %941 = vmatprep.mubr.f32.mxu1 %v3768_v3 }
 0x440   :  { %v690_v44 = vpop.permute.xlu0 %689 }
 0x444   :  { %v682_v40 = vpop.permute.xlu1 %681 }
 0x50b   :  { %v673_v41 = vpop.f32.mrb[2].mxu1 }
 0x50c   :  { %v684_v42 = vmul.f32 %v682_v40, %v673_v41  ;;  %v675_v43 = vpop.f32.mrb[3].mxu1 }
 0x50d   :  { %v685_v45 = vmul.f32 %v682_v40, %v675_v43 }
 0x50e   :  { %v692_v46 = vadd.f32 %v690_v44, %v684_v42 }
 0x50f   :  { %v693_v47 = vadd.f32 %v690_v44, %v685_v45 }
 0x510   :  { %v694_v48 = vmax.f32 %v692_v46, 0.0 }
 0x511   :  { %v695_v49 = vmax.f32 %v693_v47, 0.0 }
 0x512   :  { %v696_v50 = vmul.f32 %v694_v48, %v4065_v8 }
 0x513   :  { %v697_v51 = vmul.f32 %v695_v49, %v4068_v9 }
 0x514   :  { %700 = vrot.lane.b32.xlu1 %v696_v50, %s3769_s0 }
 0x515   :  { %702 = vrot.lane.b32.xlu0 %v697_v51, %s3769_s0 }
 0x586   :  { %v701_v52 = vpop.permute.xlu1 %700 }
 0x587   :  { %707 = vst.msk [vmem:[#allocation2] sm:$0xff] %vm247_vm3, %v701_v52  ;;  %v703_v53 = vpop.permute.xlu0 %702 }
 0x588   :  { %v704_v54 = vsel %vm216_vm0, %v701_v52, %v703_v53 }
 0x589   :  { %708 = vst.msk [vmem:[#allocation2 + $0x8] sm:$0xff] %vm249_vm4, %v704_v54  ;;  %v780_v54 = vld [vmem:[%s4591_s29] sm:$0xff]  ;;  %s4618_s29 = sld [smem:[#allocation38_spill]] }
 0x58e   :  { %v709_v55 = vld [vmem:[#allocation2] sm:$0xff] }
 0x58f   :  { %750 = vrot.lane.b32.xlu0 %v709_v55, %s3770_s9 }
 0x590   :  { %v710_v56 = vld [vmem:[#allocation2 + $0x8] sm:$0xff] }
 0x591   :  { %v3563_v57 = vpack.i.bf16 %v710_v56, %v709_v55  ;;  %v3583_v58 = vpack.i.bf16 %v4081_v19, %v710_v56 }
 0x593   :  { %3564 = vrot.lane.b32.xlu0 %v3563_v57, %s3774_s2  ;;  %3559 = vrot.lane.b32.xlu1 %v3563_v57, %s3772_s28 }
 0x597   :  { %3574 = vrot.lane.b32.xlu0 %v3563_v57, %s3776_s10  ;;  %3569 = vrot.lane.b32.xlu1 %v3563_v57, %s3771_s13 }
 0x59b   :  { %3584 = vrot.lane.b32.xlu0 %v3583_v58, %s3770_s9  ;;  %3579 = vrot.lane.b32.xlu1 %v3563_v57, %s3773_s1 }
 0x59f   :  { %772 = vrot.lane.b32.xlu0 %v710_v56, %s3778_s11  ;;  %3589 = vrot.lane.b32.xlu1 %v3583_v58, %s3775_s7 }
 0x5a3   :  { %770 = vrot.lane.b32.xlu0 %v709_v55, %s3778_s11  ;;  %760 = vrot.lane.b32.xlu1 %v709_v55, %s3775_s7 }
 0x5a7   :  { %866 = vperm.xlu0 %3521, %v863_v59   ;;  %774 = vrot.lane.b32.xlu1 %v4081_v19, %s3778_s11 }
 0x5ab   :  { %959 = vperm.xlu0 %3521, %v956_v60   ;;  %858 = vperm.xlu1 %3522, %v855_v61  }
 0x5af   :  { %1068 = vperm.xlu0 %3521, %v1065_v62   ;;  %951 = vperm.xlu1 %3522, %v948_v63  }
 0x5b3   :  { %1060 = vperm.xlu1 %3522, %v1057_v0  }
 0x601   :  { %v751_v1 = vpop.permute.xlu0 %750 }
 0x605   :  { %v3560_v2 = vpop.permute.xlu1 %3559  ;;  %v3565_v4 = vpop.permute.xlu0 %3564 }
 0x606   :  { %v3562_v7 = vunpack.i.h.bf16 %v3560_v2  ;;  %v3561_v10 = vunpack.i.l.bf16 %v3560_v2  ;;  %v3567_v13 = vunpack.i.h.bf16 %v3565_v4  ;;  %v3566_v14 = vunpack.i.l.bf16 %v3565_v4  ;;  %v873_v2 = vld [vmem:[%s4592_s3] sm:$0xff]  ;;  %s4619_s3 = sld [smem:[#allocation40_spill]] }
 0x608   :  { %v3258_v11 = vpack.c.bf16 %v3562_v7, %v710_v56  ;;  %v718_v12 = vsel %vm260_vm5, %v3561_v10, %v3562_v7  ;;  %v725_v24 = vsel %vm249_vm4, %v3566_v14, %v3567_v13 }
 0x609   :  { %v3260_v15 = vpack.c.bf16 %v718_v12, %v709_v55  ;;  %v3570_v16 = vpop.permute.xlu1 %3569  ;;  %v3575_v17 = vpop.permute.xlu0 %3574 }
 0x60a   :  { %v3572_v18 = vunpack.i.h.bf16 %v3570_v16  ;;  %v3571_v20 = vunpack.i.l.bf16 %v3570_v16  ;;  %3259 = vmatprep.subr.bf16.mxu0 %v3258_v11  ;;  %v3577_v22 = vunpack.i.h.bf16 %v3575_v17  ;;  %v3576_v23 = vunpack.i.l.bf16 %v3575_v17 }
 0x60b   :  { %3261 = vmatpush1.bf16.msra.mxu0 %v3260_v15 }
 0x60c   :  { %v732_v27 = vsel %vm275_vm6, %v3571_v20, %v3572_v18  ;;  %v3262_v28 = vpack.c.bf16 %v3572_v18, %v3567_v13  ;;  %v739_v34 = vsel %vm283_vm8, %v3576_v23, %v3577_v22 }
 0x60d   :  { %v3264_v29 = vpack.c.bf16 %v732_v27, %v725_v24  ;;  %v3580_v30 = vpop.permute.xlu1 %3579  ;;  %v3585_v31 = vpop.permute.xlu0 %3584 }
 0x60e   :  { %v3582_v32 = vunpack.i.h.bf16 %v3580_v30  ;;  %v3581_v33 = vunpack.i.l.bf16 %v3580_v30  ;;  %3263 = vmatprep.subr.bf16.mxu0 %v3262_v28  ;;  %v3587_v37 = vunpack.i.h.bf16 %v3585_v31  ;;  %v3586_v38 = vunpack.i.l.bf16 %v3585_v31 }
 0x60f   :  { %3265 = vmatpush1.bf16.msra.mxu0 %v3264_v29 }
 0x610   :  { %v746_v35 = vsel %vm291_vm7, %v3581_v33, %v3582_v32  ;;  %v3266_v36 = vpack.c.bf16 %v3582_v32, %v3577_v22  ;;  %v757_v44 = vsel %vm302_vm10, %v3586_v38, %v3587_v37  ;;  %v756_v48 = vsel %vm302_vm10, %v751_v1, %v3586_v38 }
 0x611   :  { %v3268_v39 = vpack.c.bf16 %v746_v35, %v739_v34  ;;  %v3590_v40 = vpop.permute.xlu1 %3589  ;;  %v773_v43 = vpop.permute.xlu0 %772 }
 0x612   :  { %v3592_v41 = vunpack.i.h.bf16 %v3590_v40  ;;  %v3591_v42 = vunpack.i.l.bf16 %v3590_v40  ;;  %3267 = vmatprep.subr.bf16.mxu0 %v3266_v36 }
 0x613   :  { %3269 = vmatpush1.bf16.msra.mxu0 %v3268_v39 }
 0x614   :  { %v767_v45 = vsel %vm313_vm9, %v3591_v42, %v3592_v41 }
 0x615   :  { %v761_v46 = vpop.permute.xlu1 %760  ;;  %v3270_v47 = vpack.c.bf16 %v767_v45, %v757_v44  ;;  %v771_v51 = vpop.permute.xlu0 %770 }
 0x616   :  { %v766_v49 = vsel %vm313_vm9, %v761_v46, %v3591_v42  ;;  %v776_v55 = vsel %vm324_vm11, %v771_v51, %v773_v43 }
 0x617   :  { %v3272_v50 = vpack.c.bf16 %v766_v49, %v756_v48  ;;  %3271 = vmatprep.subr.bf16.mxu0 %v3270_v47 }
 0x619   :  { %v775_v52 = vpop.permute.xlu1 %774  ;;  %3273 = vmatpush1.bf16.msra.mxu0 %v3272_v50 }
 0x61a   :  { %v777_v53 = vsel %vm324_vm11, %v773_v43, %v775_v52  ;;  %v1242_v52 = vld [vmem:[%s4594_s14] sm:$0xff]  ;;  %s4623_s14 = sld [smem:[#allocation39_spill]] }
 0x61b   :  { %800 = vmatprep.subr.mxu0 %v777_v53  ;;  %v1234_v53 = vld [vmem:[%s4595_s19] sm:$0xff]  ;;  %s4624_s19 = sld [smem:[#allocation41_spill]] }
 0x61d   :  { %801 = vmatpush1.msra.mxu0 %v776_v55 }
 0x61e   :  { %2927 = vmatmul.mubr.msk.f32.vlgmr.msra.gmra.mrb[2].mxu0 %vm330_vm12, %v780_v54 }
 0x61f   :  { %1404 = vmatprep.mubr.f32.mxu0 %v3768_v3 }
 0x626   :  { %v867_v60 = vpop.permute.xlu0 %866 }
 0x62a   :  { %v859_v56 = vpop.permute.xlu1 %858  ;;  %v960_v12 = vpop.permute.xlu0 %959 }
 0x62e   :  { %v952_v4 = vpop.permute.xlu1 %951  ;;  %v1069_v37 = vpop.permute.xlu0 %1068 }
 0x632   :  { %v1061_v33 = vpop.permute.xlu1 %1060 }
 0x6f1   :  { %v850_v57 = vpop.f32.mrb[2].mxu0 }
 0x6f2   :  { %v861_v58 = vmul.f32 %v859_v56, %v850_v57  ;;  %v852_v59 = vpop.f32.mrb[3].mxu0 }
 0x6f3   :  { %v862_v61 = vmul.f32 %v859_v56, %v852_v59 }
 0x6f4   :  { %v869_v62 = vadd.f32 %v867_v60, %v861_v58 }
 0x6f5   :  { %v870_v63 = vadd.f32 %v867_v60, %v862_v61 }
 0x6f6   :  { %v871_v1 = vmax.f32 %v869_v62, 0.0 }
 0x6f7   :  { %v872_v0 = vmax.f32 %v870_v63, 0.0 }
 0x6f9   :  { %877 = vmatprep.subr.mxu1 %v872_v0 }
 0x6fa   :  { %878 = vmatpush1.msra.mxu1 %v871_v1 }
 0x6fb   :  { %2928 = vmatmul.mubr.msk.f32.vlgmr.msra.gmra.mrb[4].mxu1 %vm426_vm13, %v873_v2 }
 0x6fc   :  { %1050 = vmatprep.mubr.f32.mxu1 %v3768_v3 }
 0x7ce   :  { %v943_v7 = vpop.f32.mrb[4].mxu1 }
 0x7cf   :  { %v954_v10 = vmul.f32 %v952_v4, %v943_v7  ;;  %v945_v11 = vpop.f32.mrb[5].mxu1 }
 0x7d0   :  { %v955_v13 = vmul.f32 %v952_v4, %v945_v11 }
 0x7d1   :  { %v962_v14 = vadd.f32 %v960_v12, %v954_v10 }
 0x7d2   :  { %v963_v15 = vadd.f32 %v960_v12, %v955_v13 }
 0x7d3   :  { %v964_v16 = vadd.f32 %v962_v14, %v4118_v26  ;;  %v982_v26 = vld [vmem:[%s4593_s8] sm:$0xff]  ;;  %s4620_s8 = sld [smem:[#allocation35_spill]] }
 0x7d4   :  { %v965_v17 = vadd.f32 %v963_v15, %v4115_v25 }
 0x7d5   :  { %v2929_v18 = vmul.f32 -1.442695, %v964_v16 }
 0x7d6   :  { %v2930_v20 = vmul.f32 -1.442695, %v965_v17 }
 0x7d7   :  { %3663 = vpow2.f32 %v2929_v18 }
 0x7d8   :  { %3665 = vpow2.f32 %v2930_v20 }
 0x7e1   :  { %v3664_v22 = vpop.eup %3663 }
 0x7e2   :  { %v3666_v23 = vpop.eup %3665  ;;  %v972_v24 = vadd.f32 1.0, %v3664_v22 }
 0x7e3   :  { %v973_v27 = vadd.f32 1.0, %v3666_v23 }
 0x7e4   :  { %3667 = vrcp.f32 %v972_v24 }
 0x7e5   :  { %3669 = vrcp.f32 %v973_v27 }
 0x7ee   :  { %v3668_v28 = vpop.eup %3667 }
 0x7ef   :  { %v3670_v29 = vpop.eup %3669  ;;  %v978_v30 = vmul.f32 %v3668_v28, %v964_v16 }
 0x7f0   :  { %v979_v31 = vmul.f32 %v3670_v29, %v965_v17 }
 0x7f1   :  { %v4212_v25 = vmul.f32 %v978_v30, %v4065_v8 }
 0x7f2   :  { %v4209_v32 = vmul.f32 %v979_v31, %v4068_v9 }
 0x7f4   :  { %986 = vmatprep.subr.mxu1 %v4209_v32 }
 0x7f5   :  { %987 = vmatpush1.msra.mxu1 %v4212_v25 }
 0x7f6   :  { %2931 = vmatmul.mubr.msk.f32.vlgmr.msra.gmra.mrb[6].mxu1 %vm426_vm13, %v982_v26 }
 0x7f7   :  { %1227 = vmatprep.mubr.f32.mxu1 %v3768_v3 }
 0x8c9   :  { %v1052_v34 = vpop.f32.mrb[6].mxu1 }
 0x8ca   :  { %v1063_v35 = vmul.f32 %v1061_v33, %v1052_v34  ;;  %v1054_v36 = vpop.f32.mrb[7].mxu1 }
 0x8cb   :  { %v1064_v38 = vmul.f32 %v1061_v33, %v1054_v36 }
 0x8cc   :  { %v1071_v39 = vadd.f32 %v1069_v37, %v1063_v35 }
 0x8cd   :  { %v1072_v40 = vadd.f32 %v1069_v37, %v1064_v38 }
 0x8ce   :  { %v1073_v41 = vmax.f32 %v1071_v39, 0.0 }
 0x8cf   :  { %v1074_v42 = vmax.f32 %v1072_v40, 0.0 }
 0x8d0   :  { %v1075_v43 = vmul.f32 %v1073_v41, %v4065_v8 }
 0x8d1   :  { %v1076_v44 = vmul.f32 %v1074_v42, %v4068_v9 }
 0x8d2   :  { %1079 = vrot.lane.b32.xlu1 %v1075_v43, %s3769_s0  ;;  %v1159_v43 = vld [vmem:[%s4596_s24] sm:$0xff] }
 0x8d3   :  { %1081 = vrot.lane.b32.xlu0 %v1076_v44, %s3769_s0 }
 0x944   :  { %v1080_v45 = vpop.permute.xlu1 %1079 }
 0x945   :  { %1086 = vst.msk [vmem:[#allocation2] sm:$0xff] %vm247_vm3, %v1080_v45  ;;  %v1082_v46 = vpop.permute.xlu0 %1081 }
 0x946   :  { %v1083_v47 = vsel %vm216_vm0, %v1080_v45, %v1082_v46 }
 0x947   :  { %1087 = vst.msk [vmem:[#allocation2 + $0x8] sm:$0xff] %vm249_vm4, %v1083_v47 }
 0x94c   :  { %v1088_v48 = vld [vmem:[#allocation2] sm:$0xff] }
 0x94d   :  { %1129 = vrot.lane.b32.xlu0 %v1088_v48, %s3770_s9 }
 0x94e   :  { %v1089_v49 = vld [vmem:[#allocation2 + $0x8] sm:$0xff] }
 0x94f   :  { %v3598_v50 = vpack.i.bf16 %v1089_v49, %v1088_v48  ;;  %v3618_v51 = vpack.i.bf16 %v4081_v19, %v1089_v49 }
 0x951   :  { %3599 = vrot.lane.b32.xlu0 %v3598_v50, %s3774_s2  ;;  %3594 = vrot.lane.b32.xlu1 %v3598_v50, %s3772_s28 }
 0x955   :  { %3609 = vrot.lane.b32.xlu0 %v3598_v50, %s3776_s10  ;;  %3604 = vrot.lane.b32.xlu1 %v3598_v50, %s3771_s13 }
 0x959   :  { %3619 = vrot.lane.b32.xlu0 %v3618_v51, %s3770_s9  ;;  %3614 = vrot.lane.b32.xlu1 %v3598_v50, %s3773_s1 }
 0x95d   :  { %1151 = vrot.lane.b32.xlu0 %v1089_v49, %s3778_s11  ;;  %3624 = vrot.lane.b32.xlu1 %v3618_v51, %s3775_s7 }
 0x961   :  { %1149 = vrot.lane.b32.xlu0 %v1088_v48, %s3778_s11  ;;  %1139 = vrot.lane.b32.xlu1 %v1088_v48, %s3775_s7 }
 0x965   :  { %1245 = vperm.xlu0 %3521, %v1242_v52   ;;  %1153 = vrot.lane.b32.xlu1 %v4081_v19, %s3778_s11 }
 0x969   :  { %1237 = vperm.xlu1 %3522, %v1234_v53  }
 0x9bf   :  { %v1130_v54 = vpop.permute.xlu0 %1129 }
 0x9c3   :  { %v3595_v55 = vpop.permute.xlu1 %3594  ;;  %v3600_v56 = vpop.permute.xlu0 %3599 }
 0x9c4   :  { %v3597_v57 = vunpack.i.h.bf16 %v3595_v55  ;;  %v3596_v58 = vunpack.i.l.bf16 %v3595_v55  ;;  %v3602_v61 = vunpack.i.h.bf16 %v3600_v56  ;;  %v3601_v62 = vunpack.i.l.bf16 %v3600_v56 }
 0x9c6   :  { %v3274_v59 = vpack.c.bf16 %v3597_v57, %v1089_v49  ;;  %v1097_v60 = vsel %vm260_vm5, %v3596_v58, %v3597_v57  ;;  %v1104_v11 = vsel %vm249_vm4, %v3601_v62, %v3602_v61 }
 0x9c7   :  { %v3276_v63 = vpack.c.bf16 %v1097_v60, %v1088_v48  ;;  %v3605_v0 = vpop.permute.xlu1 %3604  ;;  %v3610_v1 = vpop.permute.xlu0 %3609 }
 0x9c8   :  { %v3607_v2 = vunpack.i.h.bf16 %v3605_v0  ;;  %v3606_v4 = vunpack.i.l.bf16 %v3605_v0  ;;  %3275 = vmatprep.subr.bf16.mxu1 %v3274_v59  ;;  %v3612_v7 = vunpack.i.h.bf16 %v3610_v1  ;;  %v3611_v10 = vunpack.i.l.bf16 %v3610_v1  ;;  %v1419_v0 = vld [vmem:[%s4597_s6] sm:$0xff] }
 0x9c9   :  { %3277 = vmatpush1.bf16.msra.mxu1 %v3276_v63  ;;  %v1512_v1 = vld [vmem:[%s4598_s12] sm:$0xff] }
 0x9ca   :  { %v1111_v12 = vsel %vm275_vm6, %v3606_v4, %v3607_v2  ;;  %v3278_v13 = vpack.c.bf16 %v3607_v2, %v3602_v61  ;;  %v1118_v20 = vsel %vm283_vm8, %v3611_v10, %v3612_v7  ;;  %v1411_v2 = vld [vmem:[%s4599_s4] sm:$0xff] }
 0x9cb   :  { %v3280_v14 = vpack.c.bf16 %v1111_v12, %v1104_v11  ;;  %v3615_v15 = vpop.permute.xlu1 %3614  ;;  %v3620_v16 = vpop.permute.xlu0 %3619  ;;  %v1714_v4 = vld [vmem:[%s4600_s16] sm:$0xff] }
 0x9cc   :  { %v3617_v17 = vunpack.i.h.bf16 %v3615_v15  ;;  %v3616_v18 = vunpack.i.l.bf16 %v3615_v15  ;;  %3279 = vmatprep.subr.bf16.mxu1 %v3278_v13  ;;  %v3622_v24 = vunpack.i.h.bf16 %v3620_v16  ;;  %v3621_v27 = vunpack.i.l.bf16 %v3620_v16  ;;  %v1706_v10 = vld [vmem:[%s4602_s18] sm:$0xff] }
 0x9cd   :  { %3281 = vmatpush1.bf16.msra.mxu1 %v3280_v14 }
 0x9ce   :  { %v1125_v22 = vsel %vm291_vm7, %v3616_v18, %v3617_v17  ;;  %v3282_v23 = vpack.c.bf16 %v3617_v17, %v3612_v7  ;;  %v1136_v33 = vsel %vm302_vm10, %v3621_v27, %v3622_v24  ;;  %v1135_v37 = vsel %vm302_vm10, %v1130_v54, %v3621_v27  ;;  %v1504_v7 = vld [vmem:[%s4601_s15] sm:$0xff] }
 0x9cf   :  { %v3284_v28 = vpack.c.bf16 %v1125_v22, %v1118_v20  ;;  %v3625_v29 = vpop.permute.xlu1 %3624  ;;  %v1152_v26 = vpop.permute.xlu0 %1151 }
 0x9d0   :  { %v3627_v30 = vunpack.i.h.bf16 %v3625_v29  ;;  %v3626_v31 = vunpack.i.l.bf16 %v3625_v29  ;;  %3283 = vmatprep.subr.bf16.mxu1 %v3282_v23 }
 0x9d1   :  { %3285 = vmatpush1.bf16.msra.mxu1 %v3284_v28 }
 0x9d2   :  { %v1146_v34 = vsel %vm313_vm9, %v3626_v31, %v3627_v30 }
 0x9d3   :  { %v1140_v35 = vpop.permute.xlu1 %1139  ;;  %v3286_v36 = vpack.c.bf16 %v1146_v34, %v1136_v33  ;;  %v1150_v40 = vpop.permute.xlu0 %1149 }
 0x9d4   :  { %v1145_v38 = vsel %vm313_vm9, %v1140_v35, %v3626_v31  ;;  %v1155_v44 = vsel %vm324_vm11, %v1150_v40, %v1152_v26 }
 0x9d5   :  { %v3288_v39 = vpack.c.bf16 %v1145_v38, %v1135_v37  ;;  %3287 = vmatprep.subr.bf16.mxu1 %v3286_v36 }
 0x9d7   :  { %v1154_v41 = vpop.permute.xlu1 %1153  ;;  %3289 = vmatpush1.bf16.msra.mxu1 %v3288_v39 }
 0x9d8   :  { %v1156_v42 = vsel %vm324_vm11, %v1152_v26, %v1154_v41 }
 0x9d9   :  { %1179 = vmatprep.subr.mxu1 %v1156_v42 }
 0x9db   :  { %1180 = vmatpush1.msra.mxu1 %v1155_v44 }
 0x9dc   :  { %2932 = vmatmul.mubr.msk.f32.vlgmr.msra.gmra.mrb[8].mxu1 %vm330_vm12, %v1159_v43 }
 0x9dd   :  { %1497 = vmatprep.mubr.f32.mxu1 %v3768_v3 }
 0x9e4   :  { %v1246_v49 = vpop.permute.xlu0 %1245 }
 0x9e8   :  { %v1238_v45 = vpop.permute.xlu1 %1237 }
 0xaaf   :  { %v1229_v46 = vpop.f32.mrb[8].mxu1 }
 0xab0   :  { %v1240_v47 = vmul.f32 %v1238_v45, %v1229_v46  ;;  %v1231_v48 = vpop.f32.mrb[9].mxu1 }
 0xab1   :  { %v1241_v50 = vmul.f32 %v1238_v45, %v1231_v48 }
 0xab2   :  { %v1248_v51 = vadd.f32 %v1246_v49, %v1240_v47 }
 0xab3   :  { %v1249_v52 = vadd.f32 %v1246_v49, %v1241_v50 }
 0xab4   :  { %v1250_v53 = vmax.f32 %v1248_v51, 0.0 }
 0xab5   :  { %v1251_v54 = vmax.f32 %v1249_v52, 0.0 }
 0xab6   :  { %v1252_v55 = vmul.f32 %v1250_v53, %v4065_v8 }
 0xab7   :  { %v1253_v56 = vmul.f32 %v1251_v54, %v4068_v9 }
 0xab8   :  { %1256 = vrot.lane.b32.xlu1 %v1252_v55, %s3769_s0 }
 0xab9   :  { %1258 = vrot.lane.b32.xlu0 %v1253_v56, %s3769_s0  ;;  %s4606_s0 = sld [smem:[#allocation23_spill]] }
 0xb2a   :  { %v1257_v57 = vpop.permute.xlu1 %1256 }
 0xb2b   :  { %1263 = vst.msk [vmem:[#allocation2] sm:$0xff] %vm247_vm3, %v1257_v57  ;;  %v1259_v58 = vpop.permute.xlu0 %1258  ;;  %vm1732_vm3 = vcmask 990208  }
 0xb2c   :  { %v1260_v59 = vsel %vm216_vm0, %v1257_v57, %v1259_v58  ;;  %v1336_v58 = vld [vmem:[%s4603_s23] sm:$0xff] }
 0xb2d   :  { %1264 = vst.msk [vmem:[#allocation2 + $0x8] sm:$0xff] %vm249_vm4, %v1260_v59 }
 0xb32   :  { %v1265_v60 = vld [vmem:[#allocation2] sm:$0xff] }
 0xb33   :  { %1306 = vrot.lane.b32.xlu0 %v1265_v60, %s3770_s9 }
 0xb34   :  { %v1266_v61 = vld [vmem:[#allocation2 + $0x8] sm:$0xff] }
 0xb35   :  { %v3633_v62 = vpack.i.bf16 %v1266_v61, %v1265_v60  ;;  %v3653_v63 = vpack.i.bf16 %v4081_v19, %v1266_v61 }
 0xb37   :  { %3634 = vrot.lane.b32.xlu0 %v3633_v62, %s3774_s2  ;;  %3629 = vrot.lane.b32.xlu1 %v3633_v62, %s3772_s28  ;;  %s4609_s28 = sld [smem:[#allocation29_spill]]  ;;  %s4611_s2 = sld [smem:[#allocation31_spill]] }
 0xb3b   :  { %3644 = vrot.lane.b32.xlu0 %v3633_v62, %s3776_s10  ;;  %3639 = vrot.lane.b32.xlu1 %v3633_v62, %s3771_s13  ;;  %s4608_s13 = sld [smem:[#allocation24_spill]]  ;;  %s4613_s10 = sld [smem:[#allocation36_spill]] }
 0xb3f   :  { %3654 = vrot.lane.b32.xlu0 %v3653_v63, %s3770_s9  ;;  %3649 = vrot.lane.b32.xlu1 %v3633_v62, %s3773_s1  ;;  %s4607_s9 = sld [smem:[#allocation25_spill]]  ;;  %s4610_s1 = sld [smem:[#allocation30_spill]] }
 0xb43   :  { %1328 = vrot.lane.b32.xlu0 %v1266_v61, %s3778_s11  ;;  %3659 = vrot.lane.b32.xlu1 %v3653_v63, %s3775_s7 }
 0xb47   :  { %1326 = vrot.lane.b32.xlu0 %v1265_v60, %s3778_s11  ;;  %1316 = vrot.lane.b32.xlu1 %v1265_v60, %s3775_s7  ;;  %s4612_s7 = sld [smem:[#allocation33_spill]] }
 0xb4b   :  { %1422 = vperm.xlu0 %3521, %v1419_v0   ;;  %1330 = vrot.lane.b32.xlu1 %v4081_v19, %s3778_s11  ;;  %s4614_s11 = sld [smem:[#allocation34_spill]] }
 0xb4f   :  { %1515 = vperm.xlu0 %3521, %v1512_v1   ;;  %1414 = vperm.xlu1 %3522, %v1411_v2  }
 0xb53   :  { %1717 = vperm.xlu0 %3521, %v1714_v4   ;;  %1507 = vperm.xlu1 %3522, %v1504_v7  }
 0xb57   :  { %1709 = vperm.xlu1 %3522, %v1706_v10  }
 0xba5   :  { %v1307_v11 = vpop.permute.xlu0 %1306 }
 0xba9   :  { %v3630_v12 = vpop.permute.xlu1 %3629  ;;  %v3635_v13 = vpop.permute.xlu0 %3634 }
 0xbaa   :  { %v3632_v14 = vunpack.i.h.bf16 %v3630_v12  ;;  %v3631_v15 = vunpack.i.l.bf16 %v3630_v12  ;;  %v3637_v18 = vunpack.i.h.bf16 %v3635_v13  ;;  %v3636_v19 = vunpack.i.l.bf16 %v3635_v13 }
 0xbac   :  { %v3290_v16 = vpack.c.bf16 %v3632_v14, %v1266_v61  ;;  %v1274_v17 = vsel %vm260_vm5, %v3631_v15, %v3632_v14  ;;  %v1281_v30 = vsel %vm249_vm4, %v3636_v19, %v3637_v18  ;;  %vm3780_vm4 = vmmov 0  }
 0xbad   :  { %v3292_v20 = vpack.c.bf16 %v1274_v17, %v1265_v60  ;;  %v3640_v22 = vpop.permute.xlu1 %3639  ;;  %v3645_v23 = vpop.permute.xlu0 %3644  ;;  %vm1932_vm5 = vcmask 56320  }
 0xbae   :  { %v3642_v24 = vunpack.i.h.bf16 %v3640_v22  ;;  %v3641_v27 = vunpack.i.l.bf16 %v3640_v22  ;;  %3291 = vmatprep.subr.bf16.mxu0 %v3290_v16  ;;  %v3647_v28 = vunpack.i.h.bf16 %v3645_v23  ;;  %v3646_v29 = vunpack.i.l.bf16 %v3645_v23 }
 0xbaf   :  { %3293 = vmatpush1.bf16.msra.mxu0 %v3292_v20 }
 0xbb0   :  { %v1288_v31 = vsel %vm275_vm6, %v3641_v27, %v3642_v24  ;;  %v3294_v26 = vpack.c.bf16 %v3642_v24, %v3637_v18  ;;  %v1295_v38 = vsel %vm283_vm8, %v3646_v29, %v3647_v28  ;;  %vm2324_vm6 = vcmask 1040384  }
 0xbb1   :  { %v3296_v33 = vpack.c.bf16 %v1288_v31, %v1281_v30  ;;  %v3650_v34 = vpop.permute.xlu1 %3649  ;;  %v3655_v35 = vpop.permute.xlu0 %3654 }
 0xbb2   :  { %v3652_v36 = vunpack.i.h.bf16 %v3650_v34  ;;  %v3651_v37 = vunpack.i.l.bf16 %v3650_v34  ;;  %3295 = vmatprep.subr.bf16.mxu0 %v3294_v26  ;;  %v3657_v41 = vunpack.i.h.bf16 %v3655_v35  ;;  %v3656_v42 = vunpack.i.l.bf16 %v3655_v35  ;;  %v1631_v35 = vld [vmem:[%s4605_s26] sm:$0xff] }
 0xbb3   :  { %3297 = vmatpush1.bf16.msra.mxu0 %v3296_v33 }
 0xbb4   :  { %v1302_v39 = vsel %vm291_vm7, %v3651_v37, %v3652_v36  ;;  %v3298_v40 = vpack.c.bf16 %v3652_v36, %v3647_v28  ;;  %v1313_v48 = vsel %vm302_vm10, %v3656_v42, %v3657_v41  ;;  %v1312_v52 = vsel %vm302_vm10, %v1307_v11, %v3656_v42  ;;  %v1429_v11 = vld [vmem:[%s4604_s22] sm:$0xff] }
 0xbb5   :  { %v3300_v43 = vpack.c.bf16 %v1302_v39, %v1295_v38  ;;  %v3660_v44 = vpop.permute.xlu1 %3659  ;;  %v1329_v47 = vpop.permute.xlu0 %1328  ;;  %v1538_v36 = vld [vmem:[%s4606_s0] sm:$0xff]  ;;  %vm3782_vm7 = vmmov 1   ;;  %vm2499_vm10 = vcmask 261120  }
 0xbb6   :  { %v3662_v45 = vunpack.i.h.bf16 %v3660_v44  ;;  %v3661_v46 = vunpack.i.l.bf16 %v3660_v44  ;;  %3299 = vmatprep.subr.bf16.mxu0 %v3298_v40  ;;  %v3691_v37 = vld [vmem:[%s3792_s5] sm:$0x3]  ;;  %s3779_s5 = smov 7   ;;  %vm4455_vm8 = vmpackc.low %vm2324_vm6, %vm3782_vm7 }
 0xbb7   :  { %3301 = vmatpush1.bf16.msra.mxu0 %v3300_v43  ;;  %vm1724_vm14 = vcmp.gt.f32.partialorder %v3691_v37, 0.0 }
 0xbb8   :  { %v1323_v49 = vsel %vm313_vm9, %v3661_v46, %v3662_v45  ;;  %v1725_v38 = vsel %vm1724_vm14, 1, %v3777_v21 }
 0xbb9   :  { %v1317_v50 = vpop.permute.xlu1 %1316  ;;  %v3302_v51 = vpack.c.bf16 %v1323_v49, %v1313_v48  ;;  %v1327_v55 = vpop.permute.xlu0 %1326  ;;  %v1729_v41 = vrot.slane %v1725_v38, %v4059_v5  ;;  %v1915_v44 = vrot.slane %v1725_v38, %v4061_v6  ;;  %v1891_v38 = vld [vmem:[%s4616_s21] ss:$2 sm:$0x3] }
 0xbba   :  { %v1322_v53 = vsel %vm313_vm9, %v1317_v50, %v3661_v46  ;;  %v1332_v59 = vsel %vm324_vm11, %v1327_v55, %v1329_v47  ;;  %vm2398_vm9 = vcmask 663552  }
 0xbbb   :  { %v3304_v54 = vpack.c.bf16 %v1322_v53, %v1312_v52  ;;  %3303 = vmatprep.subr.bf16.mxu0 %v3302_v51  ;;  %vm1730_vm15 = vcmp.eq.s32.totalorder %v1729_v41, 1  ;;  %vm1916_vm0 = vcmp.eq.s32.totalorder %v1915_v44, 1  ;;  %v1901_v41 = vrot.slane %v1891_v38, %v4059_v5  ;;  %v2943_v44 = vld [vmem:[%s4616_s21 + $0x1] ss:$2 sm:$0x3] }
 0xbbd   :  { %v1331_v56 = vpop.permute.xlu1 %1330  ;;  %3305 = vmatpush1.bf16.msra.mxu0 %v3304_v54 }
 0xbbe   :  { %v1333_v57 = vsel %vm324_vm11, %v1329_v47, %v1331_v56  ;;  %vm2574_vm11 = vcmask 0  }
 0xbbf   :  { %1356 = vmatprep.subr.mxu0 %v1333_v57 }
 0xbc1   :  { %1357 = vmatpush1.msra.mxu0 %v1332_v59  ;;  %v1621_v59 = vld [vmem:[%s4607_s9] sm:$0xff] }
 0xbc2   :  { %2933 = vmatmul.mubr.msk.f32.vlgmr.msra.gmra.mrb[4].mxu0 %vm330_vm12, %v1336_v58 }
 0xbc3   :  { %1699 = vmatprep.mubr.f32.mxu0 %v3768_v3 }
 0xbca   :  { %v1423_v0 = vpop.permute.xlu0 %1422 }
 0xbce   :  { %v1415_v60 = vpop.permute.xlu1 %1414  ;;  %v1516_v16 = vpop.permute.xlu0 %1515 }
 0xbd2   :  { %v1508_v12 = vpop.permute.xlu1 %1507  ;;  %v1718_v45 = vpop.permute.xlu0 %1717 }
 0xbd6   :  { %v1710_v39 = vpop.permute.xlu1 %1709 }
 0xc95   :  { %v1406_v61 = vpop.f32.mrb[4].mxu0 }
 0xc96   :  { %v1417_v62 = vmul.f32 %v1415_v60, %v1406_v61  ;;  %v1408_v63 = vpop.f32.mrb[5].mxu0 }
 0xc97   :  { %v1418_v1 = vmul.f32 %v1415_v60, %v1408_v63 }
 0xc98   :  { %v1425_v2 = vadd.f32 %v1423_v0, %v1417_v62 }
 0xc99   :  { %v1426_v4 = vadd.f32 %v1423_v0, %v1418_v1  ;;  %v1613_v1 = vld [vmem:[%s4608_s13] sm:$0xff] }
 0xc9a   :  { %v1427_v10 = vmax.f32 %v1425_v2, 0.0 }
 0xc9b   :  { %v1428_v7 = vmax.f32 %v1426_v4, 0.0  ;;  %v1741_v4 = vld [vmem:[%s4609_s28] sm:$0xff] }
 0xc9d   :  { %1433 = vmatprep.subr.mxu1 %v1428_v7 }
 0xc9e   :  { %1434 = vmatpush1.msra.mxu1 %v1427_v10 }
 0xc9f   :  { %2934 = vmatmul.mubr.msk.f32.vlgmr.msra.gmra.mrb[10].mxu1 %vm426_vm13, %v1429_v11 }
 0xca0   :  { %1606 = vmatprep.mubr.f32.mxu1 %v3768_v3 }
 0xd72   :  { %v1499_v13 = vpop.f32.mrb[10].mxu1 }
 0xd73   :  { %v1510_v14 = vmul.f32 %v1508_v12, %v1499_v13  ;;  %v1501_v15 = vpop.f32.mrb[11].mxu1 }
 0xd74   :  { %v1511_v17 = vmul.f32 %v1508_v12, %v1501_v15  ;;  %v1742_v12 = vld [vmem:[%s4610_s1] sm:$0xff] }
 0xd75   :  { %v1518_v18 = vadd.f32 %v1516_v16, %v1510_v14 }
 0xd76   :  { %v1519_v19 = vadd.f32 %v1516_v16, %v1511_v17 }
 0xd77   :  { %v1520_v20 = vadd.f32 %v1518_v18, %v4212_v25 }
 0xd78   :  { %v1521_v22 = vadd.f32 %v1519_v19, %v4209_v32  ;;  %v1889_v19 = vld [vmem:[%s4611_s2] sm:$0xff] }
 0xd79   :  { %v2935_v23 = vmul.f32 -1.442695, %v1520_v20 }
 0xd7a   :  { %v2936_v24 = vmul.f32 -1.442695, %v1521_v22 }
 0xd7b   :  { %3671 = vpow2.f32 %v2935_v23 }
 0xd7c   :  { %3673 = vpow2.f32 %v2936_v24 }
 0xd85   :  { %v3672_v27 = vpop.eup %3671 }
 0xd86   :  { %v3674_v28 = vpop.eup %3673  ;;  %v1528_v29 = vadd.f32 1.0, %v3672_v27 }
 0xd87   :  { %v1529_v30 = vadd.f32 1.0, %v3674_v28  ;;  %v2177_v28 = vld [vmem:[%s4612_s7] sm:$0xff] }
 0xd88   :  { %3675 = vrcp.f32 %v1528_v29  ;;  %v2286_v29 = vld [vmem:[%s4613_s10] sm:$0x3] }
 0xd89   :  { %3677 = vrcp.f32 %v1529_v30 }
 0xd92   :  { %v3676_v31 = vpop.eup %3675 }
 0xd93   :  { %v3678_v26 = vpop.eup %3677  ;;  %v1534_v33 = vmul.f32 %v3676_v31, %v1520_v20 }
 0xd94   :  { %v1535_v34 = vmul.f32 %v3678_v26, %v1521_v22 }
 0xd95   :  { %v4306_v32 = vmul.f32 %v1534_v33, %v4065_v8 }
 0xd96   :  { %v4303_v25 = vmul.f32 %v1535_v34, %v4068_v9  ;;  %v2185_v34 = vld [vmem:[%s4614_s11] sm:$0xff] }
 0xd98   :  { %1542 = vmatprep.subr.mxu1 %v4303_v25  ;;  %1635 = vmatprep.subr.mxu0 %v4303_v25 }
 0xd99   :  { %1543 = vmatpush1.msra.mxu1 %v4306_v32  ;;  %1636 = vmatpush1.msra.mxu0 %v4306_v32 }
 0xd9a   :  { %2938 = vmatmul.mubr.msk.f32.vlgmr.msra.gmra.mrb[6].mxu0 %vm426_vm13, %v1631_v35  ;;  %3049 = vmatprep.subr.mxu0 %v3768_v3  ;;  %v2294_v35 = vld [vmem:[%s4615_s17] sm:$0x3] }
 0xd9b   :  { %3044 = vmatprep.subr.mxu1 %v3768_v3  ;;  %2937 = vmatmul.mubr.msk.f32.vlgmr.msra.gmra.mrb[12].mxu1 %vm426_vm13, %v1538_v36 }
 0xd9c   :  { %3046 = vmatprep.mubr.msk.f32.mxu1 %vm3780_vm4, %v3768_v3  ;;  %3051 = vmatprep.mubr.msk.f32.mxu0 %vm3780_vm4, %v3768_v3 }
 0xe6d   :  { %v1701_v40 = vpop.f32.mrb[6].mxu0 }
 0xe6e   :  { %v1712_v42 = vmul.f32 %v1710_v39, %v1701_v40  ;;  %v1703_v43 = vpop.f32.mrb[7].mxu0  ;;  %v1608_v0 = vpop.f32.mrb[12].mxu1 }
 0xe6f   :  { %v1713_v46 = vmul.f32 %v1710_v39, %v1703_v43  ;;  %v1610_v2 = vpop.f32.mrb[13].mxu1 }
 0xe70   :  { %v1720_v47 = vadd.f32 %v1718_v45, %v1712_v42  ;;  %v1905_v42 = vrot.slane %v1891_v38, %v4061_v6 }
 0xe71   :  { %v1721_v48 = vadd.f32 %v1718_v45, %v1713_v46 }
 0xe72   :  { %v1722_v49 = vmax.f32 %v1720_v47, 0.0 }
 0xe73   :  { %v1723_v50 = vmax.f32 %v1721_v48, 0.0 }
 0xe74   :  { %v1736_v51 = vsel %vm1730_vm15, %v1722_v49, 0.0  ;;  %v1731_v21 = vsel %vm1730_vm15, %v1722_v49, -1e+30  ;;  %v2091_v49 = vrot.slane %v2943_v44, %v4059_v5  ;;  %v2304_v5 = vld [vmem:[%s4618_s29] sm:$0xff] }
 0xe75   :  { %1928 = vrot.lane.b32.xlu1 %v1736_v51, %s3779_s5  ;;  %v1925_v52 = vsel %vm1916_vm0, %v1723_v50, 0.0  ;;  %v1917_v53 = vsel %vm1916_vm0, %v1723_v50, -1e+30  ;;  %v1919_v54 = vsel %vm1918_vm1, %v1731_v21, -inf  ;;  %v1733_v57 = vsel %vm1732_vm3, %v1731_v21, -inf }
 0xe76   :  { %1930 = vrot.lane.b32.xlu0 %v1925_v52, %s3779_s5  ;;  %v1921_v55 = vsel %vm1920_vm2, %v1917_v53, -inf  ;;  %v1737_v58 = vsel %vm1732_vm3, %v1736_v51, 0.0  ;;  %v2095_v50 = vrot.slane %v2943_v44, %v4061_v6  ;;  %v2305_v6 = vld [vmem:[%s4618_s29 + $0x8] sm:$0xff] }
 0xe77   :  { %v1922_v56 = vmax.f32 %v1919_v54, %v1921_v55 }
 0xe95   :  { %1734 = vmax.xlane.f32.xlu0 %v1733_v57 }
 0xe99   :  { %1738 = vadd.xlane.f32.xlu1 %v1737_v58 }
 0xe9d   :  { %1923 = vmax.xlane.f32.xlu1 %v1922_v56 }
 0xeae   :  { %1624 = vperm.xlu1 %3522, %v1621_v59   ;;  %v2102_v59 = vld [vmem:[%s4617_s25] sm:$0xff] }
 0xee7   :  { %v1929_v60 = vpop.permute.xlu1 %1928 }
 0xee8   :  { %v1931_v61 = vpop.permute.xlu0 %1930 }
 0xee9   :  { %v1933_v62 = vsel %vm1932_vm5, %v1929_v60, %v1931_v61  ;;  %v3781_v60 = vmov 0.0|0.0   ;;  %v4366_v61 = vpack.c.bf16 %v2305_v6, %v2304_v5  ;;  %v2412_v5 = vld [vmem:[%s4619_s3 + $0x60] sm:$0xff]  ;;  %v2413_v6 = vld [vmem:[%s4619_s3 + $0x68] sm:$0xff] }
 0xeea   :  { %v1935_v63 = vsel %vm1732_vm3, %v1933_v62, 0.0  ;;  %v2306_v62 = vld [vmem:[%s4618_s29 + $0x10] sm:$0xff] }
 0xeeb   :  { %1936 = vadd.xlane.f32.xlu0 %v1935_v63  ;;  %v2307_v63 = vld [vmem:[%s4618_s29 + $0x18] sm:$0xff] }
 0xf01   :  { %1616 = vperm.xlu0 %3521, %v1613_v1   ;;  %v2308_v1 = vld [vmem:[%s4618_s29 + $0x20] sm:$0xff] }
 0xf22   :  { %v1735_v7 = vpop.xlane.xlu0 %1734 }
 0xf23   :  { %3050 = vmatpush3.msra.mxu0 %v1735_v7  ;;  %v2310_v7 = vld [vmem:[%s4618_s29 + $0x30] sm:$0xff] }
 0xf24   :  { %3052 = vmatmul.mubr.msk.f32.vlgmr.msra.gmra.mrb[8].mxu0 %vm426_vm13, %v1741_v4  ;;  %3059 = vmatprep.subr.mxu0 %v3768_v3 }
 0xf25   :  { %3061 = vmatprep.mubr.msk.f32.mxu0 %vm3780_vm4, %v3768_v3 }
 0xf26   :  { %v1739_v10 = vpop.xlane.xlu1 %1738 }
 0xf27   :  { %v1740_v11 = vmul.f32 0.012345679, %v1739_v10  ;;  %v2311_v10 = vld [vmem:[%s4618_s29 + $0x38] sm:$0xff] }
 0xf29   :  { %3045 = vmatpush3.msra.mxu1 %v1740_v11  ;;  %v4383_v11 = vpack.c.bf16 %v2311_v10, %v2310_v7  ;;  %v4461_v10 = vld [vmem:[%s4619_s3 + $0x70] sm:$0xff] }
 0xf2a   :  { %v1924_v13 = vpop.xlane.xlu1 %1923  ;;  %3047 = vmatmul.mubr.msk.f32.vlgmr.msra.gmra.mrb[14].mxu1 %vm426_vm13, %v1742_v12  ;;  %3054 = vmatprep.subr.mxu1 %v3768_v3 }
 0xf2b   :  { %3060 = vmatpush3.msra.mxu0 %v1924_v13  ;;  %3056 = vmatprep.mubr.msk.f32.mxu1 %vm3780_vm4, %v3768_v3  ;;  %v2313_v13 = vld [vmem:[%s4618_s29 + $0x48] sm:$0xff] }
 0xf2c   :  { %3062 = vmatmul.mubr.msk.f32.vlgmr.msra.gmra.mrb[10].mxu0 %vm426_vm13, %v1741_v4 }
 0xf2d   :  { %2279 = vmatprep.mubr.f32.mxu0 %v3768_v3 }
 0xf2e   :  { %v1625_v37 = vpop.permute.xlu1 %1624 }
 0xf78   :  { %v1937_v14 = vpop.xlane.xlu0 %1936 }
 0xf79   :  { %v1938_v15 = vmul.f32 0.012345679, %v1937_v14 }
 0xf7b   :  { %3055 = vmatpush3.msra.mxu1 %v1938_v15  ;;  %v2314_v15 = vld [vmem:[%s4618_s29 + $0x50] sm:$0xff] }
 0xf7c   :  { %3057 = vmatmul.mubr.msk.f32.vlgmr.msra.gmra.mrb[16].mxu1 %vm426_vm13, %v1742_v12  ;;  %v2312_v12 = vld [vmem:[%s4618_s29 + $0x40] sm:$0xff] }
 0xf7d   :  { %2170 = vmatprep.mubr.f32.mxu1 %v3768_v3  ;;  %v4389_v14 = vpack.c.bf16 %v2313_v13, %v2312_v12  ;;  %v2415_v12 = vld [vmem:[%s4619_s3 + $0x78] sm:$0x1] }
 0xf7e   :  { %v3353_v13 = vpack.c.bf16 %v2415_v12, %v4461_v10 }
 0xf80   :  { %v1617_v36 = vpop.permute.xlu0 %1616 }
 0xf81   :  { %v1619_v39 = vmul.f32 %v1617_v36, %v1608_v0  ;;  %v1620_v40 = vmul.f32 %v1617_v36, %v1610_v2  ;;  %v4371_v0 = vpack.c.bf16 %v2307_v63, %v2306_v62  ;;  %v2309_v2 = vld [vmem:[%s4618_s29 + $0x28] sm:$0xff]  ;;  %v4449_v62 = vpack.c.bf16 %v2413_v6, %v2412_v5  ;;  %v2318_v63 = vld [vmem:[%s4618_s29 + $0x70] sm:$0xff] }
 0xf82   :  { %v4377_v4 = vpack.c.bf16 %v2309_v2, %v2308_v1  ;;  %v2319_v1 = vld [vmem:[%s4618_s29 + $0x78] sm:$0x1] }
 0xf83   :  { %v1627_v45 = vadd.f32 %v1625_v37, %v1619_v39  ;;  %v1628_v46 = vadd.f32 %v1625_v37, %v1620_v40  ;;  %v2400_v40 = vld [vmem:[%s4619_s3] sm:$0xff]  ;;  %v3328_v2 = vpack.c.bf16 %v2319_v1, %v2318_v63 }
 0xf85   :  { %v1629_v51 = vmax.f32 %v1627_v45, 0.0  ;;  %v1630_v21 = vmax.f32 %v1628_v46, 0.0  ;;  %v2402_v45 = vld [vmem:[%s4619_s3 + $0x10] sm:$0xff]  ;;  %v2403_v46 = vld [vmem:[%s4619_s3 + $0x18] sm:$0xff] }
 0xff7   :  { %v1885_v16 = vpop.f32.mrb[8].mxu0 }
 0xff8   :  { %v3053_v17 = vpop.f32.mrb[9].mxu0 }
 0xffd   :  { %v1812_v18 = vpop.f32.mrb[14].mxu1 }
 0xffe   :  { %v1886_v20 = vadd.f32 %v1885_v16, %v1812_v18  ;;  %v3048_v22 = vpop.f32.mrb[15].mxu1  ;;  %v2315_v16 = vld [vmem:[%s4618_s29 + $0x58] sm:$0xff] }
 0xfff   :  { %v2075_v23 = vpop.f32.mrb[10].mxu0  ;;  %v4395_v17 = vpack.c.bf16 %v2315_v16, %v2314_v15 }
0x1000   :  { %v1890_v24 = vadd.f32 %v1889_v19, %v1886_v20  ;;  %v3063_v27 = vpop.f32.mrb[11].mxu0 }
0x1002   :  { %1894 = vperm.xlu1 %3522, %v1890_v24  }
0x1006   :  { %2180 = vperm.xlu1 %3522, %v2177_v28  }
0x100a   :  { %2289 = vperm.xlu1 %3522, %v2286_v29  }
0x104f   :  { %v2005_v30 = vpop.f32.mrb[16].mxu1 }
0x1050   :  { %v2076_v31 = vadd.f32 %v2075_v23, %v2005_v30  ;;  %v3058_v26 = vpop.f32.mrb[17].mxu1 }
0x1052   :  { %v2079_v33 = vadd.f32 %v2076_v31, %v1889_v19 }
0x1054   :  { %2084 = vperm.xlu0 %3521, %v2079_v33  }
0x1058   :  { %2188 = vperm.xlu0 %3521, %v2185_v34  }
0x105c   :  { %2297 = vperm.xlu0 %3521, %v2294_v35  }
0x1081   :  { %v1895_v43 = vpop.permute.xlu1 %1894 }
0x1082   :  { %v1908_v47 = vmul.f32 %v1901_v41, %v1895_v43  ;;  %v1909_v48 = vmul.f32 %v1905_v42, %v1895_v43  ;;  %v2211_v43 = vld [vmem:[%s4620_s8] sm:$0x3] }
0x1084   :  { %v1910_v53 = vadd.f32 %v1908_v47, %v1629_v51  ;;  %v1911_v54 = vadd.f32 %v1909_v48, %v1630_v21  ;;  %v2405_v47 = vld [vmem:[%s4619_s3 + $0x28] sm:$0xff]  ;;  %v2408_v21 = vld [vmem:[%s4619_s3 + $0x40] sm:$0xff] }
0x1085   :  { %v2181_v18 = vpop.permute.xlu1 %2180 }
0x1089   :  { %v2290_v15 = vpop.permute.xlu1 %2289 }
0x10d3   :  { %v2085_v52 = vpop.permute.xlu0 %2084 }
0x10d4   :  { %v2098_v55 = vmul.f32 %v2091_v49, %v2085_v52  ;;  %v2099_v56 = vmul.f32 %v2095_v50, %v2085_v52  ;;  %v2406_v49 = vld [vmem:[%s4619_s3 + $0x30] sm:$0xff]  ;;  %v2407_v50 = vld [vmem:[%s4619_s3 + $0x38] sm:$0xff]  ;;  %v2409_v52 = vld [vmem:[%s4619_s3 + $0x48] sm:$0xff] }
0x10d5   :  { %v4428_v51 = vpack.c.bf16 %v2407_v50, %v2406_v49  ;;  %v2498_v49 = vld [vmem:[#allocation3] sm:$0x1] }
0x10d6   :  { %v2100_v57 = vadd.f32 %v2098_v55, %v1910_v53  ;;  %v2101_v58 = vadd.f32 %v2099_v56, %v1911_v54  ;;  %v4434_v53 = vpack.c.bf16 %v2409_v52, %v2408_v21  ;;  %v2410_v54 = vld [vmem:[%s4619_s3 + $0x50] sm:$0xff]  ;;  %v2411_v55 = vld [vmem:[%s4619_s3 + $0x58] sm:$0xff] }
0x10d7   :  { %v2189_v23 = vpop.permute.xlu0 %2188  ;;  %v4440_v56 = vpack.c.bf16 %v2411_v55, %v2410_v54 }
0x10d8   :  { %2106 = vmatprep.subr.mxu1 %v2101_v58  ;;  %v2317_v58 = vld [vmem:[%s4618_s29 + $0x68] sm:$0xff] }
0x10d9   :  { %2107 = vmatpush1.msra.mxu1 %v2100_v57  ;;  %v2316_v57 = vld [vmem:[%s4618_s29 + $0x60] sm:$0xff] }
0x10da   :  { %2944 = vmatmul.mubr.msk.f32.vlgmr.msra.gmra.mrb[18].mxu1 %vm426_vm13, %v2102_v59  ;;  %3306 = vmatprep.subr.bf16.mxu1 %v3781_v60  ;;  %v3325_v59 = vpack.c.bf16 %v2317_v58, %v2316_v57 }
0x10db   :  { %3096 = vmatprep.mubr.msk.f32.mxu1 %vm3780_vm4, %v3768_v3  ;;  %3308 = vmatpush3.bf16.msra.mxu1 %v4366_v61 }
0x10dc   :  { %3309 = vmatprep.subr.bf16.mxu1 %v3781_v60 }
0x10df   :  { %3311 = vmatpush3.bf16.msra.mxu1 %v4371_v0 }
0x10e0   :  { %3312 = vmatprep.subr.bf16.mxu1 %v3781_v60 }
0x10e3   :  { %3314 = vmatpush3.bf16.msra.mxu1 %v4377_v4 }
0x10e4   :  { %3315 = vmatprep.subr.bf16.mxu1 %v3781_v60 }
0x10e7   :  { %3317 = vmatpush3.bf16.msra.mxu1 %v4383_v11 }
0x10e8   :  { %3318 = vmatprep.subr.bf16.mxu1 %v3781_v60 }
0x10eb   :  { %3320 = vmatpush3.bf16.msra.mxu1 %v4389_v14 }
0x10ec   :  { %3321 = vmatprep.subr.bf16.mxu1 %v3781_v60 }
0x10ef   :  { %3323 = vmatpush3.bf16.msra.mxu1 %v4395_v17 }
0x10f0   :  { %3324 = vmatprep.subr.bf16.mxu1 %v3781_v60 }
0x10f3   :  { %3326 = vmatpush3.bf16.msra.mxu1 %v3325_v59 }
0x10f4   :  { %3327 = vmatprep.subr.bf16.mxu1 %v3781_v60 }
0x10f7   :  { %3330 = vmatpush3.bf16.msk.msra.mxu1 %vm4455_vm8, %v3328_v2 }
0x10f8   :  { %3356 = vmatprep.subr.bf16.mxu1 %v3781_v60 }
0x11ad   :  { %v2172_v19 = vpop.f32.mrb[18].mxu1 }
0x11ae   :  { %v2183_v20 = vmul.f32 %v2181_v18, %v2172_v19  ;;  %v2174_v22 = vpop.f32.mrb[19].mxu1 }
0x11af   :  { %v2184_v24 = vmul.f32 %v2181_v18, %v2174_v22 }
0x11b0   :  { %v2191_v27 = vadd.f32 %v2189_v23, %v2183_v20  ;;  %v2298_v20 = vpop.permute.xlu0 %2297 }
0x11b1   :  { %v2192_v28 = vadd.f32 %v2189_v23, %v2184_v24  ;;  %v2494_v23 = vld [vmem:[%s4037_s27] sm:$0xff]  ;;  %v2495_v24 = vld [vmem:[%s4037_s27 + $0x8] sm:$0xff] }
0x11b2   :  { %v2193_v29 = vadd.f32 %v2191_v27, %v4306_v32 }
0x11b3   :  { %v2194_v30 = vadd.f32 %v2192_v28, %v4303_v25  ;;  %v2401_v25 = vld [vmem:[%s4619_s3 + $0x8] sm:$0xff] }
0x11b4   :  { %v2945_v31 = vmul.f32 -1.442695, %v2193_v29  ;;  %v4407_v44 = vpack.c.bf16 %v2401_v25, %v2400_v40  ;;  %v2416_v40 = vld [vmem:[%s4624_s19] sm:$0x1] }
0x11b5   :  { %v2946_v26 = vmul.f32 -1.442695, %v2194_v30 }
0x11b6   :  { %3679 = vpow2.f32 %v2945_v31 }
0x11b7   :  { %3681 = vpow2.f32 %v2946_v26 }
0x11c0   :  { %v3680_v33 = vpop.eup %3679 }
0x11c1   :  { %v3682_v34 = vpop.eup %3681  ;;  %v2201_v35 = vadd.f32 1.0, %v3680_v33 }
0x11c2   :  { %v2202_v36 = vadd.f32 1.0, %v3682_v34 }
0x11c3   :  { %3683 = vrcp.f32 %v2201_v35 }
0x11c4   :  { %3685 = vrcp.f32 %v2202_v36 }
0x11cd   :  { %v3684_v37 = vpop.eup %3683 }
0x11ce   :  { %v3686_v38 = vpop.eup %3685  ;;  %v2207_v32 = vmul.f32 %v3684_v37, %v2193_v29  ;;  %v3357_v29 = vpack.c.bf16 %v2495_v24, %v2494_v23 }
0x11cf   :  { %v2208_v39 = vmul.f32 %v3686_v38, %v2194_v30 }
0x11d0   :  { %v2209_v42 = vmul.f32 %v2207_v32, %v4065_v8  ;;  %v2404_v8 = vld [vmem:[%s4619_s3 + $0x20] sm:$0xff] }
0x11d1   :  { %v2210_v41 = vmul.f32 %v2208_v39, %v4068_v9  ;;  %v4414_v9 = vpack.c.bf16 %v2403_v46, %v2402_v45  ;;  %v4422_v48 = vpack.c.bf16 %v2405_v47, %v2404_v8  ;;  %v2320_v32 = vld [vmem:[%s4623_s14] sm:$0x1] }
0x11d3   :  { %2215 = vmatprep.subr.mxu0 %v2210_v41 }
0x11d4   :  { %2216 = vmatpush1.msra.mxu0 %v2209_v42 }
0x11d5   :  { %2947 = vmatmul.mubr.msk.f32.vlgmr.msra.gmra.mrb[12].mxu0 %vm426_vm13, %v2211_v43  ;;  %3331 = vmatprep.subr.bf16.mxu0 %v3781_v60 }
0x11d6   :  { %3333 = vmatpush3.bf16.msra.mxu0 %v4407_v44  ;;  %3131 = vmatprep.mubr.msk.f32.mxu0 %vm3780_vm4, %v3768_v3 }
0x11d7   :  { %3334 = vmatprep.subr.bf16.mxu0 %v3781_v60 }
0x11da   :  { %3336 = vmatpush3.bf16.msra.mxu0 %v4414_v9 }
0x11db   :  { %3337 = vmatprep.subr.bf16.mxu0 %v3781_v60 }
0x11de   :  { %3339 = vmatpush3.bf16.msra.mxu0 %v4422_v48 }
0x11df   :  { %3340 = vmatprep.subr.bf16.mxu0 %v3781_v60 }
0x11e2   :  { %3342 = vmatpush3.bf16.msra.mxu0 %v4428_v51 }
0x11e3   :  { %3343 = vmatprep.subr.bf16.mxu0 %v3781_v60 }
0x11e6   :  { %3345 = vmatpush3.bf16.msra.mxu0 %v4434_v53 }
0x11e7   :  { %3346 = vmatprep.subr.bf16.mxu0 %v3781_v60 }
0x11ea   :  { %3348 = vmatpush3.bf16.msra.mxu0 %v4440_v56 }
0x11eb   :  { %3349 = vmatprep.subr.bf16.mxu0 %v3781_v60 }
0x11ee   :  { %3351 = vmatpush3.bf16.msra.mxu0 %v4449_v62 }
0x11ef   :  { %3352 = vmatprep.subr.bf16.mxu0 %v3781_v60 }
0x11f2   :  { %3355 = vmatpush3.bf16.msk.msra.mxu0 %vm4455_vm8, %v3353_v13 }
0x11f3   :  { %3362 = vmatprep.subr.bf16.mxu0 %v3781_v60 }
0x12a8   :  { %v2281_v16 = vpop.f32.mrb[12].mxu0 }
0x12a9   :  { %v2292_v18 = vmul.f32 %v2290_v15, %v2281_v16  ;;  %v2283_v19 = vpop.f32.mrb[13].mxu0 }
0x12aa   :  { %v2293_v22 = vmul.f32 %v2290_v15, %v2283_v19 }
0x12ab   :  { %v2300_v27 = vadd.f32 %v2298_v20, %v2292_v18 }
0x12ac   :  { %v2301_v28 = vadd.f32 %v2298_v20, %v2293_v22 }
0x12ad   :  { %v2302_v30 = vmax.f32 %v2300_v27, 0.0 }
0x12ae   :  { %v2303_v31 = vmax.f32 %v2301_v28, 0.0 }
0x12af   :  { %3097 = vmatmul.mubr.msk.f32.vlgmr.msra.gmra.mrb[20].mxu1 %vm1732_vm3, %v2302_v30  ;;  %v2417_v26 = vrot.slane %v2302_v30, 1 }
0x12b0   :  { %v2692_v33 = vrot.slane %v2303_v31, 1  ;;  %3358 = vmatpush3.bf16.msra.mxu1 %v3357_v29  ;;  %3142 = vmatprep.mubr.msk.f32.mxu1 %vm3780_vm4, %v3768_v3 }
0x12b1   :  { %2693 = vrot.lane.b32.xlu1 %v2417_v26, %s3779_s5  ;;  %3132 = vmatmul.mubr.msk.f32.vlgmr.msra.gmra.mrb[14].mxu0 %vm1732_vm3, %v2417_v26 }
0x12b2   :  { %2695 = vrot.lane.b32.xlu0 %v2692_v33, %s3779_s5  ;;  %3364 = vmatpush3.bf16.msra.mxu0 %v4366_v61  ;;  %v2591_v61 = vld [vmem:[%s4618_s29 + $0x78] sm:$0x1] }
0x12b3   :  { %3365 = vmatprep.subr.bf16.mxu0 %v3781_v60  ;;  %3177 = vmatprep.mubr.msk.f32.mxu0 %vm3780_vm4, %v3768_v3 }
0x12b4   :  { %3359 = vmatprep.subr.bf16.mxu1 %v3781_v60 }
0x12b5   :  { %2594 = vrot.lane.b32.xlu1 %v2302_v30, %s3779_s5 }
0x12b6   :  { %2596 = vrot.lane.b32.xlu0 %v2303_v31, %s3779_s5  ;;  %3367 = vmatpush3.bf16.msra.mxu0 %v4371_v0  ;;  %v3384_v0 = vpack.c.bf16 %v2591_v61, %v2318_v63 }
0x12b7   :  { %3368 = vmatprep.subr.bf16.mxu0 %v3781_v60 }
0x12ba   :  { %3370 = vmatpush3.bf16.msra.mxu0 %v4377_v4  ;;  %v2496_v4 = vld [vmem:[%s4037_s27 + $0x10] sm:$0xff] }
0x12bb   :  { %3371 = vmatprep.subr.bf16.mxu0 %v3781_v60 }
0x12be   :  { %3373 = vmatpush3.bf16.msra.mxu0 %v4383_v11  ;;  %v2497_v11 = vld [vmem:[%s4037_s27 + $0x18] sm:$0xff]  ;;  %s3783_s27 = smov [#allocation4]  }
0x12bf   :  { %3374 = vmatprep.subr.bf16.mxu0 %v3781_v60  ;;  %s2860_s24 = sshll.u32 %s3783_s27, 4  ;;  %s2861_s24 = int_to_ptr.vmem [resolvable:$true] %s2860_s24 }
0x12c0   :  { %s3692_s6 = scalar_lea.vmem %s2861_s24, 32  ;;  %p3697_p1 = scmp.lt.s32.totalorder %s2861_s24, %s2861_s24 }
0x12c1   :  { %p3693_p0 = scmp.ne.s32.totalorder %s2861_s24, %s3692_s6  ;;  %p3698_p2 = scmp.lt.s32.totalorder %s3692_s6, %s3692_s6 }
0x12c2   :  { %3376 = vmatpush3.bf16.msra.mxu0 %v4389_v14  ;;  %v3360_v14 = vpack.c.bf16 %v2497_v11, %v2496_v4 }
0x12c3   :  { %3377 = vmatprep.subr.bf16.mxu0 %v3781_v60  ;;  %p3699_p3 = por %p3698_p2, %p3697_p1 }
0x12c4   :  { %3361 = vmatpush3.bf16.msra.mxu1 %v3360_v14 }
0x12c5   :  { %3387 = vmatprep.subr.bf16.mxu1 %v3781_v60  ;;  %p3700_p4 = pnand %p3699_p3, %p3693_p0 }
0x12c6   :  { %3379 = vmatpush3.bf16.msra.mxu0 %v4395_v17 }
0x12c7   :  { %3380 = vmatprep.subr.bf16.mxu0 %v3781_v60 }
0x12ca   :  { %3382 = vmatpush3.bf16.msra.mxu0 %v3325_v59 }
0x12cb   :  { %3383 = vmatprep.subr.bf16.mxu0 %v3781_v60 }
0x12ce   :  { %3386 = vmatpush3.bf16.msk.msra.mxu0 %vm4455_vm8, %v3384_v0 }
0x12cf   :  { %3412 = vmatprep.subr.bf16.mxu0 %v3781_v60 }
0x1323   :  { %v2694_v17 = vpop.permute.xlu1 %2693 }
0x1324   :  { %v2696_v34 = vpop.permute.xlu0 %2695 }
0x1325   :  { %v2697_v35 = vsel %vm1932_vm5, %v2694_v17, %v2696_v34 }
0x1327   :  { %v2595_v36 = vpop.permute.xlu1 %2594 }
0x1328   :  { %v2597_v37 = vpop.permute.xlu0 %2596 }
0x1329   :  { %v2598_v38 = vsel %vm1932_vm5, %v2595_v36, %v2597_v37 }
0x132a   :  { %3178 = vmatmul.mubr.msk.f32.vlgmr.msra.gmra.mrb[16].mxu0 %vm1732_vm3, %v2598_v38 }
0x132b   :  { %3414 = vmatpush3.bf16.msra.mxu0 %v3357_v29  ;;  %3223 = vmatprep.mubr.msk.f32.mxu0 %vm3780_vm4, %v3768_v3 }
0x132c   :  { %3415 = vmatprep.subr.bf16.mxu0 %v3781_v60 }
0x132f   :  { %3417 = vmatpush3.bf16.msra.mxu0 %v3360_v14 }
0x1382   :  { %v2394_v39 = vpop.f32.mrb[20].mxu1 }
0x1383   :  { %v2395_v25 = vadd.f32 %v2394_v39, %v2320_v32  ;;  %v3098_v41 = vpop.f32.mrb[21].mxu1 }
0x1384   :  { %v2489_v42 = vpop.f32.mrb[14].mxu0 }
0x1385   :  { %2399 = vst.msk [vmem:[#allocation4] sm:$0x1] %vm2398_vm9, %v2395_v25  ;;  %v2490_v43 = vadd.f32 %v2489_v42, %v2416_v40  ;;  %v3133_v45 = vpop.f32.mrb[15].mxu0 }
0x1387   :  { %v2493_v46 = vmax.f32 %v2490_v43, 0.0 }
0x1389   :  { %3143 = vmatmul.mubr.msk.f32.vlgmr.msra.gmra.mrb[22].mxu1 %vm2499_vm10, %v2493_v46 }
0x138a   :  { %3389 = vmatpush3.bf16.msra.mxu1 %v4407_v44  ;;  %3212 = vmatprep.mubr.msk.f32.mxu1 %vm3780_vm4, %v3768_v3  ;;  %v2690_v3 = vld [vmem:[%s4619_s3 + $0x78] sm:$0x1] }
0x138b   :  { %3390 = vmatprep.subr.bf16.mxu1 %v3781_v60  ;;  %v3409_v44 = vpack.c.bf16 %v2690_v3, %v4461_v10 }
0x138e   :  { %3392 = vmatpush3.bf16.msra.mxu1 %v4414_v9  ;;  %v2592_v9 = vld [vmem:[%s4623_s14] sm:$0x1] }
0x138f   :  { %3393 = vmatprep.subr.bf16.mxu1 %v3781_v60 }
0x1392   :  { %3395 = vmatpush3.bf16.msra.mxu1 %v4422_v48 }
0x1393   :  { %3396 = vmatprep.subr.bf16.mxu1 %v3781_v60 }
0x1396   :  { %3398 = vmatpush3.bf16.msra.mxu1 %v4428_v51 }
0x1397   :  { %3399 = vmatprep.subr.bf16.mxu1 %v3781_v60 }
0x139a   :  { %3401 = vmatpush3.bf16.msra.mxu1 %v4434_v53 }
0x139b   :  { %3402 = vmatprep.subr.bf16.mxu1 %v3781_v60 }
0x139e   :  { %3404 = vmatpush3.bf16.msra.mxu1 %v4440_v56 }
0x139f   :  { %3405 = vmatprep.subr.bf16.mxu1 %v3781_v60 }
0x13a2   :  { %3407 = vmatpush3.bf16.msra.mxu1 %v4449_v62 }
0x13a3   :  { %3408 = vmatprep.subr.bf16.mxu1 %v3781_v60  ;;  %v2691_v60 = vld [vmem:[%s4624_s19] sm:$0x1] }
0x13a6   :  { %3411 = vmatpush3.bf16.msk.msra.mxu1 %vm4455_vm8, %v3409_v44 }
0x13a9   :  { %3213 = vmatmul.mubr.msk.f32.vlgmr.msra.gmra.mrb[24].mxu1 %vm1732_vm3, %v2697_v35 }
0x13fd   :  { %v2670_v8 = vpop.f32.mrb[16].mxu0 }
0x13fe   :  { %v2671_v47 = vadd.f32 %v2670_v8, %v2592_v9  ;;  %v3179_v48 = vpop.f32.mrb[17].mxu0 }
0x1400   :  { %2674 = vst.msk [vmem:[#allocation4 + $0x1] sm:$0x1] %vm2398_vm9, %v2671_v47 }
0x145c   :  { %v2569_v50 = vpop.f32.mrb[22].mxu1 }
0x145d   :  { %v2570_v51 = vadd.f32 %v2569_v50, %v2498_v49  ;;  %v3144_v21 = vpop.f32.mrb[23].mxu1 }
0x145f   :  { %3687 = vtanh.f32 %v2570_v51 }
0x1469   :  { %v3688_v52 = vpop.eup %3687 }
0x146a   :  { %2575 = vst.msk [vmem:[%s4050_s30] sm:$0x1] %vm2574_vm11, %v3688_v52 }
0x147c   :  { %v2769_v53 = vpop.f32.mrb[24].mxu1 }
0x147d   :  { %v2770_v54 = vadd.f32 %v2769_v53, %v2691_v60  ;;  %v3214_v55 = vpop.f32.mrb[25].mxu1 }
0x147f   :  { %v2773_v56 = vmax.f32 %v2770_v54, 0.0 }
0x1481   :  { %3224 = vmatmul.mubr.msk.f32.vlgmr.msra.gmra.mrb[18].mxu0 %vm2499_vm10, %v2773_v56 }
0x1482   :  { %3703 = shalt.err (!%p3700_p4)
}
0x1483   :  { %s3704_s12 = scalar_lea.hbm %s4045_s20, 32 }
0x1484   :  { %p3705_p5 = scmp.ne.s32.totalorder %s4045_s20, %s3704_s12  ;;  %p3708_p6 = scmp.lt.u32.totalorder %s3704_s12, %s4045_s20 }
0x1486   :  { %p3710_p7 = pnand %p3708_p6, %p3705_p5 }
0x1488   :  { %3713 = shalt.err (!%p3710_p7)
}
0x1489   :  { %2863 = dma.vmem_to_hbm [thread:$0]  %s2861_s24, 32, %s4045_s20, [#allocation5]   ;;  %v2778_v57 = vld [vmem:[#allocation3] sm:$0x1] }
0x1554   :  { %v2848_v58 = vpop.f32.mrb[18].mxu0 }
0x1555   :  { %v2849_v59 = vadd.f32 %v2848_v58, %v2778_v57  ;;  %v3225_v5 = vpop.f32.mrb[19].mxu0 }
0x1557   :  { %3689 = vtanh.f32 %v2849_v59 }
0x1561   :  { %v3690_v6 = vpop.eup %3689 }
0x1562   :  { %2853 = vst.msk [vmem:[%s4050_s30 + $0x1] sm:$0x1] %vm2574_vm11, %v3690_v6 }
0x1563   :  { %3714 = dma.done.wait [#allocation5], 32  }
0x1564   :  { %3715 = vsyncadd [#allocation5], 4294967264 }
0x1565   :  { %2871 = vsyncpa [#allocation5], 1 }

</bundles_post_ra>
